<compile_context>
chip_gen: v7x
topology: tpu7x:2x2x1
jax: 0.10.0
libtpu: 0.0.40
codegen_flags: <defaults>
</compile_context>

<pallas_src>
import numpy as np
import jax
import jax.numpy as jnp
from jax import lax
from jax.experimental import pallas as pl
from jax.experimental.pallas import tpu as pltpu

N_FFT = 2048
HOP = 300
WIN_LEN = 1200
N_FREQ = N_FFT // 2 + 1                     # 1025 one-sided bins
WIN_OFF = (N_FFT - WIN_LEN) // 2            # 424: window offset inside the n_fft frame
K_PAD = ((WIN_LEN + 127) // 128) * 128      # 1280: contraction dim (window support, lane-padded)
TN = 256                                    # frequency-bin tile (MXU output width on v6e/v7x)
TM_TARGET = 256                             # frame-row tile target


# ----------------------------- Pallas kernel ------------------------------ #
def _power_loss_kernel(fs_ref, fy_ref, cos_ref, sin_ref, d2_ref):
    j = pl.program_id(1)                    # frequency-tile index (reduction axis)

    @pl.when(j == 0)
    def _():
        d2_ref[...] = jnp.zeros_like(d2_ref)

    fs = fs_ref[...]                        # (TM, K_PAD) bf16, window already folded in
    fy = fy_ref[...]                        # (TM, K_PAD) bf16
    c = cos_ref[...]                        # (K_PAD, TN) bf16, = diag(w) @ cos
    s = sin_ref[...]                        # (K_PAD, TN) bf16, = diag(w) @ (-sin)

    rs = jnp.dot(fs, c, preferred_element_type=jnp.float32)
    im_s = jnp.dot(fs, s, preferred_element_type=jnp.float32)
    ry = jnp.dot(fy, c, preferred_element_type=jnp.float32)
    im_y = jnp.dot(fy, s, preferred_element_type=jnp.float32)

    mag_s = jnp.sqrt(rs * rs + im_s * im_s)
    mag_y = jnp.sqrt(ry * ry + im_y * im_y)
    diff = mag_s - mag_y                    # sqrt is non-negative -> no abs needed
    # partial ||mag_s - mag_y||_2^2 over this frequency tile, accumulated in the
    # resident output block (out index_map is constant across j).
    d2_ref[...] += jnp.sum(diff * diff, axis=1, keepdims=True)


# ------------------------------ glue (JAX) -------------------------------- #
def _windowed_dft_mats(n_freq_pad):
    """DFT matrices with the periodic Hann window folded in and the contraction
    dim truncated to the window support (rows >= WIN_LEN and cols >= N_FREQ are
    zero, so padding contributes nothing)."""
    n = np.arange(WIN_LEN, dtype=np.float64)
    w = 0.5 - 0.5 * np.cos(2.0 * np.pi * n / WIN_LEN)            # periodic Hann
    k = np.arange(N_FREQ, dtype=np.int64)
    n_glob = np.arange(WIN_LEN, dtype=np.int64) + WIN_OFF        # position inside n_fft frame
    phase = (np.outer(n_glob, k) % N_FFT).astype(np.float64) * (2.0 * np.pi / N_FFT)
    cos_m = np.zeros((K_PAD, n_freq_pad), np.float32)
    sin_m = np.zeros((K_PAD, n_freq_pad), np.float32)
    cos_m[:WIN_LEN, :N_FREQ] = (w[:, None] * np.cos(phase)).astype(np.float32)
    sin_m[:WIN_LEN, :N_FREQ] = (w[:, None] * (-np.sin(phase))).astype(np.float32)
    return cos_m, sin_m


def _frame_signal_windowed(x):
    """x: (B, T) -> frames (B, n_frames, K_PAD) covering only the window support
    of each torch.stft(center=True) frame (samples [WIN_OFF, WIN_OFF+K_PAD) of
    the 2048-sample frame); samples >= WIN_LEN are killed by the zero DFT rows."""
    pad = N_FFT // 2
    xp = jnp.pad(x, ((0, 0), (pad, pad)), mode="reflect")
    t = x.shape[1]
    n_frames = 1 + t // HOP
    idx = np.arange(n_frames)[:, None] * HOP + WIN_OFF + np.arange(K_PAD)[None, :]
    return xp[:, idx], n_frames


def power_loss(student_hat, y, sample_rate):
    b = student_hat.shape[0]
    x_s = student_hat.reshape(b, -1).astype(jnp.float32)
    x_y = y.reshape(b, -1).astype(jnp.float32)

    frames_s, n_frames = _frame_signal_windowed(x_s)
    frames_y, _ = _frame_signal_windowed(x_y)
    m = b * n_frames

    # bf16 packs 16 sublanes -> pad rows to a multiple of 16; tile at <=256.
    m16 = ((m + 15) // 16) * 16
    tm = min(TM_TARGET, m16)
    m_pad = ((m + tm - 1) // tm) * tm

    fs = jnp.zeros((m_pad, K_PAD), jnp.bfloat16).at[:m].set(
        frames_s.reshape(m, K_PAD).astype(jnp.bfloat16))
    fy = jnp.zeros((m_pad, K_PAD), jnp.bfloat16).at[:m].set(
        frames_y.reshape(m, K_PAD).astype(jnp.bfloat16))

    n_freq_pad = ((N_FREQ + TN - 1) // TN) * TN
    cos_m, sin_m = _windowed_dft_mats(n_freq_pad)
    cos_b = jnp.asarray(cos_m).astype(jnp.bfloat16)
    sin_b = jnp.asarray(sin_m).astype(jnp.bfloat16)

    grid = (m_pad // tm, n_freq_pad // TN)   # (parallel frame tiles, freq reduction last)

    d2 = pl.pallas_call(
        _power_loss_kernel,
        out_shape=jax.ShapeDtypeStruct((m_pad, 1), jnp.float32),
        grid_spec=pltpu.PrefetchScalarGridSpec(
            num_scalar_prefetch=0,
            grid=grid,
            in_specs=[
                pl.BlockSpec((tm, K_PAD), lambda i, j: (i, 0)),    # student frames tile
                pl.BlockSpec((tm, K_PAD), lambda i, j: (i, 0)),    # target frames tile
                pl.BlockSpec((K_PAD, TN), lambda i, j: (0, j)),    # windowed cos tile
                pl.BlockSpec((K_PAD, TN), lambda i, j: (0, j)),    # windowed -sin tile
            ],
            out_specs=pl.BlockSpec((tm, 1), lambda i, j: (i, 0)),  # resident across j
        ),
        compiler_params=pltpu.CompilerParams(
            dimension_semantics=("parallel", "arbitrary"),
            vmem_limit_bytes=32 << 20,
        ),
    )(fs, fy, cos_b, sin_b)

    d2 = d2[:m, 0].reshape(b, n_frames)      # ||mag_s - mag_y||_2^2 per (b, frame)

    # Frame-axis slicing (not frequency) — intentional reproduction of the
    # original PyTorch indexing quirk.
    freq = int(3000 / (sample_rate * 0.5) * 1025)
    freq1 = int(3000 / (sample_rate * 0.5) * 257)
    loss_a = jnp.mean(d2[:, :min(freq, n_frames)], axis=1)
    loss_b = jnp.mean(d2[:, freq1:], axis=1)
    return loss_a + 10.0 * loss_b


# ------------------------- pure-JAX reference ------------------------------ #
def _frame_signal_full(x):
    pad = N_FFT // 2
    xp = jnp.pad(x, ((0, 0), (pad, pad)), mode="reflect")
    t = x.shape[1]
    n_frames = 1 + t // HOP
    idx = np.arange(n_frames)[:, None] * HOP + np.arange(N_FFT)[None, :]
    return xp[:, idx], n_frames


def _hann_window_padded_full():
    n = np.arange(WIN_LEN, dtype=np.float64)
    w = 0.5 - 0.5 * np.cos(2.0 * np.pi * n / WIN_LEN)
    wp = np.zeros((N_FFT,), np.float32)
    wp[WIN_OFF:WIN_OFF + WIN_LEN] = w.astype(np.float32)
    return wp


def _dft_mats_full():
    n = np.arange(N_FFT, dtype=np.int64)
    k = np.arange(N_FREQ, dtype=np.int64)
    phase = (np.outer(n, k) % N_FFT).astype(np.float64) * (2.0 * np.pi / N_FFT)
    return np.cos(phase).astype(np.float32), (-np.sin(phase)).astype(np.float32)


def power_loss_reference(student_hat, y, sample_rate):
    b = student_hat.shape[0]
    x_s = student_hat.reshape(b, -1).astype(jnp.float32)
    x_y = y.reshape(b, -1).astype(jnp.float32)
    frames_s, n_frames = _frame_signal_full(x_s)
    frames_y, _ = _frame_signal_full(x_y)
    win = jnp.asarray(_hann_window_padded_full())
    cos_m, sin_m = _dft_mats_full()
    cos_m, sin_m = jnp.asarray(cos_m), jnp.asarray(sin_m)

    def mag(frames):
        fw = frames * win
        re = jnp.einsum("btn,nk->btk", fw, cos_m, precision=lax.Precision.HIGHEST)
        im = jnp.einsum("btn,nk->btk", fw, sin_m, precision=lax.Precision.HIGHEST)
        return jnp.sqrt(re * re + im * im)

    d2 = jnp.sum((mag(frames_s) - mag(frames_y)) ** 2, axis=-1)   # (B, n_frames)
    freq = int(3000 / (sample_rate * 0.5) * 1025)
    freq1 = int(3000 / (sample_rate * 0.5) * 257)
    return jnp.mean(d2[:, :min(freq, n_frames)], axis=1) + 10.0 * jnp.mean(d2[:, freq1:], axis=1)


# --------------------------------- main ------------------------------------ #
if __name__ == "__main__":
    key = jax.random.PRNGKey(0)
    k1, k2 = jax.random.split(key)

    # small-but-valid shapes: waveform (B, C=1, T); T long enough for a few
    # STFT frames and for reflect padding of n_fft//2.
    B, C, T = 2, 1, 12000
    SAMPLE_RATE = 192000   # -> freq=32, freq1=8 frame-slices (both non-empty)

    student_hat = 0.5 * jax.random.normal(k1, (B, C, T), dtype=jnp.float32)
    y = 0.5 * jax.random.normal(k2, (B, C, T), dtype=jnp.float32)

    out = power_loss(student_hat, y, SAMPLE_RATE)
    out = jax.block_until_ready(out)

    ref = jax.block_until_ready(power_loss_reference(student_hat, y, SAMPLE_RATE))
    if not np.allclose(np.asarray(out), np.asarray(ref), rtol=5e-2, atol=1e-3):
        raise AssertionError(f"mismatch: pallas={np.asarray(out)} ref={np.asarray(ref)}")

    print("KERNEL_OK")
</pallas_src>

<mosaic_0001>
module attributes {stable_mosaic.version = 11 : i64} {
  func.func @_power_loss_kernel(%arg0: i32, %arg1: i32, %arg2: memref<96x1280xbf16, #tpu.memory_space<vmem>>, %arg3: memref<96x1280xbf16, #tpu.memory_space<vmem>>, %arg4: memref<1280x256xbf16, #tpu.memory_space<vmem>>, %arg5: memref<1280x256xbf16, #tpu.memory_space<vmem>>, %arg6: memref<96x1xf32, #tpu.memory_space<vmem>>) attributes {dimension_semantics = [#tpu.dimension_semantics<parallel>, #tpu.dimension_semantics<arbitrary>], iteration_bounds = array<i64: 1, 5>, scalar_prefetch = 0 : i64, scratch_operands = 0 : i64, tpu.core_type = #tpu.core_type<tc>, window_params = [{transform_indices = @transform_0, window_bounds = array<i64: 96, 1280>}, {transform_indices = @transform_1, window_bounds = array<i64: 96, 1280>}, {transform_indices = @transform_2, window_bounds = array<i64: 1280, 256>}, {transform_indices = @transform_3, window_bounds = array<i64: 1280, 256>}, {transform_indices = @transform_4, window_bounds = array<i64: 96, 1>}]} {
    %c0_i32 = arith.constant 0 : i32
    %0 = arith.cmpi eq, %arg1, %c0_i32 : i32
    %1 = arith.extui %0 : i1 to i32
    %c0_i32_0 = arith.constant 0 : i32
    %2 = arith.cmpi ne, %1, %c0_i32_0 : i32
    scf.if %2 {
      %cst_16 = arith.constant 0.000000e+00 : f32
      %26 = vector.broadcast %cst_16 : f32 to vector<96x1xf32>
      %c0_17 = arith.constant 0 : index
      %c0_18 = arith.constant 0 : index
      %27 = vector.load %arg6[%c0_17, %c0_18] : memref<96x1xf32, #tpu.memory_space<vmem>>, vector<96x1xf32>
      tpu.vector_store %arg6[%c0_17, %c0_18], %26 {strides = array<i32>} : memref<96x1xf32, #tpu.memory_space<vmem>>, vector<96x1xf32>,
    } else {
    }
    %c0 = arith.constant 0 : index
    %c0_1 = arith.constant 0 : index
    %3 = vector.load %arg2[%c0, %c0_1] : memref<96x1280xbf16, #tpu.memory_space<vmem>>, vector<96x1280xbf16>
    %c0_2 = arith.constant 0 : index
    %c0_3 = arith.constant 0 : index
    %4 = vector.load %arg3[%c0_2, %c0_3] : memref<96x1280xbf16, #tpu.memory_space<vmem>>, vector<96x1280xbf16>
    %c0_4 = arith.constant 0 : index
    %c0_5 = arith.constant 0 : index
    %5 = vector.load %arg4[%c0_4, %c0_5] : memref<1280x256xbf16, #tpu.memory_space<vmem>>, vector<1280x256xbf16>
    %c0_6 = arith.constant 0 : index
    %c0_7 = arith.constant 0 : index
    %6 = vector.load %arg5[%c0_6, %c0_7] : memref<1280x256xbf16, #tpu.memory_space<vmem>>, vector<1280x256xbf16>
    %cst = arith.constant dense<0.000000e+00> : vector<96x256xf32>
    %7 = tpu.matmul %3, %5, %cst {dimension_numbers = #tpu.dot_dimension_numbers<[1], [0], [0], [1], [0, 0, 1, 1], [], []>} : vector<96x1280xbf16>, vector<1280x256xbf16>, vector<96x256xf32> -> vector<96x256xf32>
    %cst_8 = arith.constant dense<0.000000e+00> : vector<96x256xf32>
    %8 = tpu.matmul %3, %6, %cst_8 {dimension_numbers = #tpu.dot_dimension_numbers<[1], [0], [0], [1], [0, 0, 1, 1], [], []>} : vector<96x1280xbf16>, vector<1280x256xbf16>, vector<96x256xf32> -> vector<96x256xf32>
    %cst_9 = arith.constant dense<0.000000e+00> : vector<96x256xf32>
    %9 = tpu.matmul %4, %5, %cst_9 {dimension_numbers = #tpu.dot_dimension_numbers<[1], [0], [0], [1], [0, 0, 1, 1], [], []>} : vector<96x1280xbf16>, vector<1280x256xbf16>, vector<96x256xf32> -> vector<96x256xf32>
    %cst_10 = arith.constant dense<0.000000e+00> : vector<96x256xf32>
    %10 = tpu.matmul %4, %6, %cst_10 {dimension_numbers = #tpu.dot_dimension_numbers<[1], [0], [0], [1], [0, 0, 1, 1], [], []>} : vector<96x1280xbf16>, vector<1280x256xbf16>, vector<96x256xf32> -> vector<96x256xf32>
    %11 = arith.mulf %7, %7 : vector<96x256xf32>
    %12 = arith.mulf %8, %8 : vector<96x256xf32>
    %13 = arith.addf %11, %12 : vector<96x256xf32>
    %14 = math.sqrt %13 : vector<96x256xf32>
    %15 = arith.mulf %9, %9 : vector<96x256xf32>
    %16 = arith.mulf %10, %10 : vector<96x256xf32>
    %17 = arith.addf %15, %16 : vector<96x256xf32>
    %18 = math.sqrt %17 : vector<96x256xf32>
    %19 = arith.subf %14, %18 : vector<96x256xf32>
    %c0_11 = arith.constant 0 : index
    %c0_12 = arith.constant 0 : index
    %20 = vector.load %arg6[%c0_11, %c0_12] : memref<96x1xf32, #tpu.memory_space<vmem>>, vector<96x1xf32>
    %21 = arith.mulf %19, %19 : vector<96x256xf32>
    %cst_13 = arith.constant dense<0.000000e+00> : vector<96xf32>
    %22 = vector.multi_reduction <add>, %21, %cst_13 [1] : vector<96x256xf32> to vector<96xf32>
    %23 = vector.shape_cast %22 : vector<96xf32> to vector<96x1xf32>
    %24 = arith.addf %20, %23 : vector<96x1xf32>
    %c0_14 = arith.constant 0 : index
    %c0_15 = arith.constant 0 : index
    %25 = vector.load %arg6[%c0_14, %c0_15] : memref<96x1xf32, #tpu.memory_space<vmem>>, vector<96x1xf32>
    tpu.vector_store %arg6[%c0_14, %c0_15], %24 {strides = array<i32>} : memref<96x1xf32, #tpu.memory_space<vmem>>, vector<96x1xf32>,
    return
  }
  func.func @transform_0(%arg0: i32, %arg1: i32) -> (i32, i32) {
    %c0_i32 = arith.constant 0 : i32
    %c0_i32_0 = arith.constant 0 : i32
    return %arg0, %c0_i32 : i32, i32
  }
  func.func @transform_1(%arg0: i32, %arg1: i32) -> (i32, i32) {
    %c0_i32 = arith.constant 0 : i32
    %c0_i32_0 = arith.constant 0 : i32
    return %arg0, %c0_i32 : i32, i32
  }
  func.func @transform_2(%arg0: i32, %arg1: i32) -> (i32, i32) {
    %c0_i32 = arith.constant 0 : i32
    %c0_i32_0 = arith.constant 0 : i32
    return %c0_i32, %arg1 : i32, i32
  }
  func.func @transform_3(%arg0: i32, %arg1: i32) -> (i32, i32) {
    %c0_i32 = arith.constant 0 : i32
    %c0_i32_0 = arith.constant 0 : i32
    return %c0_i32, %arg1 : i32, i32
  }
  func.func @transform_4(%arg0: i32, %arg1: i32) -> (i32, i32) {
    %c0_i32 = arith.constant 0 : i32
    %c0_i32_0 = arith.constant 0 : i32
    return %arg0, %c0_i32 : i32, i32
  }
}

</mosaic_0001>

<bundles_post_ra>
// kernel: tpu_custom_call.1
= control target key start
LH: loop header
LB: loop body
LE: loop exit
PB: predicated region body
PF: predicated region fallthrough
CT: control target
= control target key end

     0   :  { %s9365_s0 = inlined_call_operand.hbm [shape: bf16[96,1280], index: 0, kind: input, shape index: {}]   ;;  %s9366_s1 = inlined_call_operand.hbm [shape: bf16[96,1280], index: 1, kind: input, shape index: {}]   ;;  %s9367_s2 = inlined_call_operand.hbm [shape: bf16[1280,1280], index: 2, kind: input, shape index: {}]   ;;  %s9368_s3 = inlined_call_operand.hbm [shape: bf16[1280,1280], index: 3, kind: input, shape index: {}]   ;;  %s9369_s4 = inlined_call_operand.vmem [shape: f32[96,1], index: 4, kind: output, shape index: {}]  }
   0x1   :  { %9381 = sst [smem:[#allocation13_spill]] %s9365_s0 }
   0x2   :  { %9382 = sst [smem:[#allocation14_spill]] %s9367_s2 }
   0x3   :  { %9 = vsyncpa [#allocation3], 0 }
   0x4   :  { %10 = vsyncpa [#allocation5], 0  ;;  %s7769_s15 = smov 0   ;;  %s7771_s16 = smov 0  }
   0x5   :  { %s7773_s17 = smov 0   ;;  %s7775_s18 = smov 0  }
   0x6   :  { %s7777_s19 = smov 0   ;;  %s7779_s20 = smov 0  }
   0x7 LB: > { %s9375_s21 = sadd.s32 4294967295, %s7733_s20   ;;  %s87_s22 = sadd.s32 1, %s7721_s17  ;;  %s7733_s20 = sphi %s7779_s20, %s16_s20   ;;  %s7729_s19 = sphi %s7777_s19, %s9409_s19   ;;  %s7725_s18 = sphi %s7775_s18, %s9408_s18   ;;  %s7721_s17 = sphi %s7773_s17, %s9407_s17   ;;  %s7717_s16 = sphi %s7771_s16, %s9406_s16   ;;  %s7713_s15 = sphi %s7769_s15, %s9405_s15  }
   0x8   : > { %p94_p0 = scmp.ne.s32.totalorder %s7721_s17, %s7717_s16  ;;  %p95_p1 = scmp.eq.s32.totalorder %s7733_s20, 0 }
   0x9   : > { %p100_p2 = scmp.ne.s32.totalorder %s7717_s16, %s7713_s15  ;;  %p7805_p3 = scmp.eq.s32.totalorder %s9375_s21, 0 }
   0xa   : > { %p96_p4 = por %p95_p1, %p94_p0  ;;  %p5552_p5 = scmp.ge.s32.totalorder %s7733_s20, 1 }
   0xb   : > { %s9383_s23 = scalar_select %p7805_p3, 1, 0 }
   0xc   : > { %p7812_p6 = por %p7805_p3, %p100_p2  ;;  %p163_p7 = scmp.lt.s32.totalorder %s7733_s20, 6 }
   0xd   : > { %s7735_s26 = smov [#allocation2]   ;;  %p6425_p10 = scmp.lt.s32.totalorder %s7733_s20, 5 }
   0xe   : > { %s9384_s24 = scalar_select %p7812_p6, 1, 0 }
   0xf   : > { %p7817_p8 = pnand %p5552_p5, %p163_p7  ;;  %s179_s27 = sshll.u32 %s7735_s26, 4  ;;  %s180_s27 = int_to_ptr.vmem [resolvable:$true] %s179_s27 }
  0x10   : > { %p7830_p12 = pnand %p6425_p10, %p96_p4  ;;  %s25_s30 = sadd.s32 1, %s7729_s19 }
  0x11   : > { %s9385_s25 = scalar_select %p7817_p8, 1, 0 }
  0x12   : > { %p6409_p9 = pneg %p7817_p8  ;;  %s9388_s0 = sld [smem:[#allocation13_spill]] }
  0x13   : > { %s9387_s29 = scalar_select %p7830_p12, 1, 0 }
  0x14   : > { %p7826_p11 = pnand %p6409_p9, %p7805_p3 }
  0x16   : > { %p9377_p0 = pneg %p7826_p11 }
  0x18   : > { %s7559_s7 = scalar_lea.hbm %s9388_s0, 7680 }
  0x19   : > { %p7560_p13 = scmp.ne.s32.totalorder %s9388_s0, %s7559_s7  ;;  %p7566_p4 = scmp.lt.u32.totalorder %s7559_s7, %s9388_s0 }
  0x1b   : > { %p7562_p1 = pnand %p9377_p0, %p7560_p13 }
  0x1d   : > { %p7563_p2 = pneg %p7562_p1 }
  0x1f   : > { %p7568_p5 = pnand %p7566_p4, %p7563_p2 }
  0x21   : > { %7571 = shalt.err (!%p7568_p5)
}
  0x22   : > { %s7572_s12 = scalar_lea.vmem %s180_s27, 7680  ;;  %p7580_p6 = scmp.lt.s32.totalorder %s180_s27, %s180_s27 }
  0x23   : > { %p7573_p7 = scmp.ne.s32.totalorder %s180_s27, %s7572_s12  ;;  %p7581_p3 = scmp.lt.s32.totalorder %s7572_s12, %s7572_s12 }
  0x25   : > { %p7575_p9 = pnand %p7573_p7, %p9377_p0  ;;  %p7582_p8 = por %p7581_p3, %p7580_p6 }
  0x27   : > { %p7576_p10 = pneg %p7575_p9 }
  0x29   : > { %p7583_p12 = pnand %p7582_p8, %p7576_p10 }
  0x2b   : > { %7586 = shalt.err (!%p7583_p12)
}
  0x2c   : > { %s7736_s13 = smov 640   ;;  %s9376_s14 = smov 40  }
  0x2d   : > { %6412 = dma.hbm_to_vmem [thread:$0]  (!%p7826_p11), %s9388_s0, 7680, %s180_s27, [#allocation3], %s7736_s13, %s7736_s13, %s9376_s14  }
  0x2e   : > { %p26_p3 = scmp.ge.s32.totalorder %s25_s30, 5  ;;  %s210_s5 = sand.u32 1, %s7733_s20  }
  0x2f   : > { %s212_s6 = sand.u32 1, %s7721_s17   ;;  %s6008_s9 = sshll.u32 %s7729_s19, 7 }
  0x30   : > { %s9411_s30 = smov (%p26_p3, %s25_s30), 0  ;;  %s7864_s7 = smul.u32 1280, %s212_s6 }
  0x31   : > { %9389 = sst [smem:[#allocation11_spill]] %s9411_s30  ;;  %s84_s8 = ssub.s32 %s7729_s19, %s9411_s30 }
  0x32   : > { %p85_p6 = scmp.eq.s32.totalorder %s84_s8, 0  ;;  %s9390_s2 = sld [smem:[#allocation14_spill]] }
  0x33   : > { %s214_s27 = scalar_lea.vmem [#allocation6], %s7864_s7  ;;  %s7884_s6 = scalar_lea.sflag [#allocation3], %s210_s5 }
  0x34   : > { %s221_s15 = sshll.u32 %s214_s27, 4  ;;  %p9392_p12 = scmp.ne.s32.totalorder %s9387_s29, 0  ;;  %s7882_s15 = int_to_ptr.vmem [resolvable:$true] %s221_s15 }
  0x35   : > { %s7880_s26 = scalar_select %p85_p6, %s7721_s17, %s87_s22  }
  0x36   : > { %p9379_p13 = pneg %p9392_p12 }
  0x37   : > { %9391 = sst [smem:[#allocation12_spill]] %s7880_s26 }
  0x38   : > { %s7874_s12 = scalar_lea.hbm %s9390_s2, %s6008_s9  ;;  %s7592_s21 = scalar_lea.hbm %s9390_s2, 102400 }
  0x39   : > { %s7587_s8 = scalar_lea.hbm %s7874_s12, 20480  ;;  %p7593_p4 = scmp.lt.u32.totalorder %s7874_s12, %s9390_s2 }
  0x3a   : > { %p7588_p8 = scmp.ne.s32.totalorder %s7874_s12, %s7587_s8  ;;  %p7594_p5 = scmp.lt.u32.totalorder %s7592_s21, %s7587_s8 }
  0x3b   : > { %p7596_p9 = scmp.lt.u32.totalorder %s7587_s8, %s7874_s12 }
  0x3c   : > { %p7590_p1 = pnand %p9379_p13, %p7588_p8  ;;  %p7595_p7 = por %p7594_p5, %p7593_p4 }
  0x3e   : > { %p7591_p2 = pneg %p7590_p1  ;;  %p7597_p10 = por %p7596_p9, %p7595_p7 }
  0x40   : > { %p7598_p3 = pnand %p7597_p10, %p7591_p2 }
  0x42   : > { %7601 = shalt.err (!%p7598_p3)
}
  0x43   : > { %s7602_s22 = scalar_lea.vmem %s7882_s15, 20480  ;;  %s7738_s5 = smov [#allocation6]  }
  0x44   : > { %p7603_p6 = scmp.ne.s32.totalorder %s7882_s15, %s7602_s22  ;;  %s7607_s10 = sshll.u32 %s7738_s5, 4  ;;  %s7608_s10 = int_to_ptr.vmem [resolvable:$false] %s7607_s10 }
  0x45   : > { %s7609_s14 = scalar_lea.vmem %s7608_s10, 40960  ;;  %p7610_p0 = scmp.lt.s32.totalorder %s7882_s15, %s7608_s10 }
  0x46   : > { %p7605_p8 = pnand %p7603_p6, %p9379_p13  ;;  %p7611_p4 = scmp.lt.s32.totalorder %s7609_s14, %s7602_s22 }
  0x48   : > { %p7606_p1 = pneg %p7605_p8  ;;  %p7612_p5 = por %p7611_p4, %p7610_p0 }
  0x4a   : > { %p7613_p7 = pnand %p7612_p5, %p7606_p1 }
  0x4c   : > { %7616 = shalt.err (!%p7613_p7)
}
  0x4d   : > { %s7739_s21 = smov 128   ;;  %s7740_s8 = smov 8  }
  0x4e   : > { %6419 = dma.hbm_to_vmem [thread:$0]  (!%p9392_p12), %s7874_s12, 20480, %s7882_s15, %s7884_s6, %s7736_s13, %s7739_s21, %s7740_s8  }
  0x4f   : > { %s7741_s11 = smov [#allocation4]   ;;  %s7920_s10 = scalar_lea.hbm %s9368_s3, %s6008_s9 }
  0x50   : > { %s196_s27 = sshll.u32 %s7741_s11, 4  ;;  %s7617_s2 = scalar_lea.hbm %s9366_s1, 7680  ;;  %s197_s27 = int_to_ptr.vmem [resolvable:$true] %s196_s27 }
  0x51   : > { %p7618_p0 = scmp.ne.s32.totalorder %s9366_s1, %s7617_s2  ;;  %p9393_p2 = pneg %p7826_p11 }
  0x52   : > { %p7624_p3 = scmp.lt.u32.totalorder %s7617_s2, %s9366_s1 }
  0x53   : > { %p7620_p9 = pnand %p7618_p0, %p9393_p2 }
  0x55   : > { %p7621_p10 = pneg %p7620_p9 }
  0x57   : > { %p7626_p6 = pnand %p7624_p3, %p7621_p10 }
  0x59   : > { %7629 = shalt.err (!%p7626_p6)
}
  0x5a   : > { %s7630_s9 = scalar_lea.vmem %s197_s27, 7680  ;;  %p9394_p1 = pmov %p9393_p2 }
  0x5b   : > { %p7631_p8 = scmp.ne.s32.totalorder %s197_s27, %s7630_s9  ;;  %p7638_p7 = scmp.lt.s32.totalorder %s197_s27, %s197_s27 }
  0x5c   : > { %p7639_p13 = scmp.lt.s32.totalorder %s7630_s9, %s7630_s9 }
  0x5d   : > { %p7633_p4 = pnand %p7631_p8, %p9394_p1 }
  0x5e   : > { %p7640_p12 = por %p7639_p13, %p7638_p7 }
  0x5f   : > { %p7634_p5 = pneg %p7633_p4 }
  0x61   : > { %p7641_p0 = pnand %p7640_p12, %p7634_p5 }
  0x63   : > { %7644 = shalt.err (!%p7641_p0)
}
  0x64   : > { %s9395_s0 = smov 40   ;;  %s235_s26 = scalar_lea.vmem [#allocation7], %s7864_s7 }
  0x65   : > { %6415 = dma.hbm_to_vmem [thread:$0]  (!%p7826_p11), %s9366_s1, 7680, %s197_s27, [#allocation5], %s7736_s13, %s7736_s13, %s9395_s0  }
  0x66   : > { %s242_s11 = sshll.u32 %s235_s26, 4  ;;  %s7645_s22 = scalar_lea.hbm %s7920_s10, 20480  ;;  %s7946_s11 = int_to_ptr.vmem [resolvable:$true] %s242_s11 }
  0x67   : > { %p7646_p12 = scmp.ne.s32.totalorder %s7920_s10, %s7645_s22  ;;  %p9396_p13 = scmp.ne.s32.totalorder %s9387_s29, 0 }
  0x68   : > { %s7650_s14 = scalar_lea.hbm %s9368_s3, 102400  ;;  %p7651_p3 = scmp.lt.u32.totalorder %s7920_s10, %s9368_s3 }
  0x69   : > { %p9397_p2 = pneg %p9396_p13  ;;  %p7652_p6 = scmp.lt.u32.totalorder %s7650_s14, %s7645_s22 }
  0x6a   : > { %p7654_p8 = scmp.lt.u32.totalorder %s7645_s22, %s7920_s10 }
  0x6b   : > { %p7648_p9 = pnand %p7646_p12, %p9397_p2  ;;  %p7653_p11 = por %p7652_p6, %p7651_p3 }
  0x6d   : > { %p7649_p10 = pneg %p7648_p9  ;;  %p7655_p1 = por %p7654_p8, %p7653_p11 }
  0x6f   : > { %p7656_p4 = pnand %p7655_p1, %p7649_p10 }
  0x71   : > { %7659 = shalt.err (!%p7656_p4)
}
  0x72   : > { %s7660_s7 = scalar_lea.vmem %s7946_s11, 20480  ;;  %p9398_p7 = pmov %p9397_p2 }
  0x73   : > { %p7661_p5 = scmp.ne.s32.totalorder %s7946_s11, %s7660_s7  ;;  %s7742_s27 = smov [#allocation7]  }
  0x74   : > { %s7665_s9 = sshll.u32 %s7742_s27, 4  ;;  %s7666_s9 = int_to_ptr.vmem [resolvable:$false] %s7665_s9 }
  0x75   : > { %p7663_p0 = pnand %p7661_p5, %p9398_p7  ;;  %s7667_s0 = scalar_lea.vmem %s7666_s9, 40960 }
  0x76   : > { %p7668_p2 = scmp.lt.s32.totalorder %s7946_s11, %s7666_s9  ;;  %p7669_p9 = scmp.lt.s32.totalorder %s7667_s0, %s7660_s7 }
  0x77   : > { %p7664_p12 = pneg %p7663_p0 }
  0x78   : > { %p7670_p3 = por %p7669_p9, %p7668_p2 }
  0x7a   : > { %p7671_p6 = pnand %p7670_p3, %p7664_p12 }
  0x7c   : > { %7674 = shalt.err (!%p7671_p6)
}
  0x7d   : > { %6422 = dma.hbm_to_vmem [thread:$0]  (!%p9396_p13), %s7920_s10, 20480, %s7946_s11, %s7884_s6, %s7736_s13, %s7739_s21, %s7740_s8  }
  0x7e   : > { %p9399_p10 = scmp.ne.s32.totalorder %s9385_s25, 0 }
  0x7f   : > { %p9400_p11 = scmp.ne.s32.totalorder (!%p9399_p10), %s9383_s23, 0 }
  0x80   : > { %254 = sbr.rel (%p9399_p10) target bundleno = 1236 (0x4d4), region = 36 }
  0x87   : > { %7700 = dma.done.wait (%p9400_p11), [#allocation3], 7680  }
  0x88   : > { %7702 = vsyncadd (%p9400_p11), [#allocation3], 4294959616 }
  0x89   : > { %7704 = dma.done.wait (%p9400_p11), [#allocation5], 7680  }
  0x8a   : > { %7706 = vsyncadd (%p9400_p11), [#allocation5], 4294959616  ;;  %s9401_s29 = sadd.s32 4294967295, %s7733_s20   ;;  %s266_s6 = sand.u32 1, %s7717_s16  }
  0x8b   : > { %s264_s13 = sand.u32 1, %s9401_s29   ;;  %s6396_s25 = smul.u32 1280, %s266_s6 }
  0x8c   : > { %s265_s21 = scalar_lea.sflag [#allocation3], %s264_s13  ;;  %p9402_p13 = scmp.ne.s32.totalorder %s9384_s24, 0 }
  0x8d   : > { %s7988_s8 = scalar_lea.vmem [#allocation6], %s6396_s25 }
  0x8e   : > { %7708 = dma.done.wait (%p9402_p13), %s265_s21, 40960  }
  0x8f   : > { %7710 = vsyncadd (%p9402_p13), %s265_s21, 4294926336  ;;  %s7994_s10 = scalar_lea.vmem [#allocation7], %s6396_s25  ;;  %p5563_p8 = scmp.ne.s32.totalorder %s7725_s18, 0 }
  0x90   : > { %vm321_vm0 = vcmask (!%p5563_p8), 7168   ;;  %v7743_v0 = vmov (!%p5563_p8), 0.0  }
  0x91   : > { %320 = sbr.rel (%p5563_p8) target bundleno = 152 (0x98), region = 56  ;;  %322 = vst.msk [vmem:[%s9369_s4] sm:$0xff] (!%p5563_p8), %vm321_vm0, %v7743_v0  ;;  %323 = vst.msk [vmem:[%s9369_s4 + $0x8] sm:$0xff] (!%p5563_p8), %vm321_vm0, %v7743_v0 }
  0x92   : > { %324 = vst.msk [vmem:[%s9369_s4 + $0x10] sm:$0xff] (!%p5563_p8), %vm321_vm0, %v7743_v0  ;;  %325 = vst.msk [vmem:[%s9369_s4 + $0x18] sm:$0xff] (!%p5563_p8), %vm321_vm0, %v7743_v0 }
  0x93   : > { %326 = vst.msk [vmem:[%s9369_s4 + $0x20] sm:$0xff] (!%p5563_p8), %vm321_vm0, %v7743_v0  ;;  %327 = vst.msk [vmem:[%s9369_s4 + $0x28] sm:$0xff] (!%p5563_p8), %vm321_vm0, %v7743_v0 }
  0x94   : > { %328 = vst.msk [vmem:[%s9369_s4 + $0x30] sm:$0xff] (!%p5563_p8), %vm321_vm0, %v7743_v0  ;;  %329 = vst.msk [vmem:[%s9369_s4 + $0x38] sm:$0xff] (!%p5563_p8), %vm321_vm0, %v7743_v0 }
  0x95   : > { %330 = vst.msk [vmem:[%s9369_s4 + $0x40] sm:$0xff] (!%p5563_p8), %vm321_vm0, %v7743_v0  ;;  %331 = vst.msk [vmem:[%s9369_s4 + $0x48] sm:$0xff] (!%p5563_p8), %vm321_vm0, %v7743_v0 }
  0x96   : > { %332 = vst.msk [vmem:[%s9369_s4 + $0x50] sm:$0xff] (!%p5563_p8), %vm321_vm0, %v7743_v0  ;;  %333 = vst.msk [vmem:[%s9369_s4 + $0x58] sm:$0xff] (!%p5563_p8), %vm321_vm0, %v7743_v0 }
  0x98 PF: > { %v6483_v1 = vld [vmem:[%s7988_s8 + $0x4] ss:$8 sps:$4 sm:$0xff]   ;;  %v6487_v3 = vld [vmem:[%s7988_s8] ss:$8 sps:$4 sm:$0xff]   ;;  %v6489_v5 = vld [vmem:[%s7988_s8 + $0x14] ss:$8 sps:$4 sm:$0xff]  }
  0x99   : > { %v6485_v2 = vld [vmem:[%s7994_s10 + $0x4] ss:$8 sps:$4 sm:$0xff]   ;;  %1874 = vmatprep.subr.bf16.mxu0 %v6483_v1  ;;  %v6488_v4 = vld [vmem:[%s7994_s10] ss:$8 sps:$4 sm:$0xff]   ;;  %v6491_v6 = vld [vmem:[%s7994_s10 + $0x14] ss:$8 sps:$4 sm:$0xff]  }
  0x9a   : > { %3139 = vmatprep.subr.bf16.mxu1 %v6485_v2  ;;  %1875 = vmatpush1.bf16.msra.mxu0 %v6487_v3  ;;  %v6493_v7 = vld [vmem:[%s7988_s8 + $0x10] ss:$8 sps:$4 sm:$0xff]   ;;  %v6495_v9 = vld [vmem:[%s7988_s8 + $0x24] ss:$8 sps:$4 sm:$0xff]   ;;  %v6499_v11 = vld [vmem:[%s7988_s8 + $0x20] ss:$8 sps:$4 sm:$0xff]  }
  0x9b   : > { %3140 = vmatpush1.bf16.msra.mxu1 %v6488_v4  ;;  %1876 = vmatprep.subr.bf16.mxu0 %v6489_v5  ;;  %v6494_v8 = vld [vmem:[%s7994_s10 + $0x10] ss:$8 sps:$4 sm:$0xff]   ;;  %v6497_v10 = vld [vmem:[%s7994_s10 + $0x24] ss:$8 sps:$4 sm:$0xff]   ;;  %v6500_v12 = vld [vmem:[%s7994_s10 + $0x20] ss:$8 sps:$4 sm:$0xff]  }
  0x9c   : > { %3141 = vmatprep.subr.bf16.mxu1 %v6491_v6  ;;  %v6501_v13 = vld [vmem:[%s7988_s8 + $0x34] ss:$8 sps:$4 sm:$0xff]   ;;  %v6505_v15 = vld [vmem:[%s7988_s8 + $0x30] ss:$8 sps:$4 sm:$0xff]   ;;  %v6507_v17 = vld [vmem:[%s7988_s8 + $0x44] ss:$8 sps:$4 sm:$0xff]  }
  0x9d   : > { %v6503_v14 = vld [vmem:[%s7994_s10 + $0x34] ss:$8 sps:$4 sm:$0xff]   ;;  %v6506_v16 = vld [vmem:[%s7994_s10 + $0x30] ss:$8 sps:$4 sm:$0xff]   ;;  %v6509_v18 = vld [vmem:[%s7994_s10 + $0x44] ss:$8 sps:$4 sm:$0xff]  }
  0x9e   : > { %1877 = vmatpush1.bf16.msra.mxu0 %v6493_v7  ;;  %v6511_v19 = vld [vmem:[%s7988_s8 + $0x40] ss:$8 sps:$4 sm:$0xff]   ;;  %v6513_v21 = vld [vmem:[%s7988_s8 + $0x54] ss:$8 sps:$4 sm:$0xff]   ;;  %v6517_v23 = vld [vmem:[%s7988_s8 + $0x50] ss:$8 sps:$4 sm:$0xff]  }
  0x9f   : > { %3142 = vmatpush1.bf16.msra.mxu1 %v6494_v8  ;;  %1878 = vmatprep.subr.bf16.mxu0 %v6495_v9  ;;  %v6512_v20 = vld [vmem:[%s7994_s10 + $0x40] ss:$8 sps:$4 sm:$0xff]   ;;  %v6515_v22 = vld [vmem:[%s7994_s10 + $0x54] ss:$8 sps:$4 sm:$0xff]   ;;  %v6518_v24 = vld [vmem:[%s7994_s10 + $0x50] ss:$8 sps:$4 sm:$0xff]  }
  0xa0   : > { %3143 = vmatprep.subr.bf16.mxu1 %v6497_v10  ;;  %v6519_v25 = vld [vmem:[%s7988_s8 + $0x64] ss:$8 sps:$4 sm:$0xff]   ;;  %v6523_v27 = vld [vmem:[%s7988_s8 + $0x60] ss:$8 sps:$4 sm:$0xff]   ;;  %v6525_v29 = vld [vmem:[%s7988_s8 + $0x74] ss:$8 sps:$4 sm:$0xff]  }
  0xa1   : > { %v6521_v26 = vld [vmem:[%s7994_s10 + $0x64] ss:$8 sps:$4 sm:$0xff]   ;;  %v6524_v28 = vld [vmem:[%s7994_s10 + $0x60] ss:$8 sps:$4 sm:$0xff]   ;;  %v6527_v30 = vld [vmem:[%s7994_s10 + $0x74] ss:$8 sps:$4 sm:$0xff]  }
  0xa2   : > { %1879 = vmatpush1.bf16.msra.mxu0 %v6499_v11  ;;  %v6529_v31 = vld [vmem:[%s7988_s8 + $0x70] ss:$8 sps:$4 sm:$0xff]   ;;  %v6531_v33 = vld [vmem:[%s7988_s8 + $0x84] ss:$8 sps:$4 sm:$0xff]   ;;  %v6535_v35 = vld [vmem:[%s7988_s8 + $0x80] ss:$8 sps:$4 sm:$0xff]  }
  0xa3   : > { %3144 = vmatpush1.bf16.msra.mxu1 %v6500_v12  ;;  %1880 = vmatprep.subr.bf16.mxu0 %v6501_v13  ;;  %v6530_v32 = vld [vmem:[%s7994_s10 + $0x70] ss:$8 sps:$4 sm:$0xff]   ;;  %v6533_v34 = vld [vmem:[%s7994_s10 + $0x84] ss:$8 sps:$4 sm:$0xff]   ;;  %v6536_v36 = vld [vmem:[%s7994_s10 + $0x80] ss:$8 sps:$4 sm:$0xff]  }
  0xa4   : > { %3145 = vmatprep.subr.bf16.mxu1 %v6503_v14  ;;  %v6537_v37 = vld [vmem:[%s7988_s8 + $0x94] ss:$8 sps:$4 sm:$0xff]   ;;  %v6541_v39 = vld [vmem:[%s7988_s8 + $0x90] ss:$8 sps:$4 sm:$0xff]   ;;  %v6543_v41 = vld [vmem:[%s7988_s8 + $0xa4] ss:$8 sps:$4 sm:$0xff]  }
  0xa5   : > { %v6539_v38 = vld [vmem:[%s7994_s10 + $0x94] ss:$8 sps:$4 sm:$0xff]   ;;  %v6542_v40 = vld [vmem:[%s7994_s10 + $0x90] ss:$8 sps:$4 sm:$0xff]   ;;  %v6545_v42 = vld [vmem:[%s7994_s10 + $0xa4] ss:$8 sps:$4 sm:$0xff]  }
  0xa6   : > { %1881 = vmatpush1.bf16.msra.mxu0 %v6505_v15  ;;  %v6547_v43 = vld [vmem:[%s7988_s8 + $0xa0] ss:$8 sps:$4 sm:$0xff]   ;;  %v6549_v45 = vld [vmem:[%s7988_s8 + $0xb4] ss:$8 sps:$4 sm:$0xff]   ;;  %v6553_v47 = vld [vmem:[%s7988_s8 + $0xb0] ss:$8 sps:$4 sm:$0xff]  }
  0xa7   : > { %3146 = vmatpush1.bf16.msra.mxu1 %v6506_v16  ;;  %1882 = vmatprep.subr.bf16.mxu0 %v6507_v17  ;;  %v6548_v44 = vld [vmem:[%s7994_s10 + $0xa0] ss:$8 sps:$4 sm:$0xff]   ;;  %v6551_v46 = vld [vmem:[%s7994_s10 + $0xb4] ss:$8 sps:$4 sm:$0xff]   ;;  %v6554_v48 = vld [vmem:[%s7994_s10 + $0xb0] ss:$8 sps:$4 sm:$0xff]  }
  0xa8   : > { %3147 = vmatprep.subr.bf16.mxu1 %v6509_v18  ;;  %v6581_v49 = vld [vmem:[#allocation2 + $0x4] ss:$40 sps:$4 sm:$0xff]   ;;  %v6559_v52 = vld [vmem:[%s7988_s8 + $0xc0] ss:$8 sps:$4 sm:$0xff]   ;;  %v6561_v54 = vld [vmem:[%s7988_s8 + $0xd4] ss:$8 sps:$4 sm:$0xff]  }
  0xa9   : > { %v6555_v50 = vld [vmem:[%s7988_s8 + $0xc4] ss:$8 sps:$4 sm:$0xff]   ;;  %1906 = vmatprep.mubr.bf16.mxu0 %v6581_v49  ;;  %3171 = vmatprep.mubr.bf16.mxu1 %v6581_v49  ;;  %v6560_v53 = vld [vmem:[%s7994_s10 + $0xc0] ss:$8 sps:$4 sm:$0xff]   ;;  %v6563_v55 = vld [vmem:[%s7994_s10 + $0xd4] ss:$8 sps:$4 sm:$0xff]  }
  0xaa   : > { %1883 = vmatpush1.bf16.msra.mxu0 %v6511_v19  ;;  %v6557_v51 = vld [vmem:[%s7994_s10 + $0xc4] ss:$8 sps:$4 sm:$0xff]   ;;  %v6565_v56 = vld [vmem:[%s7988_s8 + $0xd0] ss:$8 sps:$4 sm:$0xff]   ;;  %v6571_v60 = vld [vmem:[%s7988_s8 + $0xe0] ss:$8 sps:$4 sm:$0xff]  }
  0xab   : > { %3148 = vmatpush1.bf16.msra.mxu1 %v6512_v20  ;;  %1884 = vmatprep.subr.bf16.mxu0 %v6513_v21  ;;  %v6566_v57 = vld [vmem:[%s7994_s10 + $0xd0] ss:$8 sps:$4 sm:$0xff]   ;;  %v6567_v58 = vld [vmem:[%s7988_s8 + $0xe4] ss:$8 sps:$4 sm:$0xff]   ;;  %v6572_v61 = vld [vmem:[%s7994_s10 + $0xe0] ss:$8 sps:$4 sm:$0xff]  }
  0xac   : > { %3149 = vmatprep.subr.bf16.mxu1 %v6515_v22  ;;  %v6569_v59 = vld [vmem:[%s7994_s10 + $0xe4] ss:$8 sps:$4 sm:$0xff]   ;;  %v6573_v62 = vld [vmem:[%s7988_s8 + $0xf4] ss:$8 sps:$4 sm:$0xff]   ;;  %v6577_v0 = vld [vmem:[%s7988_s8 + $0xf0] ss:$8 sps:$4 sm:$0xff]  }
  0xad   : > { %v6575_v63 = vld [vmem:[%s7994_s10 + $0xf4] ss:$8 sps:$4 sm:$0xff]   ;;  %v6578_v1 = vld [vmem:[%s7994_s10 + $0xf0] ss:$8 sps:$4 sm:$0xff]   ;;  %v6584_v2 = vld [vmem:[%s7988_s8 + $0x104] ss:$8 sps:$4 sm:$0xff]  }
  0xae   : > { %1885 = vmatpush1.bf16.msra.mxu0 %v6517_v23  ;;  %v6587_v3 = vld [vmem:[%s7994_s10 + $0x104] ss:$8 sps:$4 sm:$0xff]   ;;  %v6579_v4 = vld [vmem:[#allocation2] ss:$40 sps:$4 sm:$0xff]   ;;  %v6590_v7 = vld [vmem:[%s7988_s8 + $0x114] ss:$8 sps:$4 sm:$0xff]  }
  0xaf   : > { %3150 = vmatpush1.bf16.msra.mxu1 %v6518_v24  ;;  %1886 = vmatprep.subr.bf16.mxu0 %v6519_v25  ;;  %v6582_v5 = vld [vmem:[%s7988_s8 + $0x100] ss:$8 sps:$4 sm:$0xff]   ;;  %v6593_v8 = vld [vmem:[%s7994_s10 + $0x114] ss:$8 sps:$4 sm:$0xff]   ;;  %v6588_v10 = vld [vmem:[%s7988_s8 + $0x110] ss:$8 sps:$4 sm:$0xff]  }
  0xb0   : > { %3151 = vmatprep.subr.bf16.mxu1 %v6521_v26  ;;  %v6585_v6 = vld [vmem:[%s7994_s10 + $0x100] ss:$8 sps:$4 sm:$0xff]   ;;  %v6618_v9 = vld [vmem:[#allocation2 + $0x54] ss:$40 sps:$4 sm:$0xff]   ;;  %v6591_v11 = vld [vmem:[%s7994_s10 + $0x110] ss:$8 sps:$4 sm:$0xff]  }
  0xb1   : > { %v6596_v12 = vld [vmem:[%s7988_s8 + $0x124] ss:$8 sps:$4 sm:$0xff]   ;;  %v6594_v14 = vld [vmem:[%s7988_s8 + $0x120] ss:$8 sps:$4 sm:$0xff]   ;;  %v6626_v16 = vld [vmem:[#allocation2 + $0x50] ss:$40 sps:$4 sm:$0xff]  }
  0xb2   : > { %1887 = vmatpush1.bf16.msra.mxu0 %v6523_v27  ;;  %v6599_v13 = vld [vmem:[%s7994_s10 + $0x124] ss:$8 sps:$4 sm:$0xff]   ;;  %v6597_v15 = vld [vmem:[%s7994_s10 + $0x120] ss:$8 sps:$4 sm:$0xff]   ;;  %v6602_v17 = vld [vmem:[%s7988_s8 + $0x134] ss:$8 sps:$4 sm:$0xff]  }
  0xb3   : > { %3152 = vmatpush1.bf16.msra.mxu1 %v6524_v28  ;;  %1888 = vmatprep.subr.bf16.mxu0 %v6525_v29  ;;  %v6605_v18 = vld [vmem:[%s7994_s10 + $0x134] ss:$8 sps:$4 sm:$0xff]   ;;  %v6633_v19 = vld [vmem:[#allocation2 + $0xa4] ss:$40 sps:$4 sm:$0xff]   ;;  %v6600_v20 = vld [vmem:[%s7988_s8 + $0x130] ss:$8 sps:$4 sm:$0xff]  }
  0xb4   : > { %3153 = vmatprep.subr.bf16.mxu1 %v6527_v30  ;;  %v6603_v21 = vld [vmem:[%s7994_s10 + $0x130] ss:$8 sps:$4 sm:$0xff]   ;;  %v6608_v22 = vld [vmem:[%s7988_s8 + $0x144] ss:$8 sps:$4 sm:$0xff]   ;;  %v6606_v24 = vld [vmem:[%s7988_s8 + $0x140] ss:$8 sps:$4 sm:$0xff]  }
  0xb5   : > { %v6611_v23 = vld [vmem:[%s7994_s10 + $0x144] ss:$8 sps:$4 sm:$0xff]   ;;  %v6609_v25 = vld [vmem:[%s7994_s10 + $0x140] ss:$8 sps:$4 sm:$0xff]   ;;  %v6614_v27 = vld [vmem:[%s7988_s8 + $0x154] ss:$8 sps:$4 sm:$0xff]  }
  0xb6   : > { %1889 = vmatpush1.bf16.msra.mxu0 %v6529_v31  ;;  %v6641_v26 = vld [vmem:[#allocation2 + $0xa0] ss:$40 sps:$4 sm:$0xff]   ;;  %v6617_v28 = vld [vmem:[%s7994_s10 + $0x154] ss:$8 sps:$4 sm:$0xff]   ;;  %v6612_v30 = vld [vmem:[%s7988_s8 + $0x150] ss:$8 sps:$4 sm:$0xff]  }
  0xb7   : > { %3154 = vmatpush1.bf16.msra.mxu1 %v6530_v32  ;;  %1890 = vmatprep.subr.bf16.mxu0 %v6531_v33  ;;  %v6648_v29 = vld [vmem:[#allocation2 + $0xf4] ss:$40 sps:$4 sm:$0xff]   ;;  %v6615_v31 = vld [vmem:[%s7994_s10 + $0x150] ss:$8 sps:$4 sm:$0xff]   ;;  %v6622_v32 = vld [vmem:[%s7988_s8 + $0x164] ss:$8 sps:$4 sm:$0xff]  }
  0xb8   : > { %3155 = vmatprep.subr.bf16.mxu1 %v6533_v34  ;;  %v6625_v33 = vld [vmem:[%s7994_s10 + $0x164] ss:$8 sps:$4 sm:$0xff]   ;;  %v6620_v34 = vld [vmem:[%s7988_s8 + $0x160] ss:$8 sps:$4 sm:$0xff]   ;;  %v6678_v49 = vld [vmem:[#allocation2 + $0x194] ss:$40 sps:$4 sm:$0xff]  }
  0xba   : > { %1891 = vmatpush1.bf16.msra.mxu0 %v6535_v35  ;;  %v6656_v35 = vld [vmem:[#allocation2 + $0xf0] ss:$40 sps:$4 sm:$0xff]  }
  0xbb   : > { %3156 = vmatpush1.bf16.msra.mxu1 %v6536_v36  ;;  %1892 = vmatprep.subr.bf16.mxu0 %v6537_v37  ;;  %v6623_v36 = vld [vmem:[%s7994_s10 + $0x160] ss:$8 sps:$4 sm:$0xff]   ;;  %v6629_v37 = vld [vmem:[%s7988_s8 + $0x174] ss:$8 sps:$4 sm:$0xff]  }
  0xbc   : > { %3157 = vmatprep.subr.bf16.mxu1 %v6539_v38  ;;  %v6632_v38 = vld [vmem:[%s7994_s10 + $0x174] ss:$8 sps:$4 sm:$0xff]  }
  0xbe   : > { %1893 = vmatpush1.bf16.msra.mxu0 %v6541_v39  ;;  %v6663_v39 = vld [vmem:[#allocation2 + $0x144] ss:$40 sps:$4 sm:$0xff]  }
  0xbf   : > { %3158 = vmatpush1.bf16.msra.mxu1 %v6542_v40  ;;  %1894 = vmatprep.subr.bf16.mxu0 %v6543_v41  ;;  %v6627_v40 = vld [vmem:[%s7988_s8 + $0x170] ss:$8 sps:$4 sm:$0xff]  }
  0xc0   : > { %3159 = vmatprep.subr.bf16.mxu1 %v6545_v42  ;;  %v6630_v41 = vld [vmem:[%s7994_s10 + $0x170] ss:$8 sps:$4 sm:$0xff]   ;;  %v6637_v42 = vld [vmem:[%s7988_s8 + $0x184] ss:$8 sps:$4 sm:$0xff]  }
  0xc2   : > { %1895 = vmatpush1.bf16.msra.mxu0 %v6547_v43  ;;  %v6640_v43 = vld [vmem:[%s7994_s10 + $0x184] ss:$8 sps:$4 sm:$0xff]  }
  0xc3   : > { %3160 = vmatpush1.bf16.msra.mxu1 %v6548_v44  ;;  %1896 = vmatprep.subr.bf16.mxu0 %v6549_v45  ;;  %v6635_v44 = vld [vmem:[%s7988_s8 + $0x180] ss:$8 sps:$4 sm:$0xff]  }
  0xc4   : > { %3161 = vmatprep.subr.bf16.mxu1 %v6551_v46  ;;  %v6638_v45 = vld [vmem:[%s7994_s10 + $0x180] ss:$8 sps:$4 sm:$0xff]  }
  0xc5   : > { %v6671_v46 = vld [vmem:[#allocation2 + $0x140] ss:$40 sps:$4 sm:$0xff]  }
  0xc6   : > { %1897 = vmatpush1.bf16.msra.mxu0 %v6553_v47  ;;  %v6644_v47 = vld [vmem:[%s7988_s8 + $0x194] ss:$8 sps:$4 sm:$0xff]  }
  0xc7   : > { %3162 = vmatpush1.bf16.msra.mxu1 %v6554_v48  ;;  %1898 = vmatprep.subr.bf16.mxu0 %v6555_v50  ;;  %v6647_v48 = vld [vmem:[%s7994_s10 + $0x194] ss:$8 sps:$4 sm:$0xff]   ;;  %v6642_v50 = vld [vmem:[%s7988_s8 + $0x190] ss:$8 sps:$4 sm:$0xff]  }
  0xc8   : > { %3163 = vmatprep.subr.bf16.mxu1 %v6557_v51  ;;  %v6645_v51 = vld [vmem:[%s7994_s10 + $0x190] ss:$8 sps:$4 sm:$0xff]  }
  0xca   : > { %1899 = vmatpush1.bf16.msra.mxu0 %v6559_v52  ;;  %v6652_v52 = vld [vmem:[%s7988_s8 + $0x1a4] ss:$8 sps:$4 sm:$0xff]  }
  0xcb   : > { %3164 = vmatpush1.bf16.msra.mxu1 %v6560_v53  ;;  %1900 = vmatprep.subr.bf16.mxu0 %v6561_v54  ;;  %v6655_v53 = vld [vmem:[%s7994_s10 + $0x1a4] ss:$8 sps:$4 sm:$0xff]   ;;  %v6650_v54 = vld [vmem:[%s7988_s8 + $0x1a0] ss:$8 sps:$4 sm:$0xff]  }
  0xcc   : > { %3165 = vmatprep.subr.bf16.mxu1 %v6563_v55  ;;  %v6653_v55 = vld [vmem:[%s7994_s10 + $0x1a0] ss:$8 sps:$4 sm:$0xff]  }
  0xce   : > { %1901 = vmatpush1.bf16.msra.mxu0 %v6565_v56  ;;  %v6686_v56 = vld [vmem:[#allocation2 + $0x190] ss:$40 sps:$4 sm:$0xff]  }
  0xcf   : > { %3166 = vmatpush1.bf16.msra.mxu1 %v6566_v57  ;;  %1902 = vmatprep.subr.bf16.mxu0 %v6567_v58  ;;  %v6659_v57 = vld [vmem:[%s7988_s8 + $0x1b4] ss:$8 sps:$4 sm:$0xff]  }
  0xd0   : > { %3167 = vmatprep.subr.bf16.mxu1 %v6569_v59  ;;  %v6662_v58 = vld [vmem:[%s7994_s10 + $0x1b4] ss:$8 sps:$4 sm:$0xff]  }
  0xd1   : > { %v6695_v59 = vld [vmem:[#allocation2 + $0xc] ss:$40 sps:$4 sm:$0xff]  }
  0xd2   : > { %1903 = vmatpush1.bf16.msra.mxu0 %v6571_v60  ;;  %v6657_v60 = vld [vmem:[%s7988_s8 + $0x1b0] ss:$8 sps:$4 sm:$0xff]  }
  0xd3   : > { %3168 = vmatpush1.bf16.msra.mxu1 %v6572_v61  ;;  %1904 = vmatprep.subr.bf16.mxu0 %v6573_v62  ;;  %v6660_v61 = vld [vmem:[%s7994_s10 + $0x1b0] ss:$8 sps:$4 sm:$0xff]   ;;  %v6667_v62 = vld [vmem:[%s7988_s8 + $0x1c4] ss:$8 sps:$4 sm:$0xff]  }
  0xd4   : > { %3169 = vmatprep.subr.bf16.mxu1 %v6575_v63  ;;  %v6670_v63 = vld [vmem:[%s7994_s10 + $0x1c4] ss:$8 sps:$4 sm:$0xff]  }
  0xd6   : > { %1905 = vmatpush1.bf16.msra.mxu0 %v6577_v0  ;;  %v6665_v0 = vld [vmem:[%s7988_s8 + $0x1c0] ss:$8 sps:$4 sm:$0xff]  }
  0xd7   : > { %3170 = vmatpush1.bf16.msra.mxu1 %v6578_v1  ;;  %1967 = vmatprep.subr.bf16.mxu0 %v6584_v2  ;;  %v6668_v1 = vld [vmem:[%s7994_s10 + $0x1c0] ss:$8 sps:$4 sm:$0xff]   ;;  %v6674_v2 = vld [vmem:[%s7988_s8 + $0x1d4] ss:$8 sps:$4 sm:$0xff]  }
  0xd8   : > { %3232 = vmatprep.subr.bf16.mxu1 %v6587_v3  ;;  %v6677_v3 = vld [vmem:[%s7994_s10 + $0x1d4] ss:$8 sps:$4 sm:$0xff]  }
  0xd9   : > { %1907 = vmatmul.mubr.bf16.vlgmr.msra.gmra.mrb[0].mxu0 %v6579_v4 }
  0xda   : > { %3172 = vmatmul.mubr.bf16.vlgmr.msra.gmra.mrb[0].mxu1 %v6579_v4  ;;  %1968 = vmatpush1.bf16.msra.mxu0 %v6582_v5  ;;  %v6672_v4 = vld [vmem:[%s7988_s8 + $0x1d0] ss:$8 sps:$4 sm:$0xff]  }
  0xdb   : > { %3233 = vmatpush1.bf16.msra.mxu1 %v6585_v6  ;;  %1969 = vmatprep.subr.bf16.mxu0 %v6590_v7  ;;  %v6675_v5 = vld [vmem:[%s7994_s10 + $0x1d0] ss:$8 sps:$4 sm:$0xff]   ;;  %v6682_v6 = vld [vmem:[%s7988_s8 + $0x1e4] ss:$8 sps:$4 sm:$0xff]  }
  0xdc   : > { %3234 = vmatprep.subr.bf16.mxu1 %v6593_v8  ;;  %1916 = vmatprep.mubr.bf16.mxu0 %v6618_v9  ;;  %v6685_v7 = vld [vmem:[%s7994_s10 + $0x1e4] ss:$8 sps:$4 sm:$0xff]   ;;  %v6680_v8 = vld [vmem:[%s7988_s8 + $0x1e0] ss:$8 sps:$4 sm:$0xff]  }
  0xdd   : > { %3181 = vmatprep.mubr.bf16.mxu1 %v6618_v9  ;;  %v6683_v9 = vld [vmem:[%s7994_s10 + $0x1e0] ss:$8 sps:$4 sm:$0xff]  }
  0xde   : > { %1970 = vmatpush1.bf16.msra.mxu0 %v6588_v10  ;;  %v6689_v10 = vld [vmem:[%s7988_s8 + $0x1f4] ss:$8 sps:$4 sm:$0xff]  }
  0xdf   : > { %3235 = vmatpush1.bf16.msra.mxu1 %v6591_v11  ;;  %1971 = vmatprep.subr.bf16.mxu0 %v6596_v12  ;;  %v6692_v11 = vld [vmem:[%s7994_s10 + $0x1f4] ss:$8 sps:$4 sm:$0xff]   ;;  %v6687_v12 = vld [vmem:[%s7988_s8 + $0x1f0] ss:$8 sps:$4 sm:$0xff]  }
  0xe0   : > { %3236 = vmatprep.subr.bf16.mxu1 %v6599_v13  ;;  %v6690_v13 = vld [vmem:[%s7994_s10 + $0x1f0] ss:$8 sps:$4 sm:$0xff]  }
  0xe1   : > { %1917 = vmatmul.mubr.bf16.gmra.mrb[4].mxu0 %v6626_v16 }
  0xe2   : > { %3182 = vmatmul.mubr.bf16.gmra.mrb[4].mxu1 %v6626_v16  ;;  %1972 = vmatpush1.bf16.msra.mxu0 %v6594_v14  ;;  %v6698_v14 = vld [vmem:[%s7988_s8 + $0x204] ss:$8 sps:$4 sm:$0xff]   ;;  %v6693_v16 = vld [vmem:[#allocation2 + $0x8] ss:$40 sps:$4 sm:$0xff]  }
  0xe3   : > { %3237 = vmatpush1.bf16.msra.mxu1 %v6597_v15  ;;  %1973 = vmatprep.subr.bf16.mxu0 %v6602_v17  ;;  %v6701_v15 = vld [vmem:[%s7994_s10 + $0x204] ss:$8 sps:$4 sm:$0xff]   ;;  %v6696_v17 = vld [vmem:[%s7988_s8 + $0x200] ss:$8 sps:$4 sm:$0xff]  }
  0xe4   : > { %3238 = vmatprep.subr.bf16.mxu1 %v6605_v18  ;;  %1926 = vmatprep.mubr.bf16.mxu0 %v6633_v19  ;;  %v6699_v18 = vld [vmem:[%s7994_s10 + $0x200] ss:$8 sps:$4 sm:$0xff]  }
  0xe5   : > { %3191 = vmatprep.mubr.bf16.mxu1 %v6633_v19  ;;  %v6704_v19 = vld [vmem:[%s7988_s8 + $0x214] ss:$8 sps:$4 sm:$0xff]  }
  0xe6   : > { %1974 = vmatpush1.bf16.msra.mxu0 %v6600_v20  ;;  %v6707_v20 = vld [vmem:[%s7994_s10 + $0x214] ss:$8 sps:$4 sm:$0xff]  }
  0xe7   : > { %3239 = vmatpush1.bf16.msra.mxu1 %v6603_v21  ;;  %1975 = vmatprep.subr.bf16.mxu0 %v6608_v22  ;;  %v6732_v21 = vld [vmem:[#allocation2 + $0x5c] ss:$40 sps:$4 sm:$0xff]   ;;  %v6702_v22 = vld [vmem:[%s7988_s8 + $0x210] ss:$8 sps:$4 sm:$0xff]  }
  0xe8   : > { %3240 = vmatprep.subr.bf16.mxu1 %v6611_v23  ;;  %v6705_v23 = vld [vmem:[%s7994_s10 + $0x210] ss:$8 sps:$4 sm:$0xff]  }
  0xe9   : > { %1927 = vmatmul.mubr.bf16.gmra.mrb[8].mxu0 %v6641_v26 }
  0xea   : > { %3192 = vmatmul.mubr.bf16.gmra.mrb[8].mxu1 %v6641_v26  ;;  %1976 = vmatpush1.bf16.msra.mxu0 %v6606_v24  ;;  %v6710_v24 = vld [vmem:[%s7988_s8 + $0x224] ss:$8 sps:$4 sm:$0xff]   ;;  %v6708_v26 = vld [vmem:[%s7988_s8 + $0x220] ss:$8 sps:$4 sm:$0xff]  }
  0xeb   : > { %3241 = vmatpush1.bf16.msra.mxu1 %v6609_v25  ;;  %1977 = vmatprep.subr.bf16.mxu0 %v6614_v27  ;;  %v6713_v25 = vld [vmem:[%s7994_s10 + $0x224] ss:$8 sps:$4 sm:$0xff]   ;;  %v6711_v27 = vld [vmem:[%s7994_s10 + $0x220] ss:$8 sps:$4 sm:$0xff]  }
  0xec   : > { %3242 = vmatprep.subr.bf16.mxu1 %v6617_v28  ;;  %1936 = vmatprep.mubr.bf16.mxu0 %v6648_v29  ;;  %v6740_v28 = vld [vmem:[#allocation2 + $0x58] ss:$40 sps:$4 sm:$0xff]  }
  0xed   : > { %3201 = vmatprep.mubr.bf16.mxu1 %v6648_v29  ;;  %v6716_v29 = vld [vmem:[%s7988_s8 + $0x234] ss:$8 sps:$4 sm:$0xff]  }
  0xee   : > { %1978 = vmatpush1.bf16.msra.mxu0 %v6612_v30  ;;  %v6719_v30 = vld [vmem:[%s7994_s10 + $0x234] ss:$8 sps:$4 sm:$0xff]  }
  0xef   : > { %3243 = vmatpush1.bf16.msra.mxu1 %v6615_v31  ;;  %1979 = vmatprep.subr.bf16.mxu0 %v6622_v32  ;;  %v6747_v31 = vld [vmem:[#allocation2 + $0xac] ss:$40 sps:$4 sm:$0xff]   ;;  %v6714_v32 = vld [vmem:[%s7988_s8 + $0x230] ss:$8 sps:$4 sm:$0xff]  }
  0xf0   : > { %3244 = vmatprep.subr.bf16.mxu1 %v6625_v33  ;;  %v6717_v33 = vld [vmem:[%s7994_s10 + $0x230] ss:$8 sps:$4 sm:$0xff]  }
  0xf1   : > { %1937 = vmatmul.mubr.bf16.gmra.mrb[12].mxu0 %v6656_v35 }
  0xf2   : > { %3202 = vmatmul.mubr.bf16.gmra.mrb[12].mxu1 %v6656_v35  ;;  %1980 = vmatpush1.bf16.msra.mxu0 %v6620_v34  ;;  %v6722_v34 = vld [vmem:[%s7988_s8 + $0x244] ss:$8 sps:$4 sm:$0xff]  }
  0xf3   : > { %3245 = vmatpush1.bf16.msra.mxu1 %v6623_v36  ;;  %1981 = vmatprep.subr.bf16.mxu0 %v6629_v37  ;;  %v6725_v35 = vld [vmem:[%s7994_s10 + $0x244] ss:$8 sps:$4 sm:$0xff]   ;;  %v6720_v36 = vld [vmem:[%s7988_s8 + $0x240] ss:$8 sps:$4 sm:$0xff]  }
  0xf4   : > { %3246 = vmatprep.subr.bf16.mxu1 %v6632_v38  ;;  %1946 = vmatprep.mubr.bf16.mxu0 %v6663_v39  ;;  %v6723_v37 = vld [vmem:[%s7994_s10 + $0x240] ss:$8 sps:$4 sm:$0xff]  }
  0xf5   : > { %3211 = vmatprep.mubr.bf16.mxu1 %v6663_v39  ;;  %v6755_v38 = vld [vmem:[#allocation2 + $0xa8] ss:$40 sps:$4 sm:$0xff]   ;;  %v6728_v39 = vld [vmem:[%s7988_s8 + $0x254] ss:$8 sps:$4 sm:$0xff]  }
  0xf6   : > { %1982 = vmatpush1.bf16.msra.mxu0 %v6627_v40  ;;  %v6731_v40 = vld [vmem:[%s7994_s10 + $0x254] ss:$8 sps:$4 sm:$0xff]  }
  0xf7   : > { %3247 = vmatpush1.bf16.msra.mxu1 %v6630_v41  ;;  %1983 = vmatprep.subr.bf16.mxu0 %v6637_v42  ;;  %v6762_v41 = vld [vmem:[#allocation2 + $0xfc] ss:$40 sps:$4 sm:$0xff]   ;;  %v6726_v42 = vld [vmem:[%s7988_s8 + $0x250] ss:$8 sps:$4 sm:$0xff]  }
  0xf8   : > { %3248 = vmatprep.subr.bf16.mxu1 %v6640_v43  ;;  %v6729_v43 = vld [vmem:[%s7994_s10 + $0x250] ss:$8 sps:$4 sm:$0xff]  }
  0xf9   : > { %1947 = vmatmul.mubr.bf16.gmra.mrb[16].mxu0 %v6671_v46 }
  0xfa   : > { %3212 = vmatmul.mubr.bf16.gmra.mrb[16].mxu1 %v6671_v46  ;;  %1984 = vmatpush1.bf16.msra.mxu0 %v6635_v44  ;;  %v6736_v44 = vld [vmem:[%s7988_s8 + $0x264] ss:$8 sps:$4 sm:$0xff]   ;;  %v6734_v46 = vld [vmem:[%s7988_s8 + $0x260] ss:$8 sps:$4 sm:$0xff]  }
  0xfb   : > { %3249 = vmatpush1.bf16.msra.mxu1 %v6638_v45  ;;  %1985 = vmatprep.subr.bf16.mxu0 %v6644_v47  ;;  %v6739_v45 = vld [vmem:[%s7994_s10 + $0x264] ss:$8 sps:$4 sm:$0xff]   ;;  %v6737_v47 = vld [vmem:[%s7994_s10 + $0x260] ss:$8 sps:$4 sm:$0xff]  }
  0xfc   : > { %3250 = vmatprep.subr.bf16.mxu1 %v6647_v48  ;;  %1956 = vmatprep.mubr.bf16.mxu0 %v6678_v49  ;;  %v6770_v48 = vld [vmem:[#allocation2 + $0xf8] ss:$40 sps:$4 sm:$0xff]  }
  0xfd   : > { %3221 = vmatprep.mubr.bf16.mxu1 %v6678_v49  ;;  %v6743_v49 = vld [vmem:[%s7988_s8 + $0x274] ss:$8 sps:$4 sm:$0xff]  }
  0xfe   : > { %1986 = vmatpush1.bf16.msra.mxu0 %v6642_v50  ;;  %v6746_v50 = vld [vmem:[%s7994_s10 + $0x274] ss:$8 sps:$4 sm:$0xff]  }
  0xff   : > { %3251 = vmatpush1.bf16.msra.mxu1 %v6645_v51  ;;  %1987 = vmatprep.subr.bf16.mxu0 %v6652_v52  ;;  %v6777_v51 = vld [vmem:[#allocation2 + $0x14c] ss:$40 sps:$4 sm:$0xff]   ;;  %v6741_v52 = vld [vmem:[%s7988_s8 + $0x270] ss:$8 sps:$4 sm:$0xff]  }
 0x100   : > { %3252 = vmatprep.subr.bf16.mxu1 %v6655_v53  ;;  %v6744_v53 = vld [vmem:[%s7994_s10 + $0x270] ss:$8 sps:$4 sm:$0xff]  }
 0x101   : > { %1957 = vmatmul.mubr.bf16.gmra.mrb[20].mxu0 %v6686_v56 }
 0x102   : > { %3222 = vmatmul.mubr.bf16.gmra.mrb[20].mxu1 %v6686_v56  ;;  %1988 = vmatpush1.bf16.msra.mxu0 %v6650_v54  ;;  %v6751_v54 = vld [vmem:[%s7988_s8 + $0x284] ss:$8 sps:$4 sm:$0xff]   ;;  %v6749_v56 = vld [vmem:[%s7988_s8 + $0x280] ss:$8 sps:$4 sm:$0xff]  }
 0x103   : > { %3253 = vmatpush1.bf16.msra.mxu1 %v6653_v55  ;;  %1989 = vmatprep.subr.bf16.mxu0 %v6659_v57  ;;  %v6754_v55 = vld [vmem:[%s7994_s10 + $0x284] ss:$8 sps:$4 sm:$0xff]   ;;  %v6752_v57 = vld [vmem:[%s7994_s10 + $0x280] ss:$8 sps:$4 sm:$0xff]  }
 0x104   : > { %3254 = vmatprep.subr.bf16.mxu1 %v6662_v58  ;;  %1999 = vmatprep.mubr.bf16.mxu0 %v6695_v59  ;;  %v6785_v58 = vld [vmem:[#allocation2 + $0x148] ss:$40 sps:$4 sm:$0xff]  }
 0x105   : > { %3264 = vmatprep.mubr.bf16.mxu1 %v6695_v59  ;;  %v6758_v59 = vld [vmem:[%s7988_s8 + $0x294] ss:$8 sps:$4 sm:$0xff]  }
 0x106   : > { %1990 = vmatpush1.bf16.msra.mxu0 %v6657_v60  ;;  %v6761_v60 = vld [vmem:[%s7994_s10 + $0x294] ss:$8 sps:$4 sm:$0xff]  }
 0x107   : > { %3255 = vmatpush1.bf16.msra.mxu1 %v6660_v61  ;;  %1991 = vmatprep.subr.bf16.mxu0 %v6667_v62  ;;  %v6792_v61 = vld [vmem:[#allocation2 + $0x19c] ss:$40 sps:$4 sm:$0xff]   ;;  %v6756_v62 = vld [vmem:[%s7988_s8 + $0x290] ss:$8 sps:$4 sm:$0xff]  }
 0x108   : > { %3256 = vmatprep.subr.bf16.mxu1 %v6670_v63  ;;  %v6759_v63 = vld [vmem:[%s7994_s10 + $0x290] ss:$8 sps:$4 sm:$0xff]  }
 0x10a   : > { %1992 = vmatpush1.bf16.msra.mxu0 %v6665_v0  ;;  %v6766_v0 = vld [vmem:[%s7988_s8 + $0x2a4] ss:$8 sps:$4 sm:$0xff]  }
 0x10b   : > { %3257 = vmatpush1.bf16.msra.mxu1 %v6668_v1  ;;  %1993 = vmatprep.subr.bf16.mxu0 %v6674_v2  ;;  %v6769_v1 = vld [vmem:[%s7994_s10 + $0x2a4] ss:$8 sps:$4 sm:$0xff]   ;;  %v6764_v2 = vld [vmem:[%s7988_s8 + $0x2a0] ss:$8 sps:$4 sm:$0xff]  }
 0x10c   : > { %3258 = vmatprep.subr.bf16.mxu1 %v6677_v3  ;;  %v6767_v3 = vld [vmem:[%s7994_s10 + $0x2a0] ss:$8 sps:$4 sm:$0xff]  }
 0x10e   : > { %1994 = vmatpush1.bf16.msra.mxu0 %v6672_v4  ;;  %v6800_v4 = vld [vmem:[#allocation2 + $0x198] ss:$40 sps:$4 sm:$0xff]  }
 0x10f   : > { %3259 = vmatpush1.bf16.msra.mxu1 %v6675_v5  ;;  %1995 = vmatprep.subr.bf16.mxu0 %v6682_v6  ;;  %v6773_v5 = vld [vmem:[%s7988_s8 + $0x2b4] ss:$8 sps:$4 sm:$0xff]  }
 0x110   : > { %3260 = vmatprep.subr.bf16.mxu1 %v6685_v7  ;;  %v6776_v6 = vld [vmem:[%s7994_s10 + $0x2b4] ss:$8 sps:$4 sm:$0xff]  }
 0x111   : > { %v6809_v7 = vld [vmem:[#allocation2 + $0x14] ss:$40 sps:$4 sm:$0xff]  }
 0x112   : > { %1996 = vmatpush1.bf16.msra.mxu0 %v6680_v8  ;;  %v6771_v8 = vld [vmem:[%s7988_s8 + $0x2b0] ss:$8 sps:$4 sm:$0xff]  }
 0x113   : > { %3261 = vmatpush1.bf16.msra.mxu1 %v6683_v9  ;;  %1997 = vmatprep.subr.bf16.mxu0 %v6689_v10  ;;  %v6774_v9 = vld [vmem:[%s7994_s10 + $0x2b0] ss:$8 sps:$4 sm:$0xff]   ;;  %v6781_v10 = vld [vmem:[%s7988_s8 + $0x2c4] ss:$8 sps:$4 sm:$0xff]  }
 0x114   : > { %3262 = vmatprep.subr.bf16.mxu1 %v6692_v11  ;;  %v6784_v11 = vld [vmem:[%s7994_s10 + $0x2c4] ss:$8 sps:$4 sm:$0xff]  }
 0x116   : > { %1998 = vmatpush1.bf16.msra.mxu0 %v6687_v12  ;;  %v6779_v12 = vld [vmem:[%s7988_s8 + $0x2c0] ss:$8 sps:$4 sm:$0xff]  }
 0x117   : > { %3263 = vmatpush1.bf16.msra.mxu1 %v6690_v13  ;;  %2060 = vmatprep.subr.bf16.mxu0 %v6698_v14  ;;  %v6782_v13 = vld [vmem:[%s7994_s10 + $0x2c0] ss:$8 sps:$4 sm:$0xff]   ;;  %v6788_v14 = vld [vmem:[%s7988_s8 + $0x2d4] ss:$8 sps:$4 sm:$0xff]  }
 0x118   : > { %3325 = vmatprep.subr.bf16.mxu1 %v6701_v15  ;;  %v6791_v15 = vld [vmem:[%s7994_s10 + $0x2d4] ss:$8 sps:$4 sm:$0xff]  }
 0x119   : > { %2000 = vmatmul.mubr.bf16.vlgmr.msra.gmra.mrb[0].mxu0 %v6693_v16 }
 0x11a   : > { %3265 = vmatmul.mubr.bf16.vlgmr.msra.gmra.mrb[0].mxu1 %v6693_v16  ;;  %2061 = vmatpush1.bf16.msra.mxu0 %v6696_v17  ;;  %v6786_v16 = vld [vmem:[%s7988_s8 + $0x2d0] ss:$8 sps:$4 sm:$0xff]  }
 0x11b   : > { %3326 = vmatpush1.bf16.msra.mxu1 %v6699_v18  ;;  %2062 = vmatprep.subr.bf16.mxu0 %v6704_v19  ;;  %v6789_v17 = vld [vmem:[%s7994_s10 + $0x2d0] ss:$8 sps:$4 sm:$0xff]   ;;  %v6796_v18 = vld [vmem:[%s7988_s8 + $0x2e4] ss:$8 sps:$4 sm:$0xff]  }
 0x11c   : > { %3327 = vmatprep.subr.bf16.mxu1 %v6707_v20  ;;  %2009 = vmatprep.mubr.bf16.mxu0 %v6732_v21  ;;  %v6799_v19 = vld [vmem:[%s7994_s10 + $0x2e4] ss:$8 sps:$4 sm:$0xff]   ;;  %v6794_v20 = vld [vmem:[%s7988_s8 + $0x2e0] ss:$8 sps:$4 sm:$0xff]  }
 0x11d   : > { %3274 = vmatprep.mubr.bf16.mxu1 %v6732_v21  ;;  %v6797_v21 = vld [vmem:[%s7994_s10 + $0x2e0] ss:$8 sps:$4 sm:$0xff]  }
 0x11e   : > { %2063 = vmatpush1.bf16.msra.mxu0 %v6702_v22  ;;  %v6803_v22 = vld [vmem:[%s7988_s8 + $0x2f4] ss:$8 sps:$4 sm:$0xff]  }
 0x11f   : > { %3328 = vmatpush1.bf16.msra.mxu1 %v6705_v23  ;;  %2064 = vmatprep.subr.bf16.mxu0 %v6710_v24  ;;  %v6806_v23 = vld [vmem:[%s7994_s10 + $0x2f4] ss:$8 sps:$4 sm:$0xff]   ;;  %v6801_v24 = vld [vmem:[%s7988_s8 + $0x2f0] ss:$8 sps:$4 sm:$0xff]  }
 0x120   : > { %3329 = vmatprep.subr.bf16.mxu1 %v6713_v25  ;;  %v6804_v25 = vld [vmem:[%s7994_s10 + $0x2f0] ss:$8 sps:$4 sm:$0xff]  }
 0x121   : > { %2010 = vmatmul.mubr.bf16.gmra.mrb[4].mxu0 %v6740_v28 }
 0x122   : > { %3275 = vmatmul.mubr.bf16.gmra.mrb[4].mxu1 %v6740_v28  ;;  %2065 = vmatpush1.bf16.msra.mxu0 %v6708_v26  ;;  %v6812_v26 = vld [vmem:[%s7988_s8 + $0x304] ss:$8 sps:$4 sm:$0xff]   ;;  %v6807_v28 = vld [vmem:[#allocation2 + $0x10] ss:$40 sps:$4 sm:$0xff]  }
 0x123   : > { %3330 = vmatpush1.bf16.msra.mxu1 %v6711_v27  ;;  %2066 = vmatprep.subr.bf16.mxu0 %v6716_v29  ;;  %v6815_v27 = vld [vmem:[%s7994_s10 + $0x304] ss:$8 sps:$4 sm:$0xff]   ;;  %v6810_v29 = vld [vmem:[%s7988_s8 + $0x300] ss:$8 sps:$4 sm:$0xff]  }
 0x124   : > { %3331 = vmatprep.subr.bf16.mxu1 %v6719_v30  ;;  %2019 = vmatprep.mubr.bf16.mxu0 %v6747_v31  ;;  %v6813_v30 = vld [vmem:[%s7994_s10 + $0x300] ss:$8 sps:$4 sm:$0xff]  }
 0x125   : > { %3284 = vmatprep.mubr.bf16.mxu1 %v6747_v31  ;;  %v6818_v31 = vld [vmem:[%s7988_s8 + $0x314] ss:$8 sps:$4 sm:$0xff]  }
 0x126   : > { %2067 = vmatpush1.bf16.msra.mxu0 %v6714_v32  ;;  %v6821_v32 = vld [vmem:[%s7994_s10 + $0x314] ss:$8 sps:$4 sm:$0xff]  }
 0x127   : > { %3332 = vmatpush1.bf16.msra.mxu1 %v6717_v33  ;;  %2068 = vmatprep.subr.bf16.mxu0 %v6722_v34  ;;  %v6846_v33 = vld [vmem:[#allocation2 + $0x64] ss:$40 sps:$4 sm:$0xff]   ;;  %v6816_v34 = vld [vmem:[%s7988_s8 + $0x310] ss:$8 sps:$4 sm:$0xff]  }
 0x128   : > { %3333 = vmatprep.subr.bf16.mxu1 %v6725_v35  ;;  %v6819_v35 = vld [vmem:[%s7994_s10 + $0x310] ss:$8 sps:$4 sm:$0xff]  }
 0x129   : > { %2020 = vmatmul.mubr.bf16.gmra.mrb[8].mxu0 %v6755_v38 }
 0x12a   : > { %3285 = vmatmul.mubr.bf16.gmra.mrb[8].mxu1 %v6755_v38  ;;  %2069 = vmatpush1.bf16.msra.mxu0 %v6720_v36  ;;  %v6824_v36 = vld [vmem:[%s7988_s8 + $0x324] ss:$8 sps:$4 sm:$0xff]   ;;  %v6822_v38 = vld [vmem:[%s7988_s8 + $0x320] ss:$8 sps:$4 sm:$0xff]  }
 0x12b   : > { %3334 = vmatpush1.bf16.msra.mxu1 %v6723_v37  ;;  %2070 = vmatprep.subr.bf16.mxu0 %v6728_v39  ;;  %v6827_v37 = vld [vmem:[%s7994_s10 + $0x324] ss:$8 sps:$4 sm:$0xff]   ;;  %v6825_v39 = vld [vmem:[%s7994_s10 + $0x320] ss:$8 sps:$4 sm:$0xff]  }
 0x12c   : > { %3335 = vmatprep.subr.bf16.mxu1 %v6731_v40  ;;  %2029 = vmatprep.mubr.bf16.mxu0 %v6762_v41  ;;  %v6854_v40 = vld [vmem:[#allocation2 + $0x60] ss:$40 sps:$4 sm:$0xff]  }
 0x12d   : > { %3294 = vmatprep.mubr.bf16.mxu1 %v6762_v41  ;;  %v6830_v41 = vld [vmem:[%s7988_s8 + $0x334] ss:$8 sps:$4 sm:$0xff]  }
 0x12e   : > { %2071 = vmatpush1.bf16.msra.mxu0 %v6726_v42  ;;  %v6833_v42 = vld [vmem:[%s7994_s10 + $0x334] ss:$8 sps:$4 sm:$0xff]  }
 0x12f   : > { %3336 = vmatpush1.bf16.msra.mxu1 %v6729_v43  ;;  %2072 = vmatprep.subr.bf16.mxu0 %v6736_v44  ;;  %v6861_v43 = vld [vmem:[#allocation2 + $0xb4] ss:$40 sps:$4 sm:$0xff]   ;;  %v6828_v44 = vld [vmem:[%s7988_s8 + $0x330] ss:$8 sps:$4 sm:$0xff]  }
 0x130   : > { %3337 = vmatprep.subr.bf16.mxu1 %v6739_v45  ;;  %v6831_v45 = vld [vmem:[%s7994_s10 + $0x330] ss:$8 sps:$4 sm:$0xff]  }
 0x131   : > { %2030 = vmatmul.mubr.bf16.gmra.mrb[12].mxu0 %v6770_v48 }
 0x132   : > { %3295 = vmatmul.mubr.bf16.gmra.mrb[12].mxu1 %v6770_v48  ;;  %2073 = vmatpush1.bf16.msra.mxu0 %v6734_v46  ;;  %v6836_v46 = vld [vmem:[%s7988_s8 + $0x344] ss:$8 sps:$4 sm:$0xff]   ;;  %v6834_v48 = vld [vmem:[%s7988_s8 + $0x340] ss:$8 sps:$4 sm:$0xff]  }
 0x133   : > { %3338 = vmatpush1.bf16.msra.mxu1 %v6737_v47  ;;  %2074 = vmatprep.subr.bf16.mxu0 %v6743_v49  ;;  %v6839_v47 = vld [vmem:[%s7994_s10 + $0x344] ss:$8 sps:$4 sm:$0xff]   ;;  %v6837_v49 = vld [vmem:[%s7994_s10 + $0x340] ss:$8 sps:$4 sm:$0xff]  }
 0x134   : > { %3339 = vmatprep.subr.bf16.mxu1 %v6746_v50  ;;  %2039 = vmatprep.mubr.bf16.mxu0 %v6777_v51  ;;  %v6869_v50 = vld [vmem:[#allocation2 + $0xb0] ss:$40 sps:$4 sm:$0xff]  }
 0x135   : > { %3304 = vmatprep.mubr.bf16.mxu1 %v6777_v51  ;;  %v6842_v51 = vld [vmem:[%s7988_s8 + $0x354] ss:$8 sps:$4 sm:$0xff]  }
 0x136   : > { %2075 = vmatpush1.bf16.msra.mxu0 %v6741_v52  ;;  %v6845_v52 = vld [vmem:[%s7994_s10 + $0x354] ss:$8 sps:$4 sm:$0xff]  }
 0x137   : > { %3340 = vmatpush1.bf16.msra.mxu1 %v6744_v53  ;;  %2076 = vmatprep.subr.bf16.mxu0 %v6751_v54  ;;  %v6876_v53 = vld [vmem:[#allocation2 + $0x104] ss:$40 sps:$4 sm:$0xff]   ;;  %v6840_v54 = vld [vmem:[%s7988_s8 + $0x350] ss:$8 sps:$4 sm:$0xff]  }
 0x138   : > { %3341 = vmatprep.subr.bf16.mxu1 %v6754_v55  ;;  %v6843_v55 = vld [vmem:[%s7994_s10 + $0x350] ss:$8 sps:$4 sm:$0xff]  }
 0x139   : > { %2040 = vmatmul.mubr.bf16.gmra.mrb[16].mxu0 %v6785_v58 }
 0x13a   : > { %3305 = vmatmul.mubr.bf16.gmra.mrb[16].mxu1 %v6785_v58  ;;  %2077 = vmatpush1.bf16.msra.mxu0 %v6749_v56  ;;  %v6850_v56 = vld [vmem:[%s7988_s8 + $0x364] ss:$8 sps:$4 sm:$0xff]   ;;  %v6848_v58 = vld [vmem:[%s7988_s8 + $0x360] ss:$8 sps:$4 sm:$0xff]  }
 0x13b   : > { %3342 = vmatpush1.bf16.msra.mxu1 %v6752_v57  ;;  %2078 = vmatprep.subr.bf16.mxu0 %v6758_v59  ;;  %v6853_v57 = vld [vmem:[%s7994_s10 + $0x364] ss:$8 sps:$4 sm:$0xff]   ;;  %v6851_v59 = vld [vmem:[%s7994_s10 + $0x360] ss:$8 sps:$4 sm:$0xff]  }
 0x13c   : > { %3343 = vmatprep.subr.bf16.mxu1 %v6761_v60  ;;  %2049 = vmatprep.mubr.bf16.mxu0 %v6792_v61  ;;  %v6884_v60 = vld [vmem:[#allocation2 + $0x100] ss:$40 sps:$4 sm:$0xff]  }
 0x13d   : > { %3314 = vmatprep.mubr.bf16.mxu1 %v6792_v61  ;;  %v6857_v61 = vld [vmem:[%s7988_s8 + $0x374] ss:$8 sps:$4 sm:$0xff]  }
 0x13e   : > { %2079 = vmatpush1.bf16.msra.mxu0 %v6756_v62  ;;  %v6860_v62 = vld [vmem:[%s7994_s10 + $0x374] ss:$8 sps:$4 sm:$0xff]  }
 0x13f   : > { %3344 = vmatpush1.bf16.msra.mxu1 %v6759_v63  ;;  %2080 = vmatprep.subr.bf16.mxu0 %v6766_v0  ;;  %v6891_v63 = vld [vmem:[#allocation2 + $0x154] ss:$40 sps:$4 sm:$0xff]   ;;  %v6855_v0 = vld [vmem:[%s7988_s8 + $0x370] ss:$8 sps:$4 sm:$0xff]  }
 0x140   : > { %3345 = vmatprep.subr.bf16.mxu1 %v6769_v1  ;;  %v6858_v1 = vld [vmem:[%s7994_s10 + $0x370] ss:$8 sps:$4 sm:$0xff]  }
 0x141   : > { %2050 = vmatmul.mubr.bf16.gmra.mrb[20].mxu0 %v6800_v4 }
 0x142   : > { %3315 = vmatmul.mubr.bf16.gmra.mrb[20].mxu1 %v6800_v4  ;;  %2081 = vmatpush1.bf16.msra.mxu0 %v6764_v2  ;;  %v6865_v2 = vld [vmem:[%s7988_s8 + $0x384] ss:$8 sps:$4 sm:$0xff]   ;;  %v6863_v4 = vld [vmem:[%s7988_s8 + $0x380] ss:$8 sps:$4 sm:$0xff]  }
 0x143   : > { %3346 = vmatpush1.bf16.msra.mxu1 %v6767_v3  ;;  %2082 = vmatprep.subr.bf16.mxu0 %v6773_v5  ;;  %v6868_v3 = vld [vmem:[%s7994_s10 + $0x384] ss:$8 sps:$4 sm:$0xff]   ;;  %v6866_v5 = vld [vmem:[%s7994_s10 + $0x380] ss:$8 sps:$4 sm:$0xff]  }
 0x144   : > { %3347 = vmatprep.subr.bf16.mxu1 %v6776_v6  ;;  %2092 = vmatprep.mubr.bf16.mxu0 %v6809_v7  ;;  %v6899_v6 = vld [vmem:[#allocation2 + $0x150] ss:$40 sps:$4 sm:$0xff]  }
 0x145   : > { %3357 = vmatprep.mubr.bf16.mxu1 %v6809_v7  ;;  %v6872_v7 = vld [vmem:[%s7988_s8 + $0x394] ss:$8 sps:$4 sm:$0xff]  }
 0x146   : > { %2083 = vmatpush1.bf16.msra.mxu0 %v6771_v8  ;;  %v6875_v8 = vld [vmem:[%s7994_s10 + $0x394] ss:$8 sps:$4 sm:$0xff]  }
 0x147   : > { %3348 = vmatpush1.bf16.msra.mxu1 %v6774_v9  ;;  %2084 = vmatprep.subr.bf16.mxu0 %v6781_v10  ;;  %v6906_v9 = vld [vmem:[#allocation2 + $0x1a4] ss:$40 sps:$4 sm:$0xff]   ;;  %v6870_v10 = vld [vmem:[%s7988_s8 + $0x390] ss:$8 sps:$4 sm:$0xff]  }
 0x148   : > { %3349 = vmatprep.subr.bf16.mxu1 %v6784_v11  ;;  %v6873_v11 = vld [vmem:[%s7994_s10 + $0x390] ss:$8 sps:$4 sm:$0xff]  }
 0x14a   : > { %2085 = vmatpush1.bf16.msra.mxu0 %v6779_v12  ;;  %v6880_v12 = vld [vmem:[%s7988_s8 + $0x3a4] ss:$8 sps:$4 sm:$0xff]  }
 0x14b   : > { %3350 = vmatpush1.bf16.msra.mxu1 %v6782_v13  ;;  %2086 = vmatprep.subr.bf16.mxu0 %v6788_v14  ;;  %v6883_v13 = vld [vmem:[%s7994_s10 + $0x3a4] ss:$8 sps:$4 sm:$0xff]   ;;  %v6878_v14 = vld [vmem:[%s7988_s8 + $0x3a0] ss:$8 sps:$4 sm:$0xff]  }
 0x14c   : > { %3351 = vmatprep.subr.bf16.mxu1 %v6791_v15  ;;  %v6881_v15 = vld [vmem:[%s7994_s10 + $0x3a0] ss:$8 sps:$4 sm:$0xff]  }
 0x14e   : > { %2087 = vmatpush1.bf16.msra.mxu0 %v6786_v16  ;;  %v6914_v16 = vld [vmem:[#allocation2 + $0x1a0] ss:$40 sps:$4 sm:$0xff]  }
 0x14f   : > { %3352 = vmatpush1.bf16.msra.mxu1 %v6789_v17  ;;  %2088 = vmatprep.subr.bf16.mxu0 %v6796_v18  ;;  %v6887_v17 = vld [vmem:[%s7988_s8 + $0x3b4] ss:$8 sps:$4 sm:$0xff]  }
 0x150   : > { %3353 = vmatprep.subr.bf16.mxu1 %v6799_v19  ;;  %v6890_v18 = vld [vmem:[%s7994_s10 + $0x3b4] ss:$8 sps:$4 sm:$0xff]  }
 0x151   : > { %v6923_v19 = vld [vmem:[#allocation2 + $0x1c] ss:$40 sps:$4 sm:$0xff]  }
 0x152   : > { %2089 = vmatpush1.bf16.msra.mxu0 %v6794_v20  ;;  %v6885_v20 = vld [vmem:[%s7988_s8 + $0x3b0] ss:$8 sps:$4 sm:$0xff]  }
 0x153   : > { %3354 = vmatpush1.bf16.msra.mxu1 %v6797_v21  ;;  %2090 = vmatprep.subr.bf16.mxu0 %v6803_v22  ;;  %v6888_v21 = vld [vmem:[%s7994_s10 + $0x3b0] ss:$8 sps:$4 sm:$0xff]   ;;  %v6895_v22 = vld [vmem:[%s7988_s8 + $0x3c4] ss:$8 sps:$4 sm:$0xff]  }
 0x154   : > { %3355 = vmatprep.subr.bf16.mxu1 %v6806_v23  ;;  %v6898_v23 = vld [vmem:[%s7994_s10 + $0x3c4] ss:$8 sps:$4 sm:$0xff]  }
 0x156   : > { %2091 = vmatpush1.bf16.msra.mxu0 %v6801_v24  ;;  %v6893_v24 = vld [vmem:[%s7988_s8 + $0x3c0] ss:$8 sps:$4 sm:$0xff]  }
 0x157   : > { %3356 = vmatpush1.bf16.msra.mxu1 %v6804_v25  ;;  %2153 = vmatprep.subr.bf16.mxu0 %v6812_v26  ;;  %v6896_v25 = vld [vmem:[%s7994_s10 + $0x3c0] ss:$8 sps:$4 sm:$0xff]   ;;  %v6902_v26 = vld [vmem:[%s7988_s8 + $0x3d4] ss:$8 sps:$4 sm:$0xff]  }
 0x158   : > { %3418 = vmatprep.subr.bf16.mxu1 %v6815_v27  ;;  %v6905_v27 = vld [vmem:[%s7994_s10 + $0x3d4] ss:$8 sps:$4 sm:$0xff]  }
 0x159   : > { %2093 = vmatmul.mubr.bf16.vlgmr.msra.gmra.mrb[0].mxu0 %v6807_v28 }
 0x15a   : > { %3358 = vmatmul.mubr.bf16.vlgmr.msra.gmra.mrb[0].mxu1 %v6807_v28  ;;  %2154 = vmatpush1.bf16.msra.mxu0 %v6810_v29  ;;  %v6900_v28 = vld [vmem:[%s7988_s8 + $0x3d0] ss:$8 sps:$4 sm:$0xff]  }
 0x15b   : > { %3419 = vmatpush1.bf16.msra.mxu1 %v6813_v30  ;;  %2155 = vmatprep.subr.bf16.mxu0 %v6818_v31  ;;  %v6903_v29 = vld [vmem:[%s7994_s10 + $0x3d0] ss:$8 sps:$4 sm:$0xff]   ;;  %v6910_v30 = vld [vmem:[%s7988_s8 + $0x3e4] ss:$8 sps:$4 sm:$0xff]  }
 0x15c   : > { %3420 = vmatprep.subr.bf16.mxu1 %v6821_v32  ;;  %2102 = vmatprep.mubr.bf16.mxu0 %v6846_v33  ;;  %v6913_v31 = vld [vmem:[%s7994_s10 + $0x3e4] ss:$8 sps:$4 sm:$0xff]   ;;  %v6908_v32 = vld [vmem:[%s7988_s8 + $0x3e0] ss:$8 sps:$4 sm:$0xff]  }
 0x15d   : > { %3367 = vmatprep.mubr.bf16.mxu1 %v6846_v33  ;;  %v6911_v33 = vld [vmem:[%s7994_s10 + $0x3e0] ss:$8 sps:$4 sm:$0xff]  }
 0x15e   : > { %2156 = vmatpush1.bf16.msra.mxu0 %v6816_v34  ;;  %v6917_v34 = vld [vmem:[%s7988_s8 + $0x3f4] ss:$8 sps:$4 sm:$0xff]  }
 0x15f   : > { %3421 = vmatpush1.bf16.msra.mxu1 %v6819_v35  ;;  %2157 = vmatprep.subr.bf16.mxu0 %v6824_v36  ;;  %v6920_v35 = vld [vmem:[%s7994_s10 + $0x3f4] ss:$8 sps:$4 sm:$0xff]   ;;  %v6915_v36 = vld [vmem:[%s7988_s8 + $0x3f0] ss:$8 sps:$4 sm:$0xff]  }
 0x160   : > { %3422 = vmatprep.subr.bf16.mxu1 %v6827_v37  ;;  %v6918_v37 = vld [vmem:[%s7994_s10 + $0x3f0] ss:$8 sps:$4 sm:$0xff]  }
 0x161   : > { %2103 = vmatmul.mubr.bf16.gmra.mrb[4].mxu0 %v6854_v40 }
 0x162   : > { %3368 = vmatmul.mubr.bf16.gmra.mrb[4].mxu1 %v6854_v40  ;;  %2158 = vmatpush1.bf16.msra.mxu0 %v6822_v38  ;;  %v6926_v38 = vld [vmem:[%s7988_s8 + $0x404] ss:$8 sps:$4 sm:$0xff]  }
 0x163   : > { %3423 = vmatpush1.bf16.msra.mxu1 %v6825_v39  ;;  %2159 = vmatprep.subr.bf16.mxu0 %v6830_v41  ;;  %v6921_v39 = vld [vmem:[#allocation2 + $0x18] ss:$40 sps:$4 sm:$0xff]   ;;  %v6929_v40 = vld [vmem:[%s7994_s10 + $0x404] ss:$8 sps:$4 sm:$0xff]  }
 0x164   : > { %3424 = vmatprep.subr.bf16.mxu1 %v6833_v42  ;;  %2112 = vmatprep.mubr.bf16.mxu0 %v6861_v43  ;;  %v6924_v41 = vld [vmem:[%s7988_s8 + $0x400] ss:$8 sps:$4 sm:$0xff]  }
 0x165   : > { %3377 = vmatprep.mubr.bf16.mxu1 %v6861_v43  ;;  %v6927_v42 = vld [vmem:[%s7994_s10 + $0x400] ss:$8 sps:$4 sm:$0xff]   ;;  %v6932_v43 = vld [vmem:[%s7988_s8 + $0x414] ss:$8 sps:$4 sm:$0xff]  }
 0x166   : > { %2160 = vmatpush1.bf16.msra.mxu0 %v6828_v44  ;;  %v6935_v44 = vld [vmem:[%s7994_s10 + $0x414] ss:$8 sps:$4 sm:$0xff]  }
 0x167   : > { %3425 = vmatpush1.bf16.msra.mxu1 %v6831_v45  ;;  %2161 = vmatprep.subr.bf16.mxu0 %v6836_v46  ;;  %v6960_v45 = vld [vmem:[#allocation2 + $0x6c] ss:$40 sps:$4 sm:$0xff]   ;;  %v6930_v46 = vld [vmem:[%s7988_s8 + $0x410] ss:$8 sps:$4 sm:$0xff]  }
 0x168   : > { %3426 = vmatprep.subr.bf16.mxu1 %v6839_v47  ;;  %v6933_v47 = vld [vmem:[%s7994_s10 + $0x410] ss:$8 sps:$4 sm:$0xff]  }
 0x169   : > { %2113 = vmatmul.mubr.bf16.gmra.mrb[8].mxu0 %v6869_v50 }
 0x16a   : > { %3378 = vmatmul.mubr.bf16.gmra.mrb[8].mxu1 %v6869_v50  ;;  %2162 = vmatpush1.bf16.msra.mxu0 %v6834_v48  ;;  %v6938_v48 = vld [vmem:[%s7988_s8 + $0x424] ss:$8 sps:$4 sm:$0xff]   ;;  %v6962_v50 = vld [vmem:[#allocation2 + $0x68] ss:$40 sps:$4 sm:$0xff]  }
 0x16b   : > { %3427 = vmatpush1.bf16.msra.mxu1 %v6837_v49  ;;  %2163 = vmatprep.subr.bf16.mxu0 %v6842_v51  ;;  %v6941_v49 = vld [vmem:[%s7994_s10 + $0x424] ss:$8 sps:$4 sm:$0xff]   ;;  %v6936_v51 = vld [vmem:[%s7988_s8 + $0x420] ss:$8 sps:$4 sm:$0xff]  }
 0x16c   : > { %3428 = vmatprep.subr.bf16.mxu1 %v6845_v52  ;;  %2122 = vmatprep.mubr.bf16.mxu0 %v6876_v53  ;;  %v6939_v52 = vld [vmem:[%s7994_s10 + $0x420] ss:$8 sps:$4 sm:$0xff]  }
 0x16d   : > { %3387 = vmatprep.mubr.bf16.mxu1 %v6876_v53  ;;  %v6944_v53 = vld [vmem:[%s7988_s8 + $0x434] ss:$8 sps:$4 sm:$0xff]  }
 0x16e   : > { %2164 = vmatpush1.bf16.msra.mxu0 %v6840_v54  ;;  %v6947_v54 = vld [vmem:[%s7994_s10 + $0x434] ss:$8 sps:$4 sm:$0xff]  }
 0x16f   : > { %3429 = vmatpush1.bf16.msra.mxu1 %v6843_v55  ;;  %2165 = vmatprep.subr.bf16.mxu0 %v6850_v56  ;;  %v6975_v55 = vld [vmem:[#allocation2 + $0xbc] ss:$40 sps:$4 sm:$0xff]   ;;  %v6942_v56 = vld [vmem:[%s7988_s8 + $0x430] ss:$8 sps:$4 sm:$0xff]  }
 0x170   : > { %3430 = vmatprep.subr.bf16.mxu1 %v6853_v57  ;;  %v6945_v57 = vld [vmem:[%s7994_s10 + $0x430] ss:$8 sps:$4 sm:$0xff]  }
 0x171   : > { %2123 = vmatmul.mubr.bf16.gmra.mrb[12].mxu0 %v6884_v60 }
 0x172   : > { %3388 = vmatmul.mubr.bf16.gmra.mrb[12].mxu1 %v6884_v60  ;;  %2166 = vmatpush1.bf16.msra.mxu0 %v6848_v58  ;;  %v6950_v58 = vld [vmem:[%s7988_s8 + $0x444] ss:$8 sps:$4 sm:$0xff]   ;;  %v6977_v60 = vld [vmem:[#allocation2 + $0xb8] ss:$40 sps:$4 sm:$0xff]  }
 0x173   : > { %3431 = vmatpush1.bf16.msra.mxu1 %v6851_v59  ;;  %2167 = vmatprep.subr.bf16.mxu0 %v6857_v61  ;;  %v6953_v59 = vld [vmem:[%s7994_s10 + $0x444] ss:$8 sps:$4 sm:$0xff]   ;;  %v6948_v61 = vld [vmem:[%s7988_s8 + $0x440] ss:$8 sps:$4 sm:$0xff]  }
 0x174   : > { %3432 = vmatprep.subr.bf16.mxu1 %v6860_v62  ;;  %2132 = vmatprep.mubr.bf16.mxu0 %v6891_v63  ;;  %v6951_v62 = vld [vmem:[%s7994_s10 + $0x440] ss:$8 sps:$4 sm:$0xff]  }
 0x175   : > { %3397 = vmatprep.mubr.bf16.mxu1 %v6891_v63  ;;  %v6956_v63 = vld [vmem:[%s7988_s8 + $0x454] ss:$8 sps:$4 sm:$0xff]  }
 0x176   : > { %2168 = vmatpush1.bf16.msra.mxu0 %v6855_v0  ;;  %v6959_v0 = vld [vmem:[%s7994_s10 + $0x454] ss:$8 sps:$4 sm:$0xff]  }
 0x177   : > { %3433 = vmatpush1.bf16.msra.mxu1 %v6858_v1  ;;  %2169 = vmatprep.subr.bf16.mxu0 %v6865_v2  ;;  %v6990_v1 = vld [vmem:[#allocation2 + $0x10c] ss:$40 sps:$4 sm:$0xff]   ;;  %v6954_v2 = vld [vmem:[%s7988_s8 + $0x450] ss:$8 sps:$4 sm:$0xff]  }
 0x178   : > { %3434 = vmatprep.subr.bf16.mxu1 %v6868_v3  ;;  %v6957_v3 = vld [vmem:[%s7994_s10 + $0x450] ss:$8 sps:$4 sm:$0xff]  }
 0x179   : > { %2133 = vmatmul.mubr.bf16.gmra.mrb[16].mxu0 %v6899_v6 }
 0x17a   : > { %3398 = vmatmul.mubr.bf16.gmra.mrb[16].mxu1 %v6899_v6  ;;  %2170 = vmatpush1.bf16.msra.mxu0 %v6863_v4  ;;  %v6965_v4 = vld [vmem:[%s7988_s8 + $0x464] ss:$8 sps:$4 sm:$0xff]   ;;  %v6992_v6 = vld [vmem:[#allocation2 + $0x108] ss:$40 sps:$4 sm:$0xff]  }
 0x17b   : > { %3435 = vmatpush1.bf16.msra.mxu1 %v6866_v5  ;;  %2171 = vmatprep.subr.bf16.mxu0 %v6872_v7  ;;  %v6968_v5 = vld [vmem:[%s7994_s10 + $0x464] ss:$8 sps:$4 sm:$0xff]   ;;  %v6963_v7 = vld [vmem:[%s7988_s8 + $0x460] ss:$8 sps:$4 sm:$0xff]  }
 0x17c   : > { %3436 = vmatprep.subr.bf16.mxu1 %v6875_v8  ;;  %2142 = vmatprep.mubr.bf16.mxu0 %v6906_v9  ;;  %v6966_v8 = vld [vmem:[%s7994_s10 + $0x460] ss:$8 sps:$4 sm:$0xff]  }
 0x17d   : > { %3407 = vmatprep.mubr.bf16.mxu1 %v6906_v9  ;;  %v6971_v9 = vld [vmem:[%s7988_s8 + $0x474] ss:$8 sps:$4 sm:$0xff]  }
 0x17e   : > { %2172 = vmatpush1.bf16.msra.mxu0 %v6870_v10  ;;  %v6974_v10 = vld [vmem:[%s7994_s10 + $0x474] ss:$8 sps:$4 sm:$0xff]  }
 0x17f   : > { %3437 = vmatpush1.bf16.msra.mxu1 %v6873_v11  ;;  %2173 = vmatprep.subr.bf16.mxu0 %v6880_v12  ;;  %v7005_v11 = vld [vmem:[#allocation2 + $0x15c] ss:$40 sps:$4 sm:$0xff]   ;;  %v6969_v12 = vld [vmem:[%s7988_s8 + $0x470] ss:$8 sps:$4 sm:$0xff]  }
 0x180   : > { %3438 = vmatprep.subr.bf16.mxu1 %v6883_v13  ;;  %v6972_v13 = vld [vmem:[%s7994_s10 + $0x470] ss:$8 sps:$4 sm:$0xff]  }
 0x181   : > { %2143 = vmatmul.mubr.bf16.gmra.mrb[20].mxu0 %v6914_v16 }
 0x182   : > { %3408 = vmatmul.mubr.bf16.gmra.mrb[20].mxu1 %v6914_v16  ;;  %2174 = vmatpush1.bf16.msra.mxu0 %v6878_v14  ;;  %v6980_v14 = vld [vmem:[%s7988_s8 + $0x484] ss:$8 sps:$4 sm:$0xff]   ;;  %v7007_v16 = vld [vmem:[#allocation2 + $0x158] ss:$40 sps:$4 sm:$0xff]  }
 0x183   : > { %3439 = vmatpush1.bf16.msra.mxu1 %v6881_v15  ;;  %2175 = vmatprep.subr.bf16.mxu0 %v6887_v17  ;;  %v6983_v15 = vld [vmem:[%s7994_s10 + $0x484] ss:$8 sps:$4 sm:$0xff]   ;;  %v6978_v17 = vld [vmem:[%s7988_s8 + $0x480] ss:$8 sps:$4 sm:$0xff]  }
 0x184   : > { %3440 = vmatprep.subr.bf16.mxu1 %v6890_v18  ;;  %2185 = vmatprep.mubr.bf16.mxu0 %v6923_v19  ;;  %v6981_v18 = vld [vmem:[%s7994_s10 + $0x480] ss:$8 sps:$4 sm:$0xff]  }
 0x185   : > { %3450 = vmatprep.mubr.bf16.mxu1 %v6923_v19  ;;  %v6986_v19 = vld [vmem:[%s7988_s8 + $0x494] ss:$8 sps:$4 sm:$0xff]  }
 0x186   : > { %2176 = vmatpush1.bf16.msra.mxu0 %v6885_v20  ;;  %v6989_v20 = vld [vmem:[%s7994_s10 + $0x494] ss:$8 sps:$4 sm:$0xff]  }
 0x187   : > { %3441 = vmatpush1.bf16.msra.mxu1 %v6888_v21  ;;  %2177 = vmatprep.subr.bf16.mxu0 %v6895_v22  ;;  %v7020_v21 = vld [vmem:[#allocation2 + $0x1ac] ss:$40 sps:$4 sm:$0xff]   ;;  %v6984_v22 = vld [vmem:[%s7988_s8 + $0x490] ss:$8 sps:$4 sm:$0xff]  }
 0x188   : > { %3442 = vmatprep.subr.bf16.mxu1 %v6898_v23  ;;  %v6987_v23 = vld [vmem:[%s7994_s10 + $0x490] ss:$8 sps:$4 sm:$0xff]  }
 0x18a   : > { %2178 = vmatpush1.bf16.msra.mxu0 %v6893_v24  ;;  %v6995_v24 = vld [vmem:[%s7988_s8 + $0x4a4] ss:$8 sps:$4 sm:$0xff]  }
 0x18b   : > { %3443 = vmatpush1.bf16.msra.mxu1 %v6896_v25  ;;  %2179 = vmatprep.subr.bf16.mxu0 %v6902_v26  ;;  %v6998_v25 = vld [vmem:[%s7994_s10 + $0x4a4] ss:$8 sps:$4 sm:$0xff]   ;;  %v7022_v26 = vld [vmem:[#allocation2 + $0x1a8] ss:$40 sps:$4 sm:$0xff]  }
 0x18c   : > { %3444 = vmatprep.subr.bf16.mxu1 %v6905_v27  ;;  %v6993_v27 = vld [vmem:[%s7988_s8 + $0x4a0] ss:$8 sps:$4 sm:$0xff]  }
 0x18e   : > { %2180 = vmatpush1.bf16.msra.mxu0 %v6900_v28  ;;  %v6996_v28 = vld [vmem:[%s7994_s10 + $0x4a0] ss:$8 sps:$4 sm:$0xff]  }
 0x18f   : > { %3445 = vmatpush1.bf16.msra.mxu1 %v6903_v29  ;;  %2181 = vmatprep.subr.bf16.mxu0 %v6910_v30  ;;  %v7001_v29 = vld [vmem:[%s7988_s8 + $0x4b4] ss:$8 sps:$4 sm:$0xff]  }
 0x190   : > { %3446 = vmatprep.subr.bf16.mxu1 %v6913_v31  ;;  %v7004_v30 = vld [vmem:[%s7994_s10 + $0x4b4] ss:$8 sps:$4 sm:$0xff]   ;;  %v7037_v31 = vld [vmem:[#allocation2 + $0x24] ss:$40 sps:$4 sm:$0xff]  }
 0x192   : > { %2182 = vmatpush1.bf16.msra.mxu0 %v6908_v32  ;;  %v6999_v32 = vld [vmem:[%s7988_s8 + $0x4b0] ss:$8 sps:$4 sm:$0xff]  }
 0x193   : > { %3447 = vmatpush1.bf16.msra.mxu1 %v6911_v33  ;;  %2183 = vmatprep.subr.bf16.mxu0 %v6917_v34  ;;  %v7002_v33 = vld [vmem:[%s7994_s10 + $0x4b0] ss:$8 sps:$4 sm:$0xff]   ;;  %v7010_v34 = vld [vmem:[%s7988_s8 + $0x4c4] ss:$8 sps:$4 sm:$0xff]  }
 0x194   : > { %3448 = vmatprep.subr.bf16.mxu1 %v6920_v35  ;;  %v7013_v35 = vld [vmem:[%s7994_s10 + $0x4c4] ss:$8 sps:$4 sm:$0xff]  }
 0x196   : > { %2184 = vmatpush1.bf16.msra.mxu0 %v6915_v36  ;;  %v7008_v36 = vld [vmem:[%s7988_s8 + $0x4c0] ss:$8 sps:$4 sm:$0xff]  }
 0x197   : > { %3449 = vmatpush1.bf16.msra.mxu1 %v6918_v37  ;;  %2246 = vmatprep.subr.bf16.mxu0 %v6926_v38  ;;  %v7011_v37 = vld [vmem:[%s7994_s10 + $0x4c0] ss:$8 sps:$4 sm:$0xff]   ;;  %v7016_v38 = vld [vmem:[%s7988_s8 + $0x4d4] ss:$8 sps:$4 sm:$0xff]  }
 0x198   : > { %3511 = vmatprep.subr.bf16.mxu1 %v6929_v40  ;;  %v7014_v40 = vld [vmem:[%s7988_s8 + $0x4d0] ss:$8 sps:$4 sm:$0xff]  }
 0x199   : > { %2186 = vmatmul.mubr.bf16.vlgmr.msra.gmra.mrb[0].mxu0 %v6921_v39 }
 0x19a   : > { %3451 = vmatmul.mubr.bf16.vlgmr.msra.gmra.mrb[0].mxu1 %v6921_v39  ;;  %2247 = vmatpush1.bf16.msra.mxu0 %v6924_v41  ;;  %v7019_v39 = vld [vmem:[%s7994_s10 + $0x4d4] ss:$8 sps:$4 sm:$0xff]   ;;  %v7017_v41 = vld [vmem:[%s7994_s10 + $0x4d0] ss:$8 sps:$4 sm:$0xff]  }
 0x19b   : > { %3512 = vmatpush1.bf16.msra.mxu1 %v6927_v42  ;;  %2248 = vmatprep.subr.bf16.mxu0 %v6932_v43  ;;  %v7025_v42 = vld [vmem:[%s7988_s8 + $0x4e4] ss:$8 sps:$4 sm:$0xff]  }
 0x19c   : > { %3513 = vmatprep.subr.bf16.mxu1 %v6935_v44  ;;  %2195 = vmatprep.mubr.bf16.mxu0 %v6960_v45  ;;  %v7028_v43 = vld [vmem:[%s7994_s10 + $0x4e4] ss:$8 sps:$4 sm:$0xff]   ;;  %v7023_v44 = vld [vmem:[%s7988_s8 + $0x4e0] ss:$8 sps:$4 sm:$0xff]  }
 0x19d   : > { %3460 = vmatprep.mubr.bf16.mxu1 %v6960_v45  ;;  %v7026_v45 = vld [vmem:[%s7994_s10 + $0x4e0] ss:$8 sps:$4 sm:$0xff]  }
 0x19e   : > { %2249 = vmatpush1.bf16.msra.mxu0 %v6930_v46  ;;  %v7031_v46 = vld [vmem:[%s7988_s8 + $0x4f4] ss:$8 sps:$4 sm:$0xff]  }
 0x19f   : > { %3514 = vmatpush1.bf16.msra.mxu1 %v6933_v47  ;;  %2250 = vmatprep.subr.bf16.mxu0 %v6938_v48  ;;  %v7034_v47 = vld [vmem:[%s7994_s10 + $0x4f4] ss:$8 sps:$4 sm:$0xff]   ;;  %v7029_v48 = vld [vmem:[%s7988_s8 + $0x4f0] ss:$8 sps:$4 sm:$0xff]  }
 0x1a0   : > { %3515 = vmatprep.subr.bf16.mxu1 %v6941_v49  ;;  %v7032_v49 = vld [vmem:[%s7994_s10 + $0x4f0] ss:$8 sps:$4 sm:$0xff]  }
 0x1a1   : > { %2196 = vmatmul.mubr.bf16.gmra.mrb[4].mxu0 %v6962_v50 }
 0x1a2   : > { %3461 = vmatmul.mubr.bf16.gmra.mrb[4].mxu1 %v6962_v50  ;;  %2251 = vmatpush1.bf16.msra.mxu0 %v6936_v51  ;;  %v7035_v50 = vld [vmem:[#allocation2 + $0x20] ss:$40 sps:$4 sm:$0xff]   ;;  %v7239_v51 = vld [vmem:[%s7988_s8 + $0x4] ss:$8 sps:$4 sm:$0xff]  }
 0x1a3   : > { %3516 = vmatpush1.bf16.msra.mxu1 %v6939_v52  ;;  %2252 = vmatprep.subr.bf16.mxu0 %v6944_v53  ;;  %v7240_v52 = vld [vmem:[%s7994_s10 + $0x4] ss:$8 sps:$4 sm:$0xff]   ;;  %v7038_v53 = vld [vmem:[#allocation2 + $0x74] ss:$40 sps:$4 sm:$0xff]  }
 0x1a4   : > { %3517 = vmatprep.subr.bf16.mxu1 %v6947_v54  ;;  %2205 = vmatprep.mubr.bf16.mxu0 %v6975_v55  ;;  %v7241_v54 = vld [vmem:[%s7988_s8] ss:$8 sps:$4 sm:$0xff]  }
 0x1a5   : > { %3470 = vmatprep.mubr.bf16.mxu1 %v6975_v55  ;;  %v7242_v55 = vld [vmem:[%s7994_s10] ss:$8 sps:$4 sm:$0xff]  }
 0x1a6   : > { %2253 = vmatpush1.bf16.msra.mxu0 %v6942_v56  ;;  %v7243_v56 = vld [vmem:[%s7988_s8 + $0x14] ss:$8 sps:$4 sm:$0xff]  }
 0x1a7   : > { %3518 = vmatpush1.bf16.msra.mxu1 %v6945_v57  ;;  %2254 = vmatprep.subr.bf16.mxu0 %v6950_v58  ;;  %v7244_v57 = vld [vmem:[%s7994_s10 + $0x14] ss:$8 sps:$4 sm:$0xff]   ;;  %v7040_v58 = vld [vmem:[#allocation2 + $0x70] ss:$40 sps:$4 sm:$0xff]  }
 0x1a8   : > { %3519 = vmatprep.subr.bf16.mxu1 %v6953_v59  ;;  %v7245_v59 = vld [vmem:[%s7988_s8 + $0x10] ss:$8 sps:$4 sm:$0xff]  }
 0x1a9   : > { %2206 = vmatmul.mubr.bf16.gmra.mrb[8].mxu0 %v6977_v60 }
 0x1aa   : > { %3471 = vmatmul.mubr.bf16.gmra.mrb[8].mxu1 %v6977_v60  ;;  %2255 = vmatpush1.bf16.msra.mxu0 %v6948_v61  ;;  %v7246_v60 = vld [vmem:[%s7994_s10 + $0x10] ss:$8 sps:$4 sm:$0xff]   ;;  %v7247_v61 = vld [vmem:[%s7988_s8 + $0x24] ss:$8 sps:$4 sm:$0xff]  }
 0x1ab   : > { %3520 = vmatpush1.bf16.msra.mxu1 %v6951_v62  ;;  %2256 = vmatprep.subr.bf16.mxu0 %v6956_v63  ;;  %v7248_v62 = vld [vmem:[%s7994_s10 + $0x24] ss:$8 sps:$4 sm:$0xff]  }
 0x1ac   : > { %3521 = vmatprep.subr.bf16.mxu1 %v6959_v0  ;;  %2215 = vmatprep.mubr.bf16.mxu0 %v6990_v1  ;;  %v7041_v63 = vld [vmem:[#allocation2 + $0xc4] ss:$40 sps:$4 sm:$0xff]   ;;  %v7249_v0 = vld [vmem:[%s7988_s8 + $0x20] ss:$8 sps:$4 sm:$0xff]  }
 0x1ad   : > { %3480 = vmatprep.mubr.bf16.mxu1 %v6990_v1  ;;  %v7250_v1 = vld [vmem:[%s7994_s10 + $0x20] ss:$8 sps:$4 sm:$0xff]  }
 0x1ae   : > { %2257 = vmatpush1.bf16.msra.mxu0 %v6954_v2  ;;  %v7251_v2 = vld [vmem:[%s7988_s8 + $0x34] ss:$8 sps:$4 sm:$0xff]  }
 0x1af   : > { %3522 = vmatpush1.bf16.msra.mxu1 %v6957_v3  ;;  %2258 = vmatprep.subr.bf16.mxu0 %v6965_v4  ;;  %v7252_v3 = vld [vmem:[%s7994_s10 + $0x34] ss:$8 sps:$4 sm:$0xff]   ;;  %v7043_v4 = vld [vmem:[#allocation2 + $0xc0] ss:$40 sps:$4 sm:$0xff]  }
 0x1b0   : > { %3523 = vmatprep.subr.bf16.mxu1 %v6968_v5  ;;  %v7253_v5 = vld [vmem:[%s7988_s8 + $0x30] ss:$8 sps:$4 sm:$0xff]  }
 0x1b1   : > { %2216 = vmatmul.mubr.bf16.gmra.mrb[12].mxu0 %v6992_v6 }
 0x1b2   : > { %3481 = vmatmul.mubr.bf16.gmra.mrb[12].mxu1 %v6992_v6  ;;  %2259 = vmatpush1.bf16.msra.mxu0 %v6963_v7  ;;  %v7254_v6 = vld [vmem:[%s7994_s10 + $0x30] ss:$8 sps:$4 sm:$0xff]   ;;  %v7255_v7 = vld [vmem:[%s7988_s8 + $0x44] ss:$8 sps:$4 sm:$0xff]  }
 0x1b3   : > { %3524 = vmatpush1.bf16.msra.mxu1 %v6966_v8  ;;  %2260 = vmatprep.subr.bf16.mxu0 %v6971_v9  ;;  %v7256_v8 = vld [vmem:[%s7994_s10 + $0x44] ss:$8 sps:$4 sm:$0xff]   ;;  %v7044_v9 = vld [vmem:[#allocation2 + $0x114] ss:$40 sps:$4 sm:$0xff]  }
 0x1b4   : > { %3525 = vmatprep.subr.bf16.mxu1 %v6974_v10  ;;  %2225 = vmatprep.mubr.bf16.mxu0 %v7005_v11  ;;  %v7257_v10 = vld [vmem:[%s7988_s8 + $0x40] ss:$8 sps:$4 sm:$0xff]  }
 0x1b5   : > { %3490 = vmatprep.mubr.bf16.mxu1 %v7005_v11  ;;  %v7258_v11 = vld [vmem:[%s7994_s10 + $0x40] ss:$8 sps:$4 sm:$0xff]  }
 0x1b6   : > { %2261 = vmatpush1.bf16.msra.mxu0 %v6969_v12  ;;  %v7259_v12 = vld [vmem:[%s7988_s8 + $0x54] ss:$8 sps:$4 sm:$0xff]  }
 0x1b7   : > { %3526 = vmatpush1.bf16.msra.mxu1 %v6972_v13  ;;  %2262 = vmatprep.subr.bf16.mxu0 %v6980_v14  ;;  %v7260_v13 = vld [vmem:[%s7994_s10 + $0x54] ss:$8 sps:$4 sm:$0xff]   ;;  %v7046_v14 = vld [vmem:[#allocation2 + $0x110] ss:$40 sps:$4 sm:$0xff]  }
 0x1b8   : > { %3527 = vmatprep.subr.bf16.mxu1 %v6983_v15  ;;  %v7261_v15 = vld [vmem:[%s7988_s8 + $0x50] ss:$8 sps:$4 sm:$0xff]  }
 0x1b9   : > { %2226 = vmatmul.mubr.bf16.gmra.mrb[16].mxu0 %v7007_v16 }
 0x1ba   : > { %3491 = vmatmul.mubr.bf16.gmra.mrb[16].mxu1 %v7007_v16  ;;  %2263 = vmatpush1.bf16.msra.mxu0 %v6978_v17  ;;  %v7262_v16 = vld [vmem:[%s7994_s10 + $0x50] ss:$8 sps:$4 sm:$0xff]   ;;  %v7263_v17 = vld [vmem:[%s7988_s8 + $0x64] ss:$8 sps:$4 sm:$0xff]  }
 0x1bb   : > { %3528 = vmatpush1.bf16.msra.mxu1 %v6981_v18  ;;  %2264 = vmatprep.subr.bf16.mxu0 %v6986_v19  ;;  %v7264_v18 = vld [vmem:[%s7994_s10 + $0x64] ss:$8 sps:$4 sm:$0xff]  }
 0x1bc   : > { %3529 = vmatprep.subr.bf16.mxu1 %v6989_v20  ;;  %2235 = vmatprep.mubr.bf16.mxu0 %v7020_v21  ;;  %v7047_v19 = vld [vmem:[#allocation2 + $0x164] ss:$40 sps:$4 sm:$0xff]   ;;  %v7265_v20 = vld [vmem:[%s7988_s8 + $0x60] ss:$8 sps:$4 sm:$0xff]  }
 0x1bd   : > { %3500 = vmatprep.mubr.bf16.mxu1 %v7020_v21  ;;  %v7266_v21 = vld [vmem:[%s7994_s10 + $0x60] ss:$8 sps:$4 sm:$0xff]  }
 0x1be   : > { %2265 = vmatpush1.bf16.msra.mxu0 %v6984_v22  ;;  %v7267_v22 = vld [vmem:[%s7988_s8 + $0x74] ss:$8 sps:$4 sm:$0xff]  }
 0x1bf   : > { %3530 = vmatpush1.bf16.msra.mxu1 %v6987_v23  ;;  %2266 = vmatprep.subr.bf16.mxu0 %v6995_v24  ;;  %v7268_v23 = vld [vmem:[%s7994_s10 + $0x74] ss:$8 sps:$4 sm:$0xff]   ;;  %v7049_v24 = vld [vmem:[#allocation2 + $0x160] ss:$40 sps:$4 sm:$0xff]  }
 0x1c0   : > { %3531 = vmatprep.subr.bf16.mxu1 %v6998_v25  ;;  %v7269_v25 = vld [vmem:[%s7988_s8 + $0x70] ss:$8 sps:$4 sm:$0xff]  }
 0x1c1   : > { %2236 = vmatmul.mubr.bf16.gmra.mrb[20].mxu0 %v7022_v26 }
 0x1c2   : > { %3501 = vmatmul.mubr.bf16.gmra.mrb[20].mxu1 %v7022_v26  ;;  %2267 = vmatpush1.bf16.msra.mxu0 %v6993_v27  ;;  %v7270_v26 = vld [vmem:[%s7994_s10 + $0x70] ss:$8 sps:$4 sm:$0xff]   ;;  %v7271_v27 = vld [vmem:[%s7988_s8 + $0x84] ss:$8 sps:$4 sm:$0xff]  }
 0x1c3   : > { %3532 = vmatpush1.bf16.msra.mxu1 %v6996_v28  ;;  %2268 = vmatprep.subr.bf16.mxu0 %v7001_v29  ;;  %v7272_v28 = vld [vmem:[%s7994_s10 + $0x84] ss:$8 sps:$4 sm:$0xff]   ;;  %v7050_v29 = vld [vmem:[#allocation2 + $0x1b4] ss:$40 sps:$4 sm:$0xff]  }
 0x1c4   : > { %3533 = vmatprep.subr.bf16.mxu1 %v7004_v30  ;;  %2278 = vmatprep.mubr.bf16.mxu0 %v7037_v31  ;;  %v7273_v30 = vld [vmem:[%s7988_s8 + $0x80] ss:$8 sps:$4 sm:$0xff]  }
 0x1c5   : > { %3543 = vmatprep.mubr.bf16.mxu1 %v7037_v31  ;;  %v7274_v31 = vld [vmem:[%s7994_s10 + $0x80] ss:$8 sps:$4 sm:$0xff]  }
 0x1c6   : > { %2269 = vmatpush1.bf16.msra.mxu0 %v6999_v32  ;;  %v7275_v32 = vld [vmem:[%s7988_s8 + $0x94] ss:$8 sps:$4 sm:$0xff]  }
 0x1c7   : > { %3534 = vmatpush1.bf16.msra.mxu1 %v7002_v33  ;;  %2270 = vmatprep.subr.bf16.mxu0 %v7010_v34  ;;  %v7276_v33 = vld [vmem:[%s7994_s10 + $0x94] ss:$8 sps:$4 sm:$0xff]   ;;  %v7052_v34 = vld [vmem:[#allocation2 + $0x1b0] ss:$40 sps:$4 sm:$0xff]  }
 0x1c8   : > { %3535 = vmatprep.subr.bf16.mxu1 %v7013_v35  ;;  %v7277_v35 = vld [vmem:[%s7988_s8 + $0x90] ss:$8 sps:$4 sm:$0xff]  }
 0x1ca   : > { %2271 = vmatpush1.bf16.msra.mxu0 %v7008_v36  ;;  %v7278_v36 = vld [vmem:[%s7994_s10 + $0x90] ss:$8 sps:$4 sm:$0xff]  }
 0x1cb   : > { %3536 = vmatpush1.bf16.msra.mxu1 %v7011_v37  ;;  %2272 = vmatprep.subr.bf16.mxu0 %v7016_v38  ;;  %v7279_v37 = vld [vmem:[%s7988_s8 + $0xa4] ss:$8 sps:$4 sm:$0xff]  }
 0x1cc   : > { %3537 = vmatprep.subr.bf16.mxu1 %v7019_v39  ;;  %v7280_v38 = vld [vmem:[%s7994_s10 + $0xa4] ss:$8 sps:$4 sm:$0xff]  }
 0x1cd   : > { %v7055_v39 = vld [vmem:[#allocation4 + $0x4] ss:$40 sps:$4 sm:$0xff]  }
 0x1ce   : > { %2273 = vmatpush1.bf16.msra.mxu0 %v7014_v40  ;;  %v7281_v40 = vld [vmem:[%s7988_s8 + $0xa0] ss:$8 sps:$4 sm:$0xff]  }
 0x1cf   : > { %3538 = vmatpush1.bf16.msra.mxu1 %v7017_v41  ;;  %2274 = vmatprep.subr.bf16.mxu0 %v7025_v42  ;;  %v7282_v41 = vld [vmem:[%s7994_s10 + $0xa0] ss:$8 sps:$4 sm:$0xff]   ;;  %v7283_v42 = vld [vmem:[%s7988_s8 + $0xb4] ss:$8 sps:$4 sm:$0xff]  }
 0x1d0   : > { %3539 = vmatprep.subr.bf16.mxu1 %v7028_v43  ;;  %v7284_v43 = vld [vmem:[%s7994_s10 + $0xb4] ss:$8 sps:$4 sm:$0xff]  }
 0x1d2   : > { %2275 = vmatpush1.bf16.msra.mxu0 %v7023_v44  ;;  %v7285_v44 = vld [vmem:[%s7988_s8 + $0xb0] ss:$8 sps:$4 sm:$0xff]  }
 0x1d3   : > { %3540 = vmatpush1.bf16.msra.mxu1 %v7026_v45  ;;  %2276 = vmatprep.subr.bf16.mxu0 %v7031_v46  ;;  %v7286_v45 = vld [vmem:[%s7994_s10 + $0xb0] ss:$8 sps:$4 sm:$0xff]   ;;  %v7287_v46 = vld [vmem:[%s7988_s8 + $0xc4] ss:$8 sps:$4 sm:$0xff]  }
 0x1d4   : > { %3541 = vmatprep.subr.bf16.mxu1 %v7034_v47  ;;  %v7288_v47 = vld [vmem:[%s7994_s10 + $0xc4] ss:$8 sps:$4 sm:$0xff]  }
 0x1d6   : > { %2277 = vmatpush1.bf16.msra.mxu0 %v7029_v48  ;;  %v7289_v48 = vld [vmem:[%s7988_s8 + $0xc0] ss:$8 sps:$4 sm:$0xff]  }
 0x1d7   : > { %3542 = vmatpush1.bf16.msra.mxu1 %v7032_v49  ;;  %3904 = vmatprep.subr.bf16.mxu0 %v7239_v51  ;;  %v7290_v49 = vld [vmem:[%s7994_s10 + $0xc0] ss:$8 sps:$4 sm:$0xff]   ;;  %v7292_v51 = vld [vmem:[%s7994_s10 + $0xd4] ss:$8 sps:$4 sm:$0xff]  }
 0x1d8   : > { %4369 = vmatprep.subr.bf16.mxu1 %v7240_v52  ;;  %v7293_v52 = vld [vmem:[%s7988_s8 + $0xd0] ss:$8 sps:$4 sm:$0xff]  }
 0x1d9   : > { %2279 = vmatmul.mubr.bf16.vlgmr.msra.gmra.mrb[0].mxu0 %v7035_v50 }
 0x1da   : > { %3544 = vmatmul.mubr.bf16.vlgmr.msra.gmra.mrb[0].mxu1 %v7035_v50  ;;  %3905 = vmatpush1.bf16.msra.mxu0 %v7241_v54  ;;  %v7291_v50 = vld [vmem:[%s7988_s8 + $0xd4] ss:$8 sps:$4 sm:$0xff]   ;;  %v7295_v54 = vld [vmem:[%s7988_s8 + $0xe4] ss:$8 sps:$4 sm:$0xff]  }
 0x1db   : > { %4370 = vmatpush1.bf16.msra.mxu1 %v7242_v55  ;;  %3906 = vmatprep.subr.bf16.mxu0 %v7243_v56  ;;  %v7296_v55 = vld [vmem:[%s7994_s10 + $0xe4] ss:$8 sps:$4 sm:$0xff]   ;;  %v7297_v56 = vld [vmem:[%s7988_s8 + $0xe0] ss:$8 sps:$4 sm:$0xff]  }
 0x1dc   : > { %4371 = vmatprep.subr.bf16.mxu1 %v7244_v57  ;;  %2288 = vmatprep.mubr.bf16.mxu0 %v7038_v53  ;;  %v7298_v57 = vld [vmem:[%s7994_s10 + $0xe0] ss:$8 sps:$4 sm:$0xff]  }
 0x1dd   : > { %3553 = vmatprep.mubr.bf16.mxu1 %v7038_v53  ;;  %v7294_v53 = vld [vmem:[%s7994_s10 + $0xd0] ss:$8 sps:$4 sm:$0xff]  }
 0x1de   : > { %3907 = vmatpush1.bf16.msra.mxu0 %v7245_v59  ;;  %v7300_v59 = vld [vmem:[%s7994_s10 + $0xf4] ss:$8 sps:$4 sm:$0xff]  }
 0x1df   : > { %4372 = vmatpush1.bf16.msra.mxu1 %v7246_v60  ;;  %3908 = vmatprep.subr.bf16.mxu0 %v7247_v61  ;;  %v7053_v60 = vld [vmem:[#allocation4] ss:$40 sps:$4 sm:$0xff]   ;;  %v7301_v61 = vld [vmem:[%s7988_s8 + $0xf0] ss:$8 sps:$4 sm:$0xff]  }
 0x1e0   : > { %4373 = vmatprep.subr.bf16.mxu1 %v7248_v62  ;;  %v7302_v62 = vld [vmem:[%s7994_s10 + $0xf0] ss:$8 sps:$4 sm:$0xff]  }
 0x1e1   : > { %2289 = vmatmul.mubr.bf16.gmra.mrb[4].mxu0 %v7040_v58 }
 0x1e2   : > { %3554 = vmatmul.mubr.bf16.gmra.mrb[4].mxu1 %v7040_v58  ;;  %3909 = vmatpush1.bf16.msra.mxu0 %v7249_v0  ;;  %v7299_v58 = vld [vmem:[%s7988_s8 + $0xf4] ss:$8 sps:$4 sm:$0xff]   ;;  %v7304_v0 = vld [vmem:[%s7994_s10 + $0x104] ss:$8 sps:$4 sm:$0xff]  }
 0x1e3   : > { %4374 = vmatpush1.bf16.msra.mxu1 %v7250_v1  ;;  %3910 = vmatprep.subr.bf16.mxu0 %v7251_v2  ;;  %v7056_v1 = vld [vmem:[#allocation4 + $0x54] ss:$40 sps:$4 sm:$0xff]   ;;  %v7305_v2 = vld [vmem:[%s7988_s8 + $0x100] ss:$8 sps:$4 sm:$0xff]  }
 0x1e4   : > { %4375 = vmatprep.subr.bf16.mxu1 %v7252_v3  ;;  %2298 = vmatprep.mubr.bf16.mxu0 %v7041_v63  ;;  %v7306_v3 = vld [vmem:[%s7994_s10 + $0x100] ss:$8 sps:$4 sm:$0xff]  }
 0x1e5   : > { %3563 = vmatprep.mubr.bf16.mxu1 %v7041_v63  ;;  %v7303_v63 = vld [vmem:[%s7988_s8 + $0x104] ss:$8 sps:$4 sm:$0xff]  }
 0x1e6   : > { %3911 = vmatpush1.bf16.msra.mxu0 %v7253_v5  ;;  %v7308_v5 = vld [vmem:[%s7994_s10 + $0x114] ss:$8 sps:$4 sm:$0xff]  }
 0x1e7   : > { %4376 = vmatpush1.bf16.msra.mxu1 %v7254_v6  ;;  %3912 = vmatprep.subr.bf16.mxu0 %v7255_v7  ;;  %v7058_v6 = vld [vmem:[#allocation4 + $0x50] ss:$40 sps:$4 sm:$0xff]  }
 0x1e8   : > { %4377 = vmatprep.subr.bf16.mxu1 %v7256_v8  ;;  %v7309_v7 = vld [vmem:[%s7988_s8 + $0x110] ss:$8 sps:$4 sm:$0xff]  }
 0x1e9   : > { %2299 = vmatmul.mubr.bf16.gmra.mrb[8].mxu0 %v7043_v4  ;;  %v7310_v8 = vld [vmem:[%s7994_s10 + $0x110] ss:$8 sps:$4 sm:$0xff]  }
 0x1ea   : > { %3564 = vmatmul.mubr.bf16.gmra.mrb[8].mxu1 %v7043_v4  ;;  %3913 = vmatpush1.bf16.msra.mxu0 %v7257_v10  ;;  %v7307_v4 = vld [vmem:[%s7988_s8 + $0x114] ss:$8 sps:$4 sm:$0xff]   ;;  %v7312_v10 = vld [vmem:[%s7994_s10 + $0x124] ss:$8 sps:$4 sm:$0xff]  }
 0x1eb   : > { %4378 = vmatpush1.bf16.msra.mxu1 %v7258_v11  ;;  %3914 = vmatprep.subr.bf16.mxu0 %v7259_v12  ;;  %v7059_v11 = vld [vmem:[#allocation4 + $0xa4] ss:$40 sps:$4 sm:$0xff]   ;;  %v7313_v12 = vld [vmem:[%s7988_s8 + $0x120] ss:$8 sps:$4 sm:$0xff]  }
 0x1ec   : > { %4379 = vmatprep.subr.bf16.mxu1 %v7260_v13  ;;  %2308 = vmatprep.mubr.bf16.mxu0 %v7044_v9  ;;  %v7314_v13 = vld [vmem:[%s7994_s10 + $0x120] ss:$8 sps:$4 sm:$0xff]  }
 0x1ed   : > { %3573 = vmatprep.mubr.bf16.mxu1 %v7044_v9  ;;  %v7311_v9 = vld [vmem:[%s7988_s8 + $0x124] ss:$8 sps:$4 sm:$0xff]  }
 0x1ee   : > { %3915 = vmatpush1.bf16.msra.mxu0 %v7261_v15  ;;  %v7316_v15 = vld [vmem:[%s7994_s10 + $0x134] ss:$8 sps:$4 sm:$0xff]  }
 0x1ef   : > { %4380 = vmatpush1.bf16.msra.mxu1 %v7262_v16  ;;  %3916 = vmatprep.subr.bf16.mxu0 %v7263_v17  ;;  %v7061_v16 = vld [vmem:[#allocation4 + $0xa0] ss:$40 sps:$4 sm:$0xff]   ;;  %v7317_v17 = vld [vmem:[%s7988_s8 + $0x130] ss:$8 sps:$4 sm:$0xff]  }
 0x1f0   : > { %4381 = vmatprep.subr.bf16.mxu1 %v7264_v18  ;;  %v7318_v18 = vld [vmem:[%s7994_s10 + $0x130] ss:$8 sps:$4 sm:$0xff]  }
 0x1f1   : > { %2309 = vmatmul.mubr.bf16.gmra.mrb[12].mxu0 %v7046_v14 }
 0x1f2   : > { %3574 = vmatmul.mubr.bf16.gmra.mrb[12].mxu1 %v7046_v14  ;;  %3917 = vmatpush1.bf16.msra.mxu0 %v7265_v20  ;;  %v7315_v14 = vld [vmem:[%s7988_s8 + $0x134] ss:$8 sps:$4 sm:$0xff]   ;;  %v7320_v20 = vld [vmem:[%s7994_s10 + $0x144] ss:$8 sps:$4 sm:$0xff]  }
 0x1f3   : > { %4382 = vmatpush1.bf16.msra.mxu1 %v7266_v21  ;;  %3918 = vmatprep.subr.bf16.mxu0 %v7267_v22  ;;  %v7062_v21 = vld [vmem:[#allocation4 + $0xf4] ss:$40 sps:$4 sm:$0xff]   ;;  %v7321_v22 = vld [vmem:[%s7988_s8 + $0x140] ss:$8 sps:$4 sm:$0xff]  }
 0x1f4   : > { %4383 = vmatprep.subr.bf16.mxu1 %v7268_v23  ;;  %2318 = vmatprep.mubr.bf16.mxu0 %v7047_v19  ;;  %v7322_v23 = vld [vmem:[%s7994_s10 + $0x140] ss:$8 sps:$4 sm:$0xff]  }
 0x1f5   : > { %3583 = vmatprep.mubr.bf16.mxu1 %v7047_v19  ;;  %v7319_v19 = vld [vmem:[%s7988_s8 + $0x144] ss:$8 sps:$4 sm:$0xff]  }
 0x1f6   : > { %3919 = vmatpush1.bf16.msra.mxu0 %v7269_v25  ;;  %v7324_v25 = vld [vmem:[%s7994_s10 + $0x154] ss:$8 sps:$4 sm:$0xff]  }
 0x1f7   : > { %4384 = vmatpush1.bf16.msra.mxu1 %v7270_v26  ;;  %3920 = vmatprep.subr.bf16.mxu0 %v7271_v27  ;;  %v7064_v26 = vld [vmem:[#allocation4 + $0xf0] ss:$40 sps:$4 sm:$0xff]  }
 0x1f8   : > { %4385 = vmatprep.subr.bf16.mxu1 %v7272_v28  ;;  %v7325_v27 = vld [vmem:[%s7988_s8 + $0x150] ss:$8 sps:$4 sm:$0xff]  }
 0x1f9   : > { %2319 = vmatmul.mubr.bf16.gmra.mrb[16].mxu0 %v7049_v24  ;;  %v7326_v28 = vld [vmem:[%s7994_s10 + $0x150] ss:$8 sps:$4 sm:$0xff]  }
 0x1fa   : > { %3584 = vmatmul.mubr.bf16.gmra.mrb[16].mxu1 %v7049_v24  ;;  %3921 = vmatpush1.bf16.msra.mxu0 %v7273_v30  ;;  %v7323_v24 = vld [vmem:[%s7988_s8 + $0x154] ss:$8 sps:$4 sm:$0xff]   ;;  %v7328_v30 = vld [vmem:[%s7994_s10 + $0x164] ss:$8 sps:$4 sm:$0xff]  }
 0x1fb   : > { %4386 = vmatpush1.bf16.msra.mxu1 %v7274_v31  ;;  %3922 = vmatprep.subr.bf16.mxu0 %v7275_v32  ;;  %v7065_v31 = vld [vmem:[#allocation4 + $0x144] ss:$40 sps:$4 sm:$0xff]   ;;  %v7329_v32 = vld [vmem:[%s7988_s8 + $0x160] ss:$8 sps:$4 sm:$0xff]  }
 0x1fc   : > { %4387 = vmatprep.subr.bf16.mxu1 %v7276_v33  ;;  %2328 = vmatprep.mubr.bf16.mxu0 %v7050_v29  ;;  %v7330_v33 = vld [vmem:[%s7994_s10 + $0x160] ss:$8 sps:$4 sm:$0xff]  }
 0x1fd   : > { %3593 = vmatprep.mubr.bf16.mxu1 %v7050_v29  ;;  %v7327_v29 = vld [vmem:[%s7988_s8 + $0x164] ss:$8 sps:$4 sm:$0xff]  }
 0x1fe   : > { %3923 = vmatpush1.bf16.msra.mxu0 %v7277_v35  ;;  %v7332_v35 = vld [vmem:[%s7994_s10 + $0x174] ss:$8 sps:$4 sm:$0xff]  }
 0x1ff   : > { %4388 = vmatpush1.bf16.msra.mxu1 %v7278_v36  ;;  %3924 = vmatprep.subr.bf16.mxu0 %v7279_v37  ;;  %v7067_v36 = vld [vmem:[#allocation4 + $0x140] ss:$40 sps:$4 sm:$0xff]   ;;  %v7333_v37 = vld [vmem:[%s7988_s8 + $0x170] ss:$8 sps:$4 sm:$0xff]  }
 0x200   : > { %4389 = vmatprep.subr.bf16.mxu1 %v7280_v38  ;;  %v7334_v38 = vld [vmem:[%s7994_s10 + $0x170] ss:$8 sps:$4 sm:$0xff]  }
 0x201   : > { %2329 = vmatmul.mubr.bf16.gmra.mrb[20].mxu0 %v7052_v34 }
 0x202   : > { %3594 = vmatmul.mubr.bf16.gmra.mrb[20].mxu1 %v7052_v34  ;;  %3925 = vmatpush1.bf16.msra.mxu0 %v7281_v40  ;;  %v7331_v34 = vld [vmem:[%s7988_s8 + $0x174] ss:$8 sps:$4 sm:$0xff]   ;;  %v7336_v40 = vld [vmem:[%s7994_s10 + $0x184] ss:$8 sps:$4 sm:$0xff]  }
 0x203   : > { %4390 = vmatpush1.bf16.msra.mxu1 %v7282_v41  ;;  %3926 = vmatprep.subr.bf16.mxu0 %v7283_v42  ;;  %v7068_v41 = vld [vmem:[#allocation4 + $0x194] ss:$40 sps:$4 sm:$0xff]   ;;  %v7337_v42 = vld [vmem:[%s7988_s8 + $0x180] ss:$8 sps:$4 sm:$0xff]  }
 0x204   : > { %4391 = vmatprep.subr.bf16.mxu1 %v7284_v43  ;;  %3936 = vmatprep.mubr.bf16.mxu0 %v7055_v39  ;;  %v7338_v43 = vld [vmem:[%s7994_s10 + $0x180] ss:$8 sps:$4 sm:$0xff]  }
 0x205   : > { %4401 = vmatprep.mubr.bf16.mxu1 %v7055_v39  ;;  %v7335_v39 = vld [vmem:[%s7988_s8 + $0x184] ss:$8 sps:$4 sm:$0xff]  }
 0x206   : > { %3927 = vmatpush1.bf16.msra.mxu0 %v7285_v44  ;;  %v7339_v44 = vld [vmem:[%s7988_s8 + $0x194] ss:$8 sps:$4 sm:$0xff]  }
 0x207   : > { %4392 = vmatpush1.bf16.msra.mxu1 %v7286_v45  ;;  %3928 = vmatprep.subr.bf16.mxu0 %v7287_v46  ;;  %v7340_v45 = vld [vmem:[%s7994_s10 + $0x194] ss:$8 sps:$4 sm:$0xff]   ;;  %v7070_v46 = vld [vmem:[#allocation4 + $0x190] ss:$40 sps:$4 sm:$0xff]  }
 0x208   : > { %4393 = vmatprep.subr.bf16.mxu1 %v7288_v47  ;;  %v7341_v47 = vld [vmem:[%s7988_s8 + $0x190] ss:$8 sps:$4 sm:$0xff]  }
 0x20a   : > { %3929 = vmatpush1.bf16.msra.mxu0 %v7289_v48  ;;  %v7342_v48 = vld [vmem:[%s7994_s10 + $0x190] ss:$8 sps:$4 sm:$0xff]  }
 0x20b   : > { %4394 = vmatpush1.bf16.msra.mxu1 %v7290_v49  ;;  %3930 = vmatprep.subr.bf16.mxu0 %v7291_v50  ;;  %v7343_v49 = vld [vmem:[%s7988_s8 + $0x1a4] ss:$8 sps:$4 sm:$0xff]  }
 0x20c   : > { %4395 = vmatprep.subr.bf16.mxu1 %v7292_v51  ;;  %v7344_v50 = vld [vmem:[%s7994_s10 + $0x1a4] ss:$8 sps:$4 sm:$0xff]  }
 0x20d   : > { %v7073_v51 = vld [vmem:[#allocation4 + $0xc] ss:$40 sps:$4 sm:$0xff]  }
 0x20e   : > { %3931 = vmatpush1.bf16.msra.mxu0 %v7293_v52  ;;  %v7345_v52 = vld [vmem:[%s7988_s8 + $0x1a0] ss:$8 sps:$4 sm:$0xff]  }
 0x20f   : > { %4396 = vmatpush1.bf16.msra.mxu1 %v7294_v53  ;;  %3932 = vmatprep.subr.bf16.mxu0 %v7295_v54  ;;  %v7346_v53 = vld [vmem:[%s7994_s10 + $0x1a0] ss:$8 sps:$4 sm:$0xff]   ;;  %v7347_v54 = vld [vmem:[%s7988_s8 + $0x1b4] ss:$8 sps:$4 sm:$0xff]  }
 0x210   : > { %4397 = vmatprep.subr.bf16.mxu1 %v7296_v55  ;;  %v7348_v55 = vld [vmem:[%s7994_s10 + $0x1b4] ss:$8 sps:$4 sm:$0xff]  }
 0x212   : > { %3933 = vmatpush1.bf16.msra.mxu0 %v7297_v56  ;;  %v7349_v56 = vld [vmem:[%s7988_s8 + $0x1b0] ss:$8 sps:$4 sm:$0xff]  }
 0x213   : > { %4398 = vmatpush1.bf16.msra.mxu1 %v7298_v57  ;;  %3934 = vmatprep.subr.bf16.mxu0 %v7299_v58  ;;  %v7350_v57 = vld [vmem:[%s7994_s10 + $0x1b0] ss:$8 sps:$4 sm:$0xff]   ;;  %v7351_v58 = vld [vmem:[%s7988_s8 + $0x1c4] ss:$8 sps:$4 sm:$0xff]  }
 0x214   : > { %4399 = vmatprep.subr.bf16.mxu1 %v7300_v59  ;;  %v7352_v59 = vld [vmem:[%s7994_s10 + $0x1c4] ss:$8 sps:$4 sm:$0xff]  }
 0x216   : > { %3935 = vmatpush1.bf16.msra.mxu0 %v7301_v61  ;;  %v7354_v61 = vld [vmem:[%s7994_s10 + $0x1c0] ss:$8 sps:$4 sm:$0xff]  }
 0x217   : > { %4400 = vmatpush1.bf16.msra.mxu1 %v7302_v62  ;;  %3997 = vmatprep.subr.bf16.mxu0 %v7303_v63  ;;  %v7355_v62 = vld [vmem:[%s7988_s8 + $0x1d4] ss:$8 sps:$4 sm:$0xff]  }
 0x218   : > { %4462 = vmatprep.subr.bf16.mxu1 %v7304_v0  ;;  %v7356_v63 = vld [vmem:[%s7994_s10 + $0x1d4] ss:$8 sps:$4 sm:$0xff]   ;;  %v7357_v0 = vld [vmem:[%s7988_s8 + $0x1d0] ss:$8 sps:$4 sm:$0xff]  }
 0x219   : > { %3937 = vmatmul.mubr.bf16.vlgmr.msra.gmra.mrb[24].mxu0 %v7053_v60 }
 0x21a   : > { %4402 = vmatmul.mubr.bf16.vlgmr.msra.gmra.mrb[24].mxu1 %v7053_v60  ;;  %3998 = vmatpush1.bf16.msra.mxu0 %v7305_v2  ;;  %v7353_v60 = vld [vmem:[%s7988_s8 + $0x1c0] ss:$8 sps:$4 sm:$0xff]   ;;  %v7359_v2 = vld [vmem:[%s7988_s8 + $0x1e4] ss:$8 sps:$4 sm:$0xff]  }
 0x21b   : > { %4463 = vmatpush1.bf16.msra.mxu1 %v7306_v3  ;;  %3999 = vmatprep.subr.bf16.mxu0 %v7307_v4  ;;  %v7360_v3 = vld [vmem:[%s7994_s10 + $0x1e4] ss:$8 sps:$4 sm:$0xff]   ;;  %v7361_v4 = vld [vmem:[%s7988_s8 + $0x1e0] ss:$8 sps:$4 sm:$0xff]  }
 0x21c   : > { %4464 = vmatprep.subr.bf16.mxu1 %v7308_v5  ;;  %3946 = vmatprep.mubr.bf16.mxu0 %v7056_v1  ;;  %v7362_v5 = vld [vmem:[%s7994_s10 + $0x1e0] ss:$8 sps:$4 sm:$0xff]  }
 0x21d   : > { %4411 = vmatprep.mubr.bf16.mxu1 %v7056_v1  ;;  %v7358_v1 = vld [vmem:[%s7994_s10 + $0x1d0] ss:$8 sps:$4 sm:$0xff]  }
 0x21e   : > { %4000 = vmatpush1.bf16.msra.mxu0 %v7309_v7  ;;  %v7364_v7 = vld [vmem:[%s7994_s10 + $0x1f4] ss:$8 sps:$4 sm:$0xff]  }
 0x21f   : > { %4465 = vmatpush1.bf16.msra.mxu1 %v7310_v8  ;;  %4001 = vmatprep.subr.bf16.mxu0 %v7311_v9  ;;  %v7071_v8 = vld [vmem:[#allocation4 + $0x8] ss:$40 sps:$4 sm:$0xff]  }
 0x220   : > { %4466 = vmatprep.subr.bf16.mxu1 %v7312_v10  ;;  %v7365_v9 = vld [vmem:[%s7988_s8 + $0x1f0] ss:$8 sps:$4 sm:$0xff]  }
 0x221   : > { %3947 = vmatmul.mubr.bf16.gmra.mrb[28].mxu0 %v7058_v6  ;;  %v7366_v10 = vld [vmem:[%s7994_s10 + $0x1f0] ss:$8 sps:$4 sm:$0xff]  }
 0x222   : > { %4412 = vmatmul.mubr.bf16.gmra.mrb[28].mxu1 %v7058_v6  ;;  %4002 = vmatpush1.bf16.msra.mxu0 %v7313_v12  ;;  %v7363_v6 = vld [vmem:[%s7988_s8 + $0x1f4] ss:$8 sps:$4 sm:$0xff]   ;;  %v7368_v12 = vld [vmem:[%s7994_s10 + $0x204] ss:$8 sps:$4 sm:$0xff]  }
 0x223   : > { %4467 = vmatpush1.bf16.msra.mxu1 %v7314_v13  ;;  %4003 = vmatprep.subr.bf16.mxu0 %v7315_v14  ;;  %v7074_v13 = vld [vmem:[#allocation4 + $0x5c] ss:$40 sps:$4 sm:$0xff]   ;;  %v7369_v14 = vld [vmem:[%s7988_s8 + $0x200] ss:$8 sps:$4 sm:$0xff]  }
 0x224   : > { %4468 = vmatprep.subr.bf16.mxu1 %v7316_v15  ;;  %3956 = vmatprep.mubr.bf16.mxu0 %v7059_v11  ;;  %v7370_v15 = vld [vmem:[%s7994_s10 + $0x200] ss:$8 sps:$4 sm:$0xff]  }
 0x225   : > { %4421 = vmatprep.mubr.bf16.mxu1 %v7059_v11  ;;  %v7367_v11 = vld [vmem:[%s7988_s8 + $0x204] ss:$8 sps:$4 sm:$0xff]  }
 0x226   : > { %4004 = vmatpush1.bf16.msra.mxu0 %v7317_v17  ;;  %v7372_v17 = vld [vmem:[%s7994_s10 + $0x214] ss:$8 sps:$4 sm:$0xff]  }
 0x227   : > { %4469 = vmatpush1.bf16.msra.mxu1 %v7318_v18  ;;  %4005 = vmatprep.subr.bf16.mxu0 %v7319_v19  ;;  %v7076_v18 = vld [vmem:[#allocation4 + $0x58] ss:$40 sps:$4 sm:$0xff]  }
 0x228   : > { %4470 = vmatprep.subr.bf16.mxu1 %v7320_v20  ;;  %v7373_v19 = vld [vmem:[%s7988_s8 + $0x210] ss:$8 sps:$4 sm:$0xff]  }
 0x229   : > { %3957 = vmatmul.mubr.bf16.gmra.mrb[32].mxu0 %v7061_v16  ;;  %v7374_v20 = vld [vmem:[%s7994_s10 + $0x210] ss:$8 sps:$4 sm:$0xff]  }
 0x22a   : > { %4422 = vmatmul.mubr.bf16.gmra.mrb[32].mxu1 %v7061_v16  ;;  %4006 = vmatpush1.bf16.msra.mxu0 %v7321_v22  ;;  %v7371_v16 = vld [vmem:[%s7988_s8 + $0x214] ss:$8 sps:$4 sm:$0xff]   ;;  %v7376_v22 = vld [vmem:[%s7994_s10 + $0x224] ss:$8 sps:$4 sm:$0xff]  }
 0x22b   : > { %4471 = vmatpush1.bf16.msra.mxu1 %v7322_v23  ;;  %4007 = vmatprep.subr.bf16.mxu0 %v7323_v24  ;;  %v7077_v23 = vld [vmem:[#allocation4 + $0xac] ss:$40 sps:$4 sm:$0xff]   ;;  %v7377_v24 = vld [vmem:[%s7988_s8 + $0x220] ss:$8 sps:$4 sm:$0xff]  }
 0x22c   : > { %4472 = vmatprep.subr.bf16.mxu1 %v7324_v25  ;;  %3966 = vmatprep.mubr.bf16.mxu0 %v7062_v21  ;;  %v7378_v25 = vld [vmem:[%s7994_s10 + $0x220] ss:$8 sps:$4 sm:$0xff]  }
 0x22d   : > { %4431 = vmatprep.mubr.bf16.mxu1 %v7062_v21  ;;  %v7375_v21 = vld [vmem:[%s7988_s8 + $0x224] ss:$8 sps:$4 sm:$0xff]  }
 0x22e   : > { %4008 = vmatpush1.bf16.msra.mxu0 %v7325_v27  ;;  %v7380_v27 = vld [vmem:[%s7994_s10 + $0x234] ss:$8 sps:$4 sm:$0xff]  }
 0x22f   : > { %4473 = vmatpush1.bf16.msra.mxu1 %v7326_v28  ;;  %4009 = vmatprep.subr.bf16.mxu0 %v7327_v29  ;;  %v7079_v28 = vld [vmem:[#allocation4 + $0xa8] ss:$40 sps:$4 sm:$0xff]  }
 0x230   : > { %4474 = vmatprep.subr.bf16.mxu1 %v7328_v30  ;;  %v7381_v29 = vld [vmem:[%s7988_s8 + $0x230] ss:$8 sps:$4 sm:$0xff]  }
 0x231   : > { %3967 = vmatmul.mubr.bf16.gmra.mrb[36].mxu0 %v7064_v26  ;;  %v7382_v30 = vld [vmem:[%s7994_s10 + $0x230] ss:$8 sps:$4 sm:$0xff]  }
 0x232   : > { %4432 = vmatmul.mubr.bf16.gmra.mrb[36].mxu1 %v7064_v26  ;;  %4010 = vmatpush1.bf16.msra.mxu0 %v7329_v32  ;;  %v7379_v26 = vld [vmem:[%s7988_s8 + $0x234] ss:$8 sps:$4 sm:$0xff]   ;;  %v7384_v32 = vld [vmem:[%s7994_s10 + $0x244] ss:$8 sps:$4 sm:$0xff]  }
 0x233   : > { %4475 = vmatpush1.bf16.msra.mxu1 %v7330_v33  ;;  %4011 = vmatprep.subr.bf16.mxu0 %v7331_v34  ;;  %v7080_v33 = vld [vmem:[#allocation4 + $0xfc] ss:$40 sps:$4 sm:$0xff]   ;;  %v7385_v34 = vld [vmem:[%s7988_s8 + $0x240] ss:$8 sps:$4 sm:$0xff]  }
 0x234   : > { %4476 = vmatprep.subr.bf16.mxu1 %v7332_v35  ;;  %3976 = vmatprep.mubr.bf16.mxu0 %v7065_v31  ;;  %v7386_v35 = vld [vmem:[%s7994_s10 + $0x240] ss:$8 sps:$4 sm:$0xff]  }
 0x235   : > { %4441 = vmatprep.mubr.bf16.mxu1 %v7065_v31  ;;  %v7383_v31 = vld [vmem:[%s7988_s8 + $0x244] ss:$8 sps:$4 sm:$0xff]  }
 0x236   : > { %4012 = vmatpush1.bf16.msra.mxu0 %v7333_v37  ;;  %v7388_v37 = vld [vmem:[%s7994_s10 + $0x254] ss:$8 sps:$4 sm:$0xff]  }
 0x237   : > { %4477 = vmatpush1.bf16.msra.mxu1 %v7334_v38  ;;  %4013 = vmatprep.subr.bf16.mxu0 %v7335_v39  ;;  %v7082_v38 = vld [vmem:[#allocation4 + $0xf8] ss:$40 sps:$4 sm:$0xff]  }
 0x238   : > { %4478 = vmatprep.subr.bf16.mxu1 %v7336_v40  ;;  %v7389_v39 = vld [vmem:[%s7988_s8 + $0x250] ss:$8 sps:$4 sm:$0xff]  }
 0x239   : > { %3977 = vmatmul.mubr.bf16.gmra.mrb[40].mxu0 %v7067_v36  ;;  %v7390_v40 = vld [vmem:[%s7994_s10 + $0x250] ss:$8 sps:$4 sm:$0xff]  }
 0x23a   : > { %4442 = vmatmul.mubr.bf16.gmra.mrb[40].mxu1 %v7067_v36  ;;  %4014 = vmatpush1.bf16.msra.mxu0 %v7337_v42  ;;  %v7387_v36 = vld [vmem:[%s7988_s8 + $0x254] ss:$8 sps:$4 sm:$0xff]   ;;  %v7392_v42 = vld [vmem:[%s7994_s10 + $0x264] ss:$8 sps:$4 sm:$0xff]  }
 0x23b   : > { %4479 = vmatpush1.bf16.msra.mxu1 %v7338_v43  ;;  %4015 = vmatprep.subr.bf16.mxu0 %v7339_v44  ;;  %v7083_v43 = vld [vmem:[#allocation4 + $0x14c] ss:$40 sps:$4 sm:$0xff]   ;;  %v7393_v44 = vld [vmem:[%s7988_s8 + $0x260] ss:$8 sps:$4 sm:$0xff]  }
 0x23c   : > { %4480 = vmatprep.subr.bf16.mxu1 %v7340_v45  ;;  %3986 = vmatprep.mubr.bf16.mxu0 %v7068_v41  ;;  %v7394_v45 = vld [vmem:[%s7994_s10 + $0x260] ss:$8 sps:$4 sm:$0xff]  }
 0x23d   : > { %4451 = vmatprep.mubr.bf16.mxu1 %v7068_v41  ;;  %v7391_v41 = vld [vmem:[%s7988_s8 + $0x264] ss:$8 sps:$4 sm:$0xff]  }
 0x23e   : > { %4016 = vmatpush1.bf16.msra.mxu0 %v7341_v47  ;;  %v7396_v47 = vld [vmem:[%s7994_s10 + $0x274] ss:$8 sps:$4 sm:$0xff]  }
 0x23f   : > { %4481 = vmatpush1.bf16.msra.mxu1 %v7342_v48  ;;  %4017 = vmatprep.subr.bf16.mxu0 %v7343_v49  ;;  %v7085_v48 = vld [vmem:[#allocation4 + $0x148] ss:$40 sps:$4 sm:$0xff]  }
 0x240   : > { %4482 = vmatprep.subr.bf16.mxu1 %v7344_v50  ;;  %v7397_v49 = vld [vmem:[%s7988_s8 + $0x270] ss:$8 sps:$4 sm:$0xff]  }
 0x241   : > { %3987 = vmatmul.mubr.bf16.gmra.mrb[44].mxu0 %v7070_v46  ;;  %v7398_v50 = vld [vmem:[%s7994_s10 + $0x270] ss:$8 sps:$4 sm:$0xff]  }
 0x242   : > { %4452 = vmatmul.mubr.bf16.gmra.mrb[44].mxu1 %v7070_v46  ;;  %4018 = vmatpush1.bf16.msra.mxu0 %v7345_v52  ;;  %v7395_v46 = vld [vmem:[%s7988_s8 + $0x274] ss:$8 sps:$4 sm:$0xff]   ;;  %v7400_v52 = vld [vmem:[%s7994_s10 + $0x284] ss:$8 sps:$4 sm:$0xff]  }
 0x243   : > { %4483 = vmatpush1.bf16.msra.mxu1 %v7346_v53  ;;  %4019 = vmatprep.subr.bf16.mxu0 %v7347_v54  ;;  %v7086_v53 = vld [vmem:[#allocation4 + $0x19c] ss:$40 sps:$4 sm:$0xff]   ;;  %v7401_v54 = vld [vmem:[%s7988_s8 + $0x280] ss:$8 sps:$4 sm:$0xff]  }
 0x244   : > { %4484 = vmatprep.subr.bf16.mxu1 %v7348_v55  ;;  %4029 = vmatprep.mubr.bf16.mxu0 %v7073_v51  ;;  %v7402_v55 = vld [vmem:[%s7994_s10 + $0x280] ss:$8 sps:$4 sm:$0xff]  }
 0x245   : > { %4494 = vmatprep.mubr.bf16.mxu1 %v7073_v51  ;;  %v7399_v51 = vld [vmem:[%s7988_s8 + $0x284] ss:$8 sps:$4 sm:$0xff]  }
 0x246   : > { %4020 = vmatpush1.bf16.msra.mxu0 %v7349_v56  ;;  %v7403_v56 = vld [vmem:[%s7988_s8 + $0x294] ss:$8 sps:$4 sm:$0xff]  }
 0x247   : > { %4485 = vmatpush1.bf16.msra.mxu1 %v7350_v57  ;;  %4021 = vmatprep.subr.bf16.mxu0 %v7351_v58  ;;  %v7404_v57 = vld [vmem:[%s7994_s10 + $0x294] ss:$8 sps:$4 sm:$0xff]   ;;  %v7088_v58 = vld [vmem:[#allocation4 + $0x198] ss:$40 sps:$4 sm:$0xff]  }
 0x248   : > { %4486 = vmatprep.subr.bf16.mxu1 %v7352_v59  ;;  %v7405_v59 = vld [vmem:[%s7988_s8 + $0x290] ss:$8 sps:$4 sm:$0xff]  }
 0x24a   : > { %4022 = vmatpush1.bf16.msra.mxu0 %v7353_v60  ;;  %v7406_v60 = vld [vmem:[%s7994_s10 + $0x290] ss:$8 sps:$4 sm:$0xff]  }
 0x24b   : > { %4487 = vmatpush1.bf16.msra.mxu1 %v7354_v61  ;;  %4023 = vmatprep.subr.bf16.mxu0 %v7355_v62  ;;  %v7407_v61 = vld [vmem:[%s7988_s8 + $0x2a4] ss:$8 sps:$4 sm:$0xff]  }
 0x24c   : > { %4488 = vmatprep.subr.bf16.mxu1 %v7356_v63  ;;  %v7408_v62 = vld [vmem:[%s7994_s10 + $0x2a4] ss:$8 sps:$4 sm:$0xff]   ;;  %v7091_v63 = vld [vmem:[#allocation4 + $0x14] ss:$40 sps:$4 sm:$0xff]  }
 0x24e   : > { %4024 = vmatpush1.bf16.msra.mxu0 %v7357_v0  ;;  %v7409_v0 = vld [vmem:[%s7988_s8 + $0x2a0] ss:$8 sps:$4 sm:$0xff]  }
 0x24f   : > { %4489 = vmatpush1.bf16.msra.mxu1 %v7358_v1  ;;  %4025 = vmatprep.subr.bf16.mxu0 %v7359_v2  ;;  %v7410_v1 = vld [vmem:[%s7994_s10 + $0x2a0] ss:$8 sps:$4 sm:$0xff]   ;;  %v7411_v2 = vld [vmem:[%s7988_s8 + $0x2b4] ss:$8 sps:$4 sm:$0xff]  }
 0x250   : > { %4490 = vmatprep.subr.bf16.mxu1 %v7360_v3  ;;  %v7412_v3 = vld [vmem:[%s7994_s10 + $0x2b4] ss:$8 sps:$4 sm:$0xff]  }
 0x252   : > { %4026 = vmatpush1.bf16.msra.mxu0 %v7361_v4  ;;  %v7413_v4 = vld [vmem:[%s7988_s8 + $0x2b0] ss:$8 sps:$4 sm:$0xff]  }
 0x253   : > { %4491 = vmatpush1.bf16.msra.mxu1 %v7362_v5  ;;  %4027 = vmatprep.subr.bf16.mxu0 %v7363_v6  ;;  %v7414_v5 = vld [vmem:[%s7994_s10 + $0x2b0] ss:$8 sps:$4 sm:$0xff]   ;;  %v7415_v6 = vld [vmem:[%s7988_s8 + $0x2c4] ss:$8 sps:$4 sm:$0xff]  }
 0x254   : > { %4492 = vmatprep.subr.bf16.mxu1 %v7364_v7  ;;  %v7416_v7 = vld [vmem:[%s7994_s10 + $0x2c4] ss:$8 sps:$4 sm:$0xff]  }
 0x256   : > { %4028 = vmatpush1.bf16.msra.mxu0 %v7365_v9  ;;  %v7418_v9 = vld [vmem:[%s7994_s10 + $0x2c0] ss:$8 sps:$4 sm:$0xff]  }
 0x257   : > { %4493 = vmatpush1.bf16.msra.mxu1 %v7366_v10  ;;  %4090 = vmatprep.subr.bf16.mxu0 %v7367_v11  ;;  %v7419_v10 = vld [vmem:[%s7988_s8 + $0x2d4] ss:$8 sps:$4 sm:$0xff]  }
 0x258   : > { %4555 = vmatprep.subr.bf16.mxu1 %v7368_v12  ;;  %v7420_v11 = vld [vmem:[%s7994_s10 + $0x2d4] ss:$8 sps:$4 sm:$0xff]   ;;  %v7421_v12 = vld [vmem:[%s7988_s8 + $0x2d0] ss:$8 sps:$4 sm:$0xff]  }
 0x259   : > { %4030 = vmatmul.mubr.bf16.vlgmr.msra.gmra.mrb[24].mxu0 %v7071_v8 }
 0x25a   : > { %4495 = vmatmul.mubr.bf16.vlgmr.msra.gmra.mrb[24].mxu1 %v7071_v8  ;;  %4091 = vmatpush1.bf16.msra.mxu0 %v7369_v14  ;;  %v7417_v8 = vld [vmem:[%s7988_s8 + $0x2c0] ss:$8 sps:$4 sm:$0xff]   ;;  %v7423_v14 = vld [vmem:[%s7988_s8 + $0x2e4] ss:$8 sps:$4 sm:$0xff]  }
 0x25b   : > { %4556 = vmatpush1.bf16.msra.mxu1 %v7370_v15  ;;  %4092 = vmatprep.subr.bf16.mxu0 %v7371_v16  ;;  %v7424_v15 = vld [vmem:[%s7994_s10 + $0x2e4] ss:$8 sps:$4 sm:$0xff]   ;;  %v7425_v16 = vld [vmem:[%s7988_s8 + $0x2e0] ss:$8 sps:$4 sm:$0xff]  }
 0x25c   : > { %4557 = vmatprep.subr.bf16.mxu1 %v7372_v17  ;;  %4039 = vmatprep.mubr.bf16.mxu0 %v7074_v13  ;;  %v7426_v17 = vld [vmem:[%s7994_s10 + $0x2e0] ss:$8 sps:$4 sm:$0xff]  }
 0x25d   : > { %4504 = vmatprep.mubr.bf16.mxu1 %v7074_v13  ;;  %v7422_v13 = vld [vmem:[%s7994_s10 + $0x2d0] ss:$8 sps:$4 sm:$0xff]  }
 0x25e   : > { %4093 = vmatpush1.bf16.msra.mxu0 %v7373_v19  ;;  %v7428_v19 = vld [vmem:[%s7994_s10 + $0x2f4] ss:$8 sps:$4 sm:$0xff]  }
 0x25f   : > { %4558 = vmatpush1.bf16.msra.mxu1 %v7374_v20  ;;  %4094 = vmatprep.subr.bf16.mxu0 %v7375_v21  ;;  %v7089_v20 = vld [vmem:[#allocation4 + $0x10] ss:$40 sps:$4 sm:$0xff]  }
 0x260   : > { %4559 = vmatprep.subr.bf16.mxu1 %v7376_v22  ;;  %v7429_v21 = vld [vmem:[%s7988_s8 + $0x2f0] ss:$8 sps:$4 sm:$0xff]  }
 0x261   : > { %4040 = vmatmul.mubr.bf16.gmra.mrb[28].mxu0 %v7076_v18  ;;  %v7430_v22 = vld [vmem:[%s7994_s10 + $0x2f0] ss:$8 sps:$4 sm:$0xff]  }
 0x262   : > { %4505 = vmatmul.mubr.bf16.gmra.mrb[28].mxu1 %v7076_v18  ;;  %4095 = vmatpush1.bf16.msra.mxu0 %v7377_v24  ;;  %v7427_v18 = vld [vmem:[%s7988_s8 + $0x2f4] ss:$8 sps:$4 sm:$0xff]   ;;  %v7432_v24 = vld [vmem:[%s7994_s10 + $0x304] ss:$8 sps:$4 sm:$0xff]  }
 0x263   : > { %4560 = vmatpush1.bf16.msra.mxu1 %v7378_v25  ;;  %4096 = vmatprep.subr.bf16.mxu0 %v7379_v26  ;;  %v7092_v25 = vld [vmem:[#allocation4 + $0x64] ss:$40 sps:$4 sm:$0xff]   ;;  %v7433_v26 = vld [vmem:[%s7988_s8 + $0x300] ss:$8 sps:$4 sm:$0xff]  }
 0x264   : > { %4561 = vmatprep.subr.bf16.mxu1 %v7380_v27  ;;  %4049 = vmatprep.mubr.bf16.mxu0 %v7077_v23  ;;  %v7434_v27 = vld [vmem:[%s7994_s10 + $0x300] ss:$8 sps:$4 sm:$0xff]  }
 0x265   : > { %4514 = vmatprep.mubr.bf16.mxu1 %v7077_v23  ;;  %v7431_v23 = vld [vmem:[%s7988_s8 + $0x304] ss:$8 sps:$4 sm:$0xff]  }
 0x266   : > { %4097 = vmatpush1.bf16.msra.mxu0 %v7381_v29  ;;  %v7436_v29 = vld [vmem:[%s7994_s10 + $0x314] ss:$8 sps:$4 sm:$0xff]  }
 0x267   : > { %4562 = vmatpush1.bf16.msra.mxu1 %v7382_v30  ;;  %4098 = vmatprep.subr.bf16.mxu0 %v7383_v31  ;;  %v7094_v30 = vld [vmem:[#allocation4 + $0x60] ss:$40 sps:$4 sm:$0xff]   ;;  %v7437_v31 = vld [vmem:[%s7988_s8 + $0x310] ss:$8 sps:$4 sm:$0xff]  }
 0x268   : > { %4563 = vmatprep.subr.bf16.mxu1 %v7384_v32  ;;  %v7438_v32 = vld [vmem:[%s7994_s10 + $0x310] ss:$8 sps:$4 sm:$0xff]  }
 0x269   : > { %4050 = vmatmul.mubr.bf16.gmra.mrb[32].mxu0 %v7079_v28 }
 0x26a   : > { %4515 = vmatmul.mubr.bf16.gmra.mrb[32].mxu1 %v7079_v28  ;;  %4099 = vmatpush1.bf16.msra.mxu0 %v7385_v34  ;;  %v7435_v28 = vld [vmem:[%s7988_s8 + $0x314] ss:$8 sps:$4 sm:$0xff]   ;;  %v7440_v34 = vld [vmem:[%s7994_s10 + $0x324] ss:$8 sps:$4 sm:$0xff]  }
 0x26b   : > { %4564 = vmatpush1.bf16.msra.mxu1 %v7386_v35  ;;  %4100 = vmatprep.subr.bf16.mxu0 %v7387_v36  ;;  %v7095_v35 = vld [vmem:[#allocation4 + $0xb4] ss:$40 sps:$4 sm:$0xff]   ;;  %v7441_v36 = vld [vmem:[%s7988_s8 + $0x320] ss:$8 sps:$4 sm:$0xff]  }
 0x26c   : > { %4565 = vmatprep.subr.bf16.mxu1 %v7388_v37  ;;  %4059 = vmatprep.mubr.bf16.mxu0 %v7080_v33  ;;  %v7442_v37 = vld [vmem:[%s7994_s10 + $0x320] ss:$8 sps:$4 sm:$0xff]  }
 0x26d   : > { %4524 = vmatprep.mubr.bf16.mxu1 %v7080_v33  ;;  %v7439_v33 = vld [vmem:[%s7988_s8 + $0x324] ss:$8 sps:$4 sm:$0xff]  }
 0x26e   : > { %4101 = vmatpush1.bf16.msra.mxu0 %v7389_v39  ;;  %v7444_v39 = vld [vmem:[%s7994_s10 + $0x334] ss:$8 sps:$4 sm:$0xff]  }
 0x26f   : > { %4566 = vmatpush1.bf16.msra.mxu1 %v7390_v40  ;;  %4102 = vmatprep.subr.bf16.mxu0 %v7391_v41  ;;  %v7097_v40 = vld [vmem:[#allocation4 + $0xb0] ss:$40 sps:$4 sm:$0xff]  }
 0x270   : > { %4567 = vmatprep.subr.bf16.mxu1 %v7392_v42  ;;  %v7445_v41 = vld [vmem:[%s7988_s8 + $0x330] ss:$8 sps:$4 sm:$0xff]  }
 0x271   : > { %4060 = vmatmul.mubr.bf16.gmra.mrb[36].mxu0 %v7082_v38  ;;  %v7446_v42 = vld [vmem:[%s7994_s10 + $0x330] ss:$8 sps:$4 sm:$0xff]  }
 0x272   : > { %4525 = vmatmul.mubr.bf16.gmra.mrb[36].mxu1 %v7082_v38  ;;  %4103 = vmatpush1.bf16.msra.mxu0 %v7393_v44  ;;  %v7443_v38 = vld [vmem:[%s7988_s8 + $0x334] ss:$8 sps:$4 sm:$0xff]   ;;  %v7448_v44 = vld [vmem:[%s7994_s10 + $0x344] ss:$8 sps:$4 sm:$0xff]  }
 0x273   : > { %4568 = vmatpush1.bf16.msra.mxu1 %v7394_v45  ;;  %4104 = vmatprep.subr.bf16.mxu0 %v7395_v46  ;;  %v7098_v45 = vld [vmem:[#allocation4 + $0x104] ss:$40 sps:$4 sm:$0xff]   ;;  %v7449_v46 = vld [vmem:[%s7988_s8 + $0x340] ss:$8 sps:$4 sm:$0xff]  }
 0x274   : > { %4569 = vmatprep.subr.bf16.mxu1 %v7396_v47  ;;  %4069 = vmatprep.mubr.bf16.mxu0 %v7083_v43  ;;  %v7450_v47 = vld [vmem:[%s7994_s10 + $0x340] ss:$8 sps:$4 sm:$0xff]  }
 0x275   : > { %4534 = vmatprep.mubr.bf16.mxu1 %v7083_v43  ;;  %v7447_v43 = vld [vmem:[%s7988_s8 + $0x344] ss:$8 sps:$4 sm:$0xff]  }
 0x276   : > { %4105 = vmatpush1.bf16.msra.mxu0 %v7397_v49  ;;  %v7452_v49 = vld [vmem:[%s7994_s10 + $0x354] ss:$8 sps:$4 sm:$0xff]  }
 0x277   : > { %4570 = vmatpush1.bf16.msra.mxu1 %v7398_v50  ;;  %4106 = vmatprep.subr.bf16.mxu0 %v7399_v51 }
 0x278   : > { %4571 = vmatprep.subr.bf16.mxu1 %v7400_v52 }
 0x279   : > { %4070 = vmatmul.mubr.bf16.gmra.mrb[40].mxu0 %v7085_v48 }
 0x27a   : > { %4535 = vmatmul.mubr.bf16.gmra.mrb[40].mxu1 %v7085_v48  ;;  %4107 = vmatpush1.bf16.msra.mxu0 %v7401_v54  ;;  %v7451_v48 = vld [vmem:[%s7988_s8 + $0x354] ss:$8 sps:$4 sm:$0xff]  }
 0x27b   : > { %4572 = vmatpush1.bf16.msra.mxu1 %v7402_v55  ;;  %4108 = vmatprep.subr.bf16.mxu0 %v7403_v56  ;;  %v7100_v56 = vld [vmem:[#allocation4 + $0x100] ss:$40 sps:$4 sm:$0xff]  }
 0x27c   : > { %4573 = vmatprep.subr.bf16.mxu1 %v7404_v57  ;;  %4079 = vmatprep.mubr.bf16.mxu0 %v7086_v53 }
 0x27d   : > { %4544 = vmatprep.mubr.bf16.mxu1 %v7086_v53 }
 0x27e   : > { %4109 = vmatpush1.bf16.msra.mxu0 %v7405_v59 }
 0x27f   : > { %4574 = vmatpush1.bf16.msra.mxu1 %v7406_v60  ;;  %4110 = vmatprep.subr.bf16.mxu0 %v7407_v61  ;;  %v7453_v61 = vld [vmem:[%s7988_s8 + $0x350] ss:$8 sps:$4 sm:$0xff]  }
 0x280   : > { %4575 = vmatprep.subr.bf16.mxu1 %v7408_v62  ;;  %v7454_v62 = vld [vmem:[%s7994_s10 + $0x350] ss:$8 sps:$4 sm:$0xff]  }
 0x281   : > { %4080 = vmatmul.mubr.bf16.gmra.mrb[44].mxu0 %v7088_v58 }
 0x282   : > { %4545 = vmatmul.mubr.bf16.gmra.mrb[44].mxu1 %v7088_v58  ;;  %4111 = vmatpush1.bf16.msra.mxu0 %v7409_v0 }
 0x283   : > { %4576 = vmatpush1.bf16.msra.mxu1 %v7410_v1  ;;  %4112 = vmatprep.subr.bf16.mxu0 %v7411_v2 }
 0x284   : > { %4577 = vmatprep.subr.bf16.mxu1 %v7412_v3  ;;  %4122 = vmatprep.mubr.bf16.mxu0 %v7091_v63 }
 0x285   : > { %4587 = vmatprep.mubr.bf16.mxu1 %v7091_v63 }
 0x286   : > { %4113 = vmatpush1.bf16.msra.mxu0 %v7413_v4  ;;  %v7455_v4 = vld [vmem:[%s7988_s8 + $0x364] ss:$8 sps:$4 sm:$0xff]  }
 0x287   : > { %4578 = vmatpush1.bf16.msra.mxu1 %v7414_v5  ;;  %4114 = vmatprep.subr.bf16.mxu0 %v7415_v6  ;;  %v7456_v5 = vld [vmem:[%s7994_s10 + $0x364] ss:$8 sps:$4 sm:$0xff]  }
 0x288   : > { %4579 = vmatprep.subr.bf16.mxu1 %v7416_v7 }
 0x28a   : > { %4115 = vmatpush1.bf16.msra.mxu0 %v7417_v8 }
 0x28b   : > { %4580 = vmatpush1.bf16.msra.mxu1 %v7418_v9  ;;  %4116 = vmatprep.subr.bf16.mxu0 %v7419_v10  ;;  %v7101_v9 = vld [vmem:[#allocation4 + $0x154] ss:$40 sps:$4 sm:$0xff]  }
 0x28c   : > { %4581 = vmatprep.subr.bf16.mxu1 %v7420_v11 }
 0x28e   : > { %4117 = vmatpush1.bf16.msra.mxu0 %v7421_v12  ;;  %v7457_v12 = vld [vmem:[%s7988_s8 + $0x360] ss:$8 sps:$4 sm:$0xff]  }
 0x28f   : > { %4582 = vmatpush1.bf16.msra.mxu1 %v7422_v13  ;;  %4118 = vmatprep.subr.bf16.mxu0 %v7423_v14  ;;  %v7458_v13 = vld [vmem:[%s7994_s10 + $0x360] ss:$8 sps:$4 sm:$0xff]   ;;  %v7459_v14 = vld [vmem:[%s7988_s8 + $0x374] ss:$8 sps:$4 sm:$0xff]  }
 0x290   : > { %4583 = vmatprep.subr.bf16.mxu1 %v7424_v15  ;;  %v7460_v15 = vld [vmem:[%s7994_s10 + $0x374] ss:$8 sps:$4 sm:$0xff]  }
 0x292   : > { %4119 = vmatpush1.bf16.msra.mxu0 %v7425_v16 }
 0x293   : > { %4584 = vmatpush1.bf16.msra.mxu1 %v7426_v17  ;;  %4120 = vmatprep.subr.bf16.mxu0 %v7427_v18 }
 0x294   : > { %4585 = vmatprep.subr.bf16.mxu1 %v7428_v19 }
 0x296   : > { %4121 = vmatpush1.bf16.msra.mxu0 %v7429_v21 }
 0x297   : > { %4586 = vmatpush1.bf16.msra.mxu1 %v7430_v22  ;;  %4183 = vmatprep.subr.bf16.mxu0 %v7431_v23  ;;  %v7103_v22 = vld [vmem:[#allocation4 + $0x150] ss:$40 sps:$4 sm:$0xff]  }
 0x298   : > { %4648 = vmatprep.subr.bf16.mxu1 %v7432_v24 }
 0x299   : > { %4123 = vmatmul.mubr.bf16.vlgmr.msra.gmra.mrb[24].mxu0 %v7089_v20 }
 0x29a   : > { %4588 = vmatmul.mubr.bf16.vlgmr.msra.gmra.mrb[24].mxu1 %v7089_v20  ;;  %4184 = vmatpush1.bf16.msra.mxu0 %v7433_v26 }
 0x29b   : > { %4649 = vmatpush1.bf16.msra.mxu1 %v7434_v27  ;;  %4185 = vmatprep.subr.bf16.mxu0 %v7435_v28  ;;  %v7461_v27 = vld [vmem:[%s7988_s8 + $0x370] ss:$8 sps:$4 sm:$0xff]  }
 0x29c   : > { %4650 = vmatprep.subr.bf16.mxu1 %v7436_v29  ;;  %4132 = vmatprep.mubr.bf16.mxu0 %v7092_v25  ;;  %v7462_v28 = vld [vmem:[%s7994_s10 + $0x370] ss:$8 sps:$4 sm:$0xff]  }
 0x29d   : > { %4597 = vmatprep.mubr.bf16.mxu1 %v7092_v25 }
 0x29e   : > { %4186 = vmatpush1.bf16.msra.mxu0 %v7437_v31 }
 0x29f   : > { %4651 = vmatpush1.bf16.msra.mxu1 %v7438_v32  ;;  %4187 = vmatprep.subr.bf16.mxu0 %v7439_v33 }
 0x2a0   : > { %4652 = vmatprep.subr.bf16.mxu1 %v7440_v34  ;;  %v7463_v34 = vld [vmem:[%s7988_s8 + $0x384] ss:$8 sps:$4 sm:$0xff]  }
 0x2a1   : > { %4133 = vmatmul.mubr.bf16.gmra.mrb[28].mxu0 %v7094_v30 }
 0x2a2   : > { %4598 = vmatmul.mubr.bf16.gmra.mrb[28].mxu1 %v7094_v30  ;;  %4188 = vmatpush1.bf16.msra.mxu0 %v7441_v36 }
 0x2a3   : > { %4653 = vmatpush1.bf16.msra.mxu1 %v7442_v37  ;;  %4189 = vmatprep.subr.bf16.mxu0 %v7443_v38 }
 0x2a4   : > { %4654 = vmatprep.subr.bf16.mxu1 %v7444_v39  ;;  %4142 = vmatprep.mubr.bf16.mxu0 %v7095_v35  ;;  %v7104_v39 = vld [vmem:[#allocation4 + $0x1a4] ss:$40 sps:$4 sm:$0xff]  }
 0x2a5   : > { %4607 = vmatprep.mubr.bf16.mxu1 %v7095_v35  ;;  %v7464_v35 = vld [vmem:[%s7994_s10 + $0x384] ss:$8 sps:$4 sm:$0xff]  }
 0x2a6   : > { %4190 = vmatpush1.bf16.msra.mxu0 %v7445_v41 }
 0x2a7   : > { %4655 = vmatpush1.bf16.msra.mxu1 %v7446_v42  ;;  %4191 = vmatprep.subr.bf16.mxu0 %v7447_v43  ;;  %v7465_v42 = vld [vmem:[%s7988_s8 + $0x380] ss:$8 sps:$4 sm:$0xff]  }
 0x2a8   : > { %4656 = vmatprep.subr.bf16.mxu1 %v7448_v44  ;;  %v7466_v43 = vld [vmem:[%s7994_s10 + $0x380] ss:$8 sps:$4 sm:$0xff]   ;;  %v7467_v44 = vld [vmem:[%s7988_s8 + $0x394] ss:$8 sps:$4 sm:$0xff]  }
 0x2a9   : > { %4143 = vmatmul.mubr.bf16.gmra.mrb[32].mxu0 %v7097_v40 }
 0x2aa   : > { %4608 = vmatmul.mubr.bf16.gmra.mrb[32].mxu1 %v7097_v40  ;;  %4192 = vmatpush1.bf16.msra.mxu0 %v7449_v46 }
 0x2ab   : > { %4657 = vmatpush1.bf16.msra.mxu1 %v7450_v47  ;;  %4193 = vmatprep.subr.bf16.mxu0 %v7451_v48 }
 0x2ac   : > { %4658 = vmatprep.subr.bf16.mxu1 %v7452_v49  ;;  %v2280_v50 = vpop.f32.mrb[0].mxu0  ;;  %4152 = vmatprep.mubr.bf16.mxu0 %v7098_v45 }
 0x2ad   : > { %v3545_v51 = vpop.f32.mrb[0].mxu1  ;;  %4617 = vmatprep.mubr.bf16.mxu1 %v7098_v45  ;;  %v4834_v52 = vmul.f32 %v2280_v50, %v2280_v50  ;;  %v2282_v54 = vpop.f32.mrb[1].mxu0  ;;  %v7468_v45 = vld [vmem:[%s7994_s10 + $0x394] ss:$8 sps:$4 sm:$0xff]  }
 0x2ae   : > { %v4858_v53 = vmul.f32 %v3545_v51, %v3545_v51  ;;  %v3547_v55 = vpop.f32.mrb[1].mxu1  ;;  %v4835_v57 = vmul.f32 %v2282_v54, %v2282_v54  ;;  %v2284_v59 = vpop.f32.mrb[2].mxu0  ;;  %4194 = vmatpush1.bf16.msra.mxu0 %v7453_v61 }
 0x2af   : > { %v4859_v58 = vmul.f32 %v3547_v55, %v3547_v55  ;;  %v3549_v60 = vpop.f32.mrb[2].mxu1  ;;  %4659 = vmatpush1.bf16.msra.mxu1 %v7454_v62  ;;  %v4836_v0 = vmul.f32 %v2284_v59, %v2284_v59  ;;  %v2286_v2 = vpop.f32.mrb[3].mxu0  ;;  %4195 = vmatprep.subr.bf16.mxu0 %v7455_v4 }
 0x2b0   : > { %v8569_v63 = vadd.f32 %v4858_v53, %v4834_v52  ;;  %v4860_v1 = vmul.f32 %v3549_v60, %v3549_v60  ;;  %v3551_v3 = vpop.f32.mrb[3].mxu1  ;;  %4660 = vmatprep.subr.bf16.mxu1 %v7456_v5  ;;  %v4837_v7 = vmul.f32 %v2286_v2, %v2286_v2  ;;  %v7106_v52 = vld [vmem:[#allocation4 + $0x1a0] ss:$40 sps:$4 sm:$0xff]   ;;  %v7472_v2 = vld [vmem:[%s7994_s10 + $0x3a4] ss:$8 sps:$4 sm:$0xff]  }
 0x2b1   : > { %v8573_v6 = vadd.f32 %v4859_v58, %v4835_v57  ;;  %v4861_v8 = vmul.f32 %v3551_v3, %v3551_v3  ;;  %4153 = vmatmul.mubr.bf16.gmra.mrb[36].mxu0 %v7100_v56  ;;  %v7469_v57 = vld [vmem:[%s7988_s8 + $0x390] ss:$8 sps:$4 sm:$0xff]  }
 0x2b2   : > { %v8575_v10 = vadd.f32 %v4860_v1, %v4836_v0  ;;  %4618 = vmatmul.mubr.bf16.gmra.mrb[36].mxu1 %v7100_v56  ;;  %4196 = vmatpush1.bf16.msra.mxu0 %v7457_v12  ;;  %v7470_v58 = vld [vmem:[%s7994_s10 + $0x390] ss:$8 sps:$4 sm:$0xff]   ;;  %v7471_v1 = vld [vmem:[%s7988_s8 + $0x3a4] ss:$8 sps:$4 sm:$0xff]   ;;  %v7473_v12 = vld [vmem:[%s7988_s8 + $0x3a0] ss:$8 sps:$4 sm:$0xff]   ;;  %7143 = vrsqrt.f32 %v8569_v63 }
 0x2b3   : > { %v8577_v11 = vadd.f32 %v4861_v8, %v4837_v7  ;;  %4661 = vmatpush1.bf16.msra.mxu1 %v7458_v13  ;;  %4197 = vmatprep.subr.bf16.mxu0 %v7459_v14  ;;  %v7109_v7 = vld [vmem:[#allocation4 + $0x1c] ss:$40 sps:$4 sm:$0xff]   ;;  %v7474_v13 = vld [vmem:[%s7994_s10 + $0x3a0] ss:$8 sps:$4 sm:$0xff]   ;;  %7145 = vrsqrt.f32 %v8573_v6  ;;  %vm4908_vm1 = vcmp.eq.f32.partialorder %v8569_v63, inf  ;;  %vm4910_vm2 = vcmp.eq.f32.partialorder %v8569_v63, 0.0 }
 0x2b4   : > { %4662 = vmatprep.subr.bf16.mxu1 %v7460_v15  ;;  %v2290_v16 = vpop.f32.mrb[4].mxu0  ;;  %4162 = vmatprep.mubr.bf16.mxu0 %v7101_v9  ;;  %v7475_v14 = vld [vmem:[%s7988_s8 + $0x3b4] ss:$8 sps:$4 sm:$0xff]   ;;  %7147 = vrsqrt.f32 %v8575_v10  ;;  %vm4915_vm3 = vcmp.eq.f32.partialorder %v8573_v6, inf  ;;  %vm4917_vm4 = vcmp.eq.f32.partialorder %v8573_v6, 0.0  ;;  %vm4922_vm5 = vcmp.eq.f32.partialorder %v8575_v10, inf }
 0x2b5   : > { %v3555_v17 = vpop.f32.mrb[4].mxu1  ;;  %4627 = vmatprep.mubr.bf16.mxu1 %v7101_v9  ;;  %v4838_v18 = vmul.f32 %v2290_v16, %v2290_v16  ;;  %v2292_v20 = vpop.f32.mrb[5].mxu0  ;;  %v7476_v15 = vld [vmem:[%s7994_s10 + $0x3b4] ss:$8 sps:$4 sm:$0xff]   ;;  %7149 = vrsqrt.f32 %v8577_v11  ;;  %vm4924_vm6 = vcmp.eq.f32.partialorder %v8575_v10, 0.0  ;;  %vm4929_vm7 = vcmp.eq.f32.partialorder %v8577_v11, inf }
 0x2b6   : > { %v4862_v19 = vmul.f32 %v3555_v17, %v3555_v17  ;;  %v3557_v21 = vpop.f32.mrb[5].mxu1  ;;  %v4839_v23 = vmul.f32 %v2292_v20, %v2292_v20  ;;  %v2294_v25 = vpop.f32.mrb[6].mxu0  ;;  %4198 = vmatpush1.bf16.msra.mxu0 %v7461_v27  ;;  %v7478_v27 = vld [vmem:[%s7994_s10 + $0x3b0] ss:$8 sps:$4 sm:$0xff]   ;;  %vm4931_vm8 = vcmp.eq.f32.partialorder %v8577_v11, 0.0 }
 0x2b7   : > { %v4863_v24 = vmul.f32 %v3557_v21, %v3557_v21  ;;  %v3559_v26 = vpop.f32.mrb[6].mxu1  ;;  %4663 = vmatpush1.bf16.msra.mxu1 %v7462_v28  ;;  %v4840_v30 = vmul.f32 %v2294_v25, %v2294_v25  ;;  %v2296_v32 = vpop.f32.mrb[7].mxu0  ;;  %4199 = vmatprep.subr.bf16.mxu0 %v7463_v34  ;;  %v7479_v34 = vld [vmem:[%s7988_s8 + $0x3c4] ss:$8 sps:$4 sm:$0xff]  }
 0x2b8   : > { %v8585_v29 = vadd.f32 %v4862_v19, %v4838_v18  ;;  %v4864_v31 = vmul.f32 %v3559_v26, %v3559_v26  ;;  %v3561_v33 = vpop.f32.mrb[7].mxu1  ;;  %4664 = vmatprep.subr.bf16.mxu1 %v7464_v35  ;;  %v4841_v37 = vmul.f32 %v2296_v32, %v2296_v32  ;;  %v7477_v26 = vld [vmem:[%s7988_s8 + $0x3b0] ss:$8 sps:$4 sm:$0xff]   ;;  %v7480_v35 = vld [vmem:[%s7994_s10 + $0x3c4] ss:$8 sps:$4 sm:$0xff]  }
 0x2b9   : > { %v8589_v36 = vadd.f32 %v4863_v24, %v4839_v23  ;;  %v4865_v38 = vmul.f32 %v3561_v33, %v3561_v33  ;;  %4163 = vmatmul.mubr.bf16.gmra.mrb[40].mxu0 %v7103_v22 }
 0x2ba   : > { %v8591_v40 = vadd.f32 %v4864_v31, %v4840_v30  ;;  %4628 = vmatmul.mubr.bf16.gmra.mrb[40].mxu1 %v7103_v22  ;;  %4200 = vmatpush1.bf16.msra.mxu0 %v7465_v42  ;;  %7151 = vrsqrt.f32 %v8585_v29  ;;  %vm4936_vm9 = vcmp.eq.f32.partialorder %v8585_v29, inf  ;;  %vm4938_vm10 = vcmp.eq.f32.partialorder %v8585_v29, 0.0 }
 0x2bb   : > { %v8593_v41 = vadd.f32 %v4865_v38, %v4841_v37  ;;  %4665 = vmatpush1.bf16.msra.mxu1 %v7466_v43  ;;  %4201 = vmatprep.subr.bf16.mxu0 %v7467_v44  ;;  %v7481_v44 = vld [vmem:[%s7988_s8 + $0x3c0] ss:$8 sps:$4 sm:$0xff]   ;;  %7153 = vrsqrt.f32 %v8589_v36  ;;  %vm4943_vm11 = vcmp.eq.f32.partialorder %v8589_v36, inf  ;;  %vm4945_vm12 = vcmp.eq.f32.partialorder %v8589_v36, 0.0 }
 0x2bc   : > { %4666 = vmatprep.subr.bf16.mxu1 %v7468_v45  ;;  %v2300_v46 = vpop.f32.mrb[8].mxu0  ;;  %4172 = vmatprep.mubr.bf16.mxu0 %v7104_v39  ;;  %v7482_v45 = vld [vmem:[%s7994_s10 + $0x3c0] ss:$8 sps:$4 sm:$0xff]   ;;  %7155 = vrsqrt.f32 %v8591_v40  ;;  %vm4950_vm13 = vcmp.eq.f32.partialorder %v8591_v40, inf  ;;  %vm4952_vm14 = vcmp.eq.f32.partialorder %v8591_v40, 0.0 }
 0x2bd   : > { %v3565_v47 = vpop.f32.mrb[8].mxu1  ;;  %4637 = vmatprep.mubr.bf16.mxu1 %v7104_v39  ;;  %v4842_v48 = vmul.f32 %v2300_v46, %v2300_v46  ;;  %v2302_v50 = vpop.f32.mrb[9].mxu0  ;;  %v7483_v46 = vld [vmem:[%s7988_s8 + $0x3d4] ss:$8 sps:$4 sm:$0xff]   ;;  %7157 = vrsqrt.f32 %v8593_v41  ;;  %vm4957_vm15 = vcmp.eq.f32.partialorder %v8593_v41, inf  ;;  %vm4959_vm0 = vcmp.eq.f32.partialorder %v8593_v41, 0.0 }
 0x2be   : > { %v4866_v49 = vmul.f32 %v3565_v47, %v3565_v47  ;;  %v3567_v51 = vpop.f32.mrb[9].mxu1  ;;  %v4843_v53 = vmul.f32 %v2302_v50, %v2302_v50  ;;  %v2304_v55 = vpop.f32.mrb[10].mxu0  ;;  %4202 = vmatpush1.bf16.msra.mxu0 %v7469_v57  ;;  %v7484_v47 = vld [vmem:[%s7994_s10 + $0x3d4] ss:$8 sps:$4 sm:$0xff]  }
 0x2bf   : > { %v4867_v54 = vmul.f32 %v3567_v51, %v3567_v51  ;;  %v3569_v56 = vpop.f32.mrb[10].mxu1  ;;  %4667 = vmatpush1.bf16.msra.mxu1 %v7470_v58  ;;  %v4844_v60 = vmul.f32 %v2304_v55, %v2304_v55  ;;  %v2306_v62 = vpop.f32.mrb[11].mxu0  ;;  %4203 = vmatprep.subr.bf16.mxu0 %v7471_v1  ;;  %v7485_v58 = vld [vmem:[%s7988_s8 + $0x3d0] ss:$8 sps:$4 sm:$0xff]  }
 0x2c0   : > { %v8601_v59 = vadd.f32 %v4866_v49, %v4842_v48  ;;  %v4868_v61 = vmul.f32 %v3569_v56, %v3569_v56  ;;  %v3571_v0 = vpop.f32.mrb[11].mxu1  ;;  %4668 = vmatprep.subr.bf16.mxu1 %v7472_v2  ;;  %v4845_v4 = vmul.f32 %v2306_v62, %v2306_v62 }
 0x2c1   : > { %v8605_v3 = vadd.f32 %v4867_v54, %v4843_v53  ;;  %v4869_v5 = vmul.f32 %v3571_v0, %v3571_v0  ;;  %4173 = vmatmul.mubr.bf16.gmra.mrb[44].mxu0 %v7106_v52 }
 0x2c2   : > { %v8607_v8 = vadd.f32 %v4868_v61, %v4844_v60  ;;  %4638 = vmatmul.mubr.bf16.gmra.mrb[44].mxu1 %v7106_v52  ;;  %4204 = vmatpush1.bf16.msra.mxu0 %v7473_v12  ;;  %v7486_v60 = vld [vmem:[%s7994_s10 + $0x3d0] ss:$8 sps:$4 sm:$0xff]   ;;  %7159 = vrsqrt.f32 %v8601_v59 }
 0x2c3   : > { %v8609_v9 = vadd.f32 %v4869_v5, %v4845_v4  ;;  %4669 = vmatpush1.bf16.msra.mxu1 %v7474_v13  ;;  %4205 = vmatprep.subr.bf16.mxu0 %v7475_v14  ;;  %v7487_v4 = vld [vmem:[%s7988_s8 + $0x3e4] ss:$8 sps:$4 sm:$0xff]   ;;  %7161 = vrsqrt.f32 %v8605_v3 }
 0x2c4   : > { %4670 = vmatprep.subr.bf16.mxu1 %v7476_v15  ;;  %v2310_v16 = vpop.f32.mrb[12].mxu0  ;;  %4215 = vmatprep.mubr.bf16.mxu0 %v7109_v7  ;;  %v7488_v5 = vld [vmem:[%s7994_s10 + $0x3e4] ss:$8 sps:$4 sm:$0xff]   ;;  %7163 = vrsqrt.f32 %v8607_v8 }
 0x2c5   : > { %v3575_v17 = vpop.f32.mrb[12].mxu1  ;;  %4680 = vmatprep.mubr.bf16.mxu1 %v7109_v7  ;;  %v4846_v18 = vmul.f32 %v2310_v16, %v2310_v16  ;;  %v2312_v20 = vpop.f32.mrb[13].mxu0  ;;  %v7489_v16 = vld [vmem:[%s7988_s8 + $0x3e0] ss:$8 sps:$4 sm:$0xff]   ;;  %7165 = vrsqrt.f32 %v8609_v9 }
 0x2c6   : > { %v4870_v19 = vmul.f32 %v3575_v17, %v3575_v17  ;;  %v3577_v21 = vpop.f32.mrb[13].mxu1  ;;  %v4847_v22 = vmul.f32 %v2312_v20, %v2312_v20  ;;  %v2314_v24 = vpop.f32.mrb[14].mxu0  ;;  %4206 = vmatpush1.bf16.msra.mxu0 %v7477_v26  ;;  %v7490_v17 = vld [vmem:[%s7994_s10 + $0x3e0] ss:$8 sps:$4 sm:$0xff]  }
 0x2c7   : > { %v4871_v23 = vmul.f32 %v3577_v21, %v3577_v21  ;;  %v3579_v25 = vpop.f32.mrb[14].mxu1  ;;  %4671 = vmatpush1.bf16.msra.mxu1 %v7478_v27  ;;  %v4848_v30 = vmul.f32 %v2314_v24, %v2314_v24  ;;  %v2316_v32 = vpop.f32.mrb[15].mxu0  ;;  %4207 = vmatprep.subr.bf16.mxu0 %v7479_v34  ;;  %v7107_v26 = vld [vmem:[#allocation4 + $0x18] ss:$40 sps:$4 sm:$0xff]  }
 0x2c8   : > { %v8617_v28 = vadd.f32 %v4870_v19, %v4846_v18  ;;  %v4872_v31 = vmul.f32 %v3579_v25, %v3579_v25  ;;  %v3581_v33 = vpop.f32.mrb[15].mxu1  ;;  %4672 = vmatprep.subr.bf16.mxu1 %v7480_v35  ;;  %v4849_v38 = vmul.f32 %v2316_v32, %v2316_v32  ;;  %v7491_v18 = vld [vmem:[%s7988_s8 + $0x3f4] ss:$8 sps:$4 sm:$0xff]   ;;  %v7494_v34 = vld [vmem:[%s7994_s10 + $0x3f0] ss:$8 sps:$4 sm:$0xff]  }
 0x2c9   : > { %v8621_v37 = vadd.f32 %v4871_v23, %v4847_v22  ;;  %v4873_v39 = vmul.f32 %v3581_v33, %v3581_v33  ;;  %v7492_v19 = vld [vmem:[%s7994_s10 + $0x3f4] ss:$8 sps:$4 sm:$0xff]   ;;  %v7493_v33 = vld [vmem:[%s7988_s8 + $0x3f0] ss:$8 sps:$4 sm:$0xff]  }
 0x2ca   : > { %v8623_v42 = vadd.f32 %v4872_v31, %v4848_v30  ;;  %4208 = vmatpush1.bf16.msra.mxu0 %v7481_v44  ;;  %7167 = vrsqrt.f32 %v8617_v28 }
 0x2cb   : > { %v8625_v43 = vadd.f32 %v4873_v39, %v4849_v38  ;;  %4673 = vmatpush1.bf16.msra.mxu1 %v7482_v45  ;;  %4209 = vmatprep.subr.bf16.mxu0 %v7483_v46  ;;  %v7495_v46 = vld [vmem:[%s7988_s8 + $0x404] ss:$8 sps:$4 sm:$0xff]   ;;  %7169 = vrsqrt.f32 %v8621_v37 }
 0x2cc   : > { %4674 = vmatprep.subr.bf16.mxu1 %v7484_v47  ;;  %v2320_v48 = vpop.f32.mrb[16].mxu0  ;;  %v7496_v47 = vld [vmem:[%s7994_s10 + $0x404] ss:$8 sps:$4 sm:$0xff]   ;;  %7171 = vrsqrt.f32 %v8623_v42 }
 0x2cd   : > { %v3585_v49 = vpop.f32.mrb[16].mxu1  ;;  %v4850_v50 = vmul.f32 %v2320_v48, %v2320_v48  ;;  %v2322_v52 = vpop.f32.mrb[17].mxu0  ;;  %7173 = vrsqrt.f32 %v8625_v43 }
 0x2ce   : > { %v4874_v51 = vmul.f32 %v3585_v49, %v3585_v49  ;;  %v3587_v53 = vpop.f32.mrb[17].mxu1  ;;  %v4851_v54 = vmul.f32 %v2322_v52, %v2322_v52  ;;  %v2324_v56 = vpop.f32.mrb[18].mxu0  ;;  %4210 = vmatpush1.bf16.msra.mxu0 %v7485_v58  ;;  %v7112_v58 = vld [vmem:[#allocation4 + $0x68] ss:$40 sps:$4 sm:$0xff]  }
 0x2cf   : > { %v4875_v55 = vmul.f32 %v3587_v53, %v3587_v53  ;;  %v3589_v57 = vpop.f32.mrb[18].mxu1  ;;  %4675 = vmatpush1.bf16.msra.mxu1 %v7486_v60  ;;  %v4852_v62 = vmul.f32 %v2324_v56, %v2324_v56  ;;  %v2326_v1 = vpop.f32.mrb[19].mxu0  ;;  %4211 = vmatprep.subr.bf16.mxu0 %v7487_v4  ;;  %v7499_v56 = vld [vmem:[%s7988_s8 + $0x414] ss:$8 sps:$4 sm:$0xff]   ;;  %v7501_v60 = vld [vmem:[%s7988_s8 + $0x410] ss:$8 sps:$4 sm:$0xff]  }
 0x2d0   : > { %v8633_v61 = vadd.f32 %v4874_v51, %v4850_v50  ;;  %v4876_v0 = vmul.f32 %v3589_v57, %v3589_v57  ;;  %v3591_v2 = vpop.f32.mrb[19].mxu1  ;;  %4676 = vmatprep.subr.bf16.mxu1 %v7488_v5  ;;  %v4853_v12 = vmul.f32 %v2326_v1, %v2326_v1  ;;  %v7110_v51 = vld [vmem:[#allocation4 + $0x6c] ss:$40 sps:$4 sm:$0xff]   ;;  %v7505_v4 = vld [vmem:[%s7988_s8 + $0x420] ss:$8 sps:$4 sm:$0xff]  }
 0x2d1   : > { %v8637_v7 = vadd.f32 %v4875_v55, %v4851_v54  ;;  %v4877_v13 = vmul.f32 %v3591_v2, %v3591_v2  ;;  %v7497_v54 = vld [vmem:[%s7988_s8 + $0x400] ss:$8 sps:$4 sm:$0xff]   ;;  %v7500_v57 = vld [vmem:[%s7994_s10 + $0x414] ss:$8 sps:$4 sm:$0xff]   ;;  %v7504_v1 = vld [vmem:[%s7994_s10 + $0x424] ss:$8 sps:$4 sm:$0xff]  }
 0x2d2   : > { %v8639_v14 = vadd.f32 %v4876_v0, %v4852_v62  ;;  %4212 = vmatpush1.bf16.msra.mxu0 %v7489_v16  ;;  %v7498_v55 = vld [vmem:[%s7994_s10 + $0x400] ss:$8 sps:$4 sm:$0xff]   ;;  %v7502_v62 = vld [vmem:[%s7994_s10 + $0x410] ss:$8 sps:$4 sm:$0xff]   ;;  %v7503_v0 = vld [vmem:[%s7988_s8 + $0x424] ss:$8 sps:$4 sm:$0xff]  }
 0x2d3   : > { %v8641_v15 = vadd.f32 %v4877_v13, %v4853_v12  ;;  %4677 = vmatpush1.bf16.msra.mxu1 %v7490_v17  ;;  %4213 = vmatprep.subr.bf16.mxu0 %v7491_v18  ;;  %v7113_v2 = vld [vmem:[#allocation4 + $0xbc] ss:$40 sps:$4 sm:$0xff]   ;;  %v7506_v5 = vld [vmem:[%s7994_s10 + $0x420] ss:$8 sps:$4 sm:$0xff]   ;;  %v7509_v17 = vld [vmem:[%s7988_s8 + $0x430] ss:$8 sps:$4 sm:$0xff]  }
 0x2d4   : > { %4678 = vmatprep.subr.bf16.mxu1 %v7492_v19  ;;  %v2330_v20 = vpop.f32.mrb[20].mxu0  ;;  %v7507_v12 = vld [vmem:[%s7988_s8 + $0x434] ss:$8 sps:$4 sm:$0xff]   ;;  %v7115_v16 = vld [vmem:[#allocation4 + $0xb8] ss:$40 sps:$4 sm:$0xff]  }
 0x2d5   : > { %v3595_v21 = vpop.f32.mrb[20].mxu1  ;;  %v4854_v22 = vmul.f32 %v2330_v20, %v2330_v20  ;;  %v2332_v24 = vpop.f32.mrb[21].mxu0  ;;  %v7508_v13 = vld [vmem:[%s7994_s10 + $0x434] ss:$8 sps:$4 sm:$0xff]   ;;  %v7510_v18 = vld [vmem:[%s7994_s10 + $0x430] ss:$8 sps:$4 sm:$0xff]  }
 0x2d6   : > { %v4878_v23 = vmul.f32 %v3595_v21, %v3595_v21  ;;  %v3597_v25 = vpop.f32.mrb[21].mxu1  ;;  %v4855_v27 = vmul.f32 %v2332_v24, %v2332_v24  ;;  %v2334_v31 = vpop.f32.mrb[22].mxu0  ;;  %4214 = vmatpush1.bf16.msra.mxu0 %v7493_v33  ;;  %v7511_v19 = vld [vmem:[%s7988_s8 + $0x444] ss:$8 sps:$4 sm:$0xff]   ;;  %v7515_v24 = vld [vmem:[%s7988_s8 + $0x454] ss:$8 sps:$4 sm:$0xff]  }
 0x2d7   : > { %v4879_v30 = vmul.f32 %v3597_v25, %v3597_v25  ;;  %v3599_v32 = vpop.f32.mrb[22].mxu1  ;;  %4679 = vmatpush1.bf16.msra.mxu1 %v7494_v34  ;;  %v4856_v38 = vmul.f32 %v2334_v31, %v2334_v31  ;;  %v2336_v44 = vpop.f32.mrb[23].mxu0  ;;  %4276 = vmatprep.subr.bf16.mxu0 %v7495_v46  ;;  %v7512_v20 = vld [vmem:[%s7994_s10 + $0x444] ss:$8 sps:$4 sm:$0xff]   ;;  %v7516_v25 = vld [vmem:[%s7994_s10 + $0x454] ss:$8 sps:$4 sm:$0xff]  }
 0x2d8   : > { %v8649_v35 = vadd.f32 %v4878_v23, %v4854_v22  ;;  %v4880_v39 = vmul.f32 %v3599_v32, %v3599_v32  ;;  %v3601_v45 = vpop.f32.mrb[23].mxu1  ;;  %4741 = vmatprep.subr.bf16.mxu1 %v7496_v47  ;;  %v4857_v49 = vmul.f32 %v2336_v44, %v2336_v44  ;;  %v7116_v21 = vld [vmem:[#allocation4 + $0x10c] ss:$40 sps:$4 sm:$0xff]   ;;  %v7513_v22 = vld [vmem:[%s7988_s8 + $0x440] ss:$8 sps:$4 sm:$0xff]  }
 0x2d9   : > { %v8653_v48 = vadd.f32 %v4879_v30, %v4855_v27  ;;  %v4881_v50 = vmul.f32 %v3601_v45, %v3601_v45  ;;  %4216 = vmatmul.mubr.bf16.vlgmr.msra.gmra.mrb[24].mxu0 %v7107_v26  ;;  %v7514_v23 = vld [vmem:[%s7994_s10 + $0x440] ss:$8 sps:$4 sm:$0xff]   ;;  %v7517_v27 = vld [vmem:[%s7988_s8 + $0x450] ss:$8 sps:$4 sm:$0xff]   ;;  %v7519_v31 = vld [vmem:[%s7988_s8 + $0x464] ss:$8 sps:$4 sm:$0xff]  }
 0x2da   : > { %v8655_v52 = vadd.f32 %v4880_v39, %v4856_v38  ;;  %4681 = vmatmul.mubr.bf16.vlgmr.msra.gmra.mrb[24].mxu1 %v7107_v26  ;;  %4277 = vmatpush1.bf16.msra.mxu0 %v7497_v54  ;;  %v7118_v26 = vld [vmem:[#allocation4 + $0x108] ss:$40 sps:$4 sm:$0xff]   ;;  %v7520_v32 = vld [vmem:[%s7994_s10 + $0x464] ss:$8 sps:$4 sm:$0xff]   ;;  %v7523_v39 = vld [vmem:[%s7988_s8 + $0x474] ss:$8 sps:$4 sm:$0xff]  }
 0x2db   : > { %v8657_v53 = vadd.f32 %v4881_v50, %v4857_v49  ;;  %4742 = vmatpush1.bf16.msra.mxu1 %v7498_v55  ;;  %4278 = vmatprep.subr.bf16.mxu0 %v7499_v56  ;;  %v7518_v30 = vld [vmem:[%s7994_s10 + $0x450] ss:$8 sps:$4 sm:$0xff]   ;;  %v7119_v33 = vld [vmem:[#allocation4 + $0x15c] ss:$40 sps:$4 sm:$0xff]   ;;  %v7521_v34 = vld [vmem:[%s7988_s8 + $0x460] ss:$8 sps:$4 sm:$0xff]  }
 0x2dc   : > { %4743 = vmatprep.subr.bf16.mxu1 %v7500_v57  ;;  %4225 = vmatprep.mubr.bf16.mxu0 %v7110_v51  ;;  %v7522_v38 = vld [vmem:[%s7994_s10 + $0x460] ss:$8 sps:$4 sm:$0xff]   ;;  %v7524_v44 = vld [vmem:[%s7994_s10 + $0x474] ss:$8 sps:$4 sm:$0xff]   ;;  %v7525_v46 = vld [vmem:[%s7988_s8 + $0x470] ss:$8 sps:$4 sm:$0xff]  }
 0x2dd   : > { %4690 = vmatprep.mubr.bf16.mxu1 %v7110_v51  ;;  %v7121_v45 = vld [vmem:[#allocation4 + $0x158] ss:$40 sps:$4 sm:$0xff]   ;;  %v7527_v49 = vld [vmem:[%s7988_s8 + $0x484] ss:$8 sps:$4 sm:$0xff]   ;;  %v7531_v56 = vld [vmem:[%s7988_s8 + $0x494] ss:$8 sps:$4 sm:$0xff]  }
 0x2de   : > { %4279 = vmatpush1.bf16.msra.mxu0 %v7501_v60  ;;  %v7526_v47 = vld [vmem:[%s7994_s10 + $0x470] ss:$8 sps:$4 sm:$0xff]   ;;  %v7528_v50 = vld [vmem:[%s7994_s10 + $0x484] ss:$8 sps:$4 sm:$0xff]   ;;  %v7529_v54 = vld [vmem:[%s7988_s8 + $0x480] ss:$8 sps:$4 sm:$0xff]  }
 0x2df   : > { %4744 = vmatpush1.bf16.msra.mxu1 %v7502_v62  ;;  %4280 = vmatprep.subr.bf16.mxu0 %v7503_v0  ;;  %v7122_v51 = vld [vmem:[#allocation4 + $0x1ac] ss:$40 sps:$4 sm:$0xff]   ;;  %v7530_v55 = vld [vmem:[%s7994_s10 + $0x480] ss:$8 sps:$4 sm:$0xff]   ;;  %v7533_v60 = vld [vmem:[%s7988_s8 + $0x490] ss:$8 sps:$4 sm:$0xff]  }
 0x2e0   : > { %4745 = vmatprep.subr.bf16.mxu1 %v7504_v1  ;;  %v7532_v57 = vld [vmem:[%s7994_s10 + $0x494] ss:$8 sps:$4 sm:$0xff]   ;;  %v7534_v62 = vld [vmem:[%s7994_s10 + $0x490] ss:$8 sps:$4 sm:$0xff]   ;;  %v7535_v0 = vld [vmem:[%s7988_s8 + $0x4a4] ss:$8 sps:$4 sm:$0xff]  }
 0x2e1   : > { %4226 = vmatmul.mubr.bf16.gmra.mrb[28].mxu0 %v7112_v58  ;;  %v7536_v1 = vld [vmem:[%s7994_s10 + $0x4a4] ss:$8 sps:$4 sm:$0xff]  }
 0x2e2   : > { %4691 = vmatmul.mubr.bf16.gmra.mrb[28].mxu1 %v7112_v58  ;;  %4281 = vmatpush1.bf16.msra.mxu0 %v7505_v4  ;;  %v7124_v58 = vld [vmem:[#allocation4 + $0x1a8] ss:$40 sps:$4 sm:$0xff]  }
 0x2e3   : > { %4746 = vmatpush1.bf16.msra.mxu1 %v7506_v5  ;;  %4282 = vmatprep.subr.bf16.mxu0 %v7507_v12  ;;  %v7537_v4 = vld [vmem:[%s7988_s8 + $0x4a0] ss:$8 sps:$4 sm:$0xff]   ;;  %v7539_v12 = vld [vmem:[%s7988_s8 + $0x4b4] ss:$8 sps:$4 sm:$0xff]  }
 0x2e4   : > { %4747 = vmatprep.subr.bf16.mxu1 %v7508_v13  ;;  %4235 = vmatprep.mubr.bf16.mxu0 %v7113_v2  ;;  %v7538_v5 = vld [vmem:[%s7994_s10 + $0x4a0] ss:$8 sps:$4 sm:$0xff]   ;;  %v7540_v13 = vld [vmem:[%s7994_s10 + $0x4b4] ss:$8 sps:$4 sm:$0xff]  }
 0x2e5   : > { %4700 = vmatprep.mubr.bf16.mxu1 %v7113_v2  ;;  %v7127_v2 = vld [vmem:[#allocation4 + $0x24] ss:$40 sps:$4 sm:$0xff]  }
 0x2e6   : > { %4283 = vmatpush1.bf16.msra.mxu0 %v7509_v17  ;;  %v7542_v17 = vld [vmem:[%s7994_s10 + $0x4b0] ss:$8 sps:$4 sm:$0xff]  }
 0x2e7   : > { %4748 = vmatpush1.bf16.msra.mxu1 %v7510_v18  ;;  %4284 = vmatprep.subr.bf16.mxu0 %v7511_v19  ;;  %v7543_v18 = vld [vmem:[%s7988_s8 + $0x4c4] ss:$8 sps:$4 sm:$0xff]  }
 0x2e8   : > { %4749 = vmatprep.subr.bf16.mxu1 %v7512_v20  ;;  %v7544_v19 = vld [vmem:[%s7994_s10 + $0x4c4] ss:$8 sps:$4 sm:$0xff]   ;;  %v7545_v20 = vld [vmem:[%s7988_s8 + $0x4c0] ss:$8 sps:$4 sm:$0xff]  }
 0x2e9   : > { %4236 = vmatmul.mubr.bf16.gmra.mrb[32].mxu0 %v7115_v16 }
 0x2ea   : > { %4701 = vmatmul.mubr.bf16.gmra.mrb[32].mxu1 %v7115_v16  ;;  %4285 = vmatpush1.bf16.msra.mxu0 %v7513_v22  ;;  %v7541_v16 = vld [vmem:[%s7988_s8 + $0x4b0] ss:$8 sps:$4 sm:$0xff]   ;;  %v7547_v22 = vld [vmem:[%s7988_s8 + $0x4d4] ss:$8 sps:$4 sm:$0xff]  }
 0x2eb   : > { %4750 = vmatpush1.bf16.msra.mxu1 %v7514_v23  ;;  %4286 = vmatprep.subr.bf16.mxu0 %v7515_v24  ;;  %v7548_v23 = vld [vmem:[%s7994_s10 + $0x4d4] ss:$8 sps:$4 sm:$0xff]   ;;  %v7549_v24 = vld [vmem:[%s7988_s8 + $0x4d0] ss:$8 sps:$4 sm:$0xff]  }
 0x2ec   : > { %4751 = vmatprep.subr.bf16.mxu1 %v7516_v25  ;;  %4245 = vmatprep.mubr.bf16.mxu0 %v7116_v21  ;;  %v7550_v25 = vld [vmem:[%s7994_s10 + $0x4d0] ss:$8 sps:$4 sm:$0xff]  }
 0x2ed   : > { %4710 = vmatprep.mubr.bf16.mxu1 %v7116_v21  ;;  %v7546_v21 = vld [vmem:[%s7994_s10 + $0x4c0] ss:$8 sps:$4 sm:$0xff]  }
 0x2ee   : > { %4287 = vmatpush1.bf16.msra.mxu0 %v7517_v27  ;;  %v7552_v27 = vld [vmem:[%s7994_s10 + $0x4e4] ss:$8 sps:$4 sm:$0xff]  }
 0x2ef   : > { %4752 = vmatpush1.bf16.msra.mxu1 %v7518_v30  ;;  %4288 = vmatprep.subr.bf16.mxu0 %v7519_v31  ;;  %v7553_v30 = vld [vmem:[%s7988_s8 + $0x4e0] ss:$8 sps:$4 sm:$0xff]  }
 0x2f0   : > { %4753 = vmatprep.subr.bf16.mxu1 %v7520_v32  ;;  %v7554_v31 = vld [vmem:[%s7994_s10 + $0x4e0] ss:$8 sps:$4 sm:$0xff]   ;;  %v7555_v32 = vld [vmem:[%s7988_s8 + $0x4f4] ss:$8 sps:$4 sm:$0xff]  }
 0x2f1   : > { %4246 = vmatmul.mubr.bf16.gmra.mrb[36].mxu0 %v7118_v26 }
 0x2f2   : > { %4711 = vmatmul.mubr.bf16.gmra.mrb[36].mxu1 %v7118_v26  ;;  %4289 = vmatpush1.bf16.msra.mxu0 %v7521_v34  ;;  %v7551_v26 = vld [vmem:[%s7988_s8 + $0x4e4] ss:$8 sps:$4 sm:$0xff]   ;;  %v7125_v34 = vld [vmem:[#allocation4 + $0x20] ss:$40 sps:$4 sm:$0xff]  }
 0x2f3   : > { %4754 = vmatpush1.bf16.msra.mxu1 %v7522_v38  ;;  %4290 = vmatprep.subr.bf16.mxu0 %v7523_v39  ;;  %v7557_v38 = vld [vmem:[%s7988_s8 + $0x4f0] ss:$8 sps:$4 sm:$0xff]  }
 0x2f4   : > { %4755 = vmatprep.subr.bf16.mxu1 %v7524_v44  ;;  %4255 = vmatprep.mubr.bf16.mxu0 %v7119_v33  ;;  %v7558_v39 = vld [vmem:[%s7994_s10 + $0x4f0] ss:$8 sps:$4 sm:$0xff]   ;;  %v7128_v44 = vld [vmem:[#allocation4 + $0x74] ss:$40 sps:$4 sm:$0xff]  }
 0x2f5   : > { %4720 = vmatprep.mubr.bf16.mxu1 %v7119_v33  ;;  %v7556_v33 = vld [vmem:[%s7994_s10 + $0x4f4] ss:$8 sps:$4 sm:$0xff]  }
 0x2f6   : > { %4291 = vmatpush1.bf16.msra.mxu0 %v7525_v46  ;;  %v7131_v46 = vld [vmem:[#allocation4 + $0xc4] ss:$40 sps:$4 sm:$0xff]  }
 0x2f7   : > { %4756 = vmatpush1.bf16.msra.mxu1 %v7526_v47  ;;  %4292 = vmatprep.subr.bf16.mxu0 %v7527_v49  ;;  %v7133_v47 = vld [vmem:[#allocation4 + $0xc0] ss:$40 sps:$4 sm:$0xff]   ;;  %v7134_v49 = vld [vmem:[#allocation4 + $0x114] ss:$40 sps:$4 sm:$0xff]  }
 0x2f8   : > { %4757 = vmatprep.subr.bf16.mxu1 %v7528_v50  ;;  %v7136_v50 = vld [vmem:[#allocation4 + $0x110] ss:$40 sps:$4 sm:$0xff]  }
 0x2f9   : > { %4256 = vmatmul.mubr.bf16.gmra.mrb[40].mxu0 %v7121_v45 }
 0x2fa   : > { %4721 = vmatmul.mubr.bf16.gmra.mrb[40].mxu1 %v7121_v45  ;;  %4293 = vmatpush1.bf16.msra.mxu0 %v7529_v54  ;;  %v7130_v45 = vld [vmem:[#allocation4 + $0x70] ss:$40 sps:$4 sm:$0xff]   ;;  %v7139_v54 = vld [vmem:[#allocation4 + $0x160] ss:$40 sps:$4 sm:$0xff]  }
 0x2fb   : > { %4758 = vmatpush1.bf16.msra.mxu1 %v7530_v55  ;;  %4294 = vmatprep.subr.bf16.mxu0 %v7531_v56  ;;  %v7140_v55 = vld [vmem:[#allocation4 + $0x1b4] ss:$40 sps:$4 sm:$0xff]   ;;  %v7142_v56 = vld [vmem:[#allocation4 + $0x1b0] ss:$40 sps:$4 sm:$0xff]  }
 0x2fc   : > { %4759 = vmatprep.subr.bf16.mxu1 %v7532_v57  ;;  %4265 = vmatprep.mubr.bf16.mxu0 %v7122_v51  ;;  %v7144_v57 = vpop.eup %7143  ;;  %7175 = vrsqrt.f32 %v8633_v61 }
 0x2fd   : > { %4730 = vmatprep.mubr.bf16.mxu1 %v7122_v51  ;;  %v7137_v51 = vld [vmem:[#allocation4 + $0x164] ss:$40 sps:$4 sm:$0xff]  }
 0x2fe   : > { %4295 = vmatpush1.bf16.msra.mxu0 %v7533_v60  ;;  %v4911_v60 = vand.u32 2147483648, %v8569_v63 }
 0x2ff   : > { %4760 = vmatpush1.bf16.msra.mxu1 %v7534_v62  ;;  %4296 = vmatprep.subr.bf16.mxu0 %v7535_v0  ;;  %v4907_v0 = vmul.f32 %v7144_v57, %v8569_v63 }
 0x300   : > { %4761 = vmatprep.subr.bf16.mxu1 %v7536_v1  ;;  %v4918_v1 = vand.u32 2147483648, %v8573_v6 }
 0x301   : > { %4266 = vmatmul.mubr.bf16.gmra.mrb[44].mxu0 %v7124_v58 }
 0x302   : > { %4731 = vmatmul.mubr.bf16.gmra.mrb[44].mxu1 %v7124_v58  ;;  %4297 = vmatpush1.bf16.msra.mxu0 %v7537_v4  ;;  %v7146_v58 = vpop.eup %7145  ;;  %7177 = vrsqrt.f32 %v8637_v7 }
 0x303   : > { %4762 = vmatpush1.bf16.msra.mxu1 %v7538_v5  ;;  %4298 = vmatprep.subr.bf16.mxu0 %v7539_v12  ;;  %v7148_v62 = vpop.eup %7147  ;;  %v4914_v4 = vmul.f32 %v7146_v58, %v8573_v6  ;;  %v4925_v5 = vand.u32 2147483648, %v8575_v10  ;;  %7179 = vrsqrt.f32 %v8639_v14 }
 0x304   : > { %4763 = vmatprep.subr.bf16.mxu1 %v7540_v13  ;;  %4308 = vmatprep.mubr.bf16.mxu0 %v7127_v2  ;;  %v4932_v13 = vand.u32 2147483648, %v8577_v11 }
 0x305   : > { %4773 = vmatprep.mubr.bf16.mxu1 %v7127_v2  ;;  %v7150_v2 = vpop.eup %7149  ;;  %7181 = vrsqrt.f32 %v8641_v15 }
 0x306   : > { %4299 = vmatpush1.bf16.msra.mxu0 %v7541_v16  ;;  %v7152_v12 = vpop.eup %7151  ;;  %7183 = vrsqrt.f32 %v8649_v35 }
 0x307   : > { %4764 = vmatpush1.bf16.msra.mxu1 %v7542_v17  ;;  %4300 = vmatprep.subr.bf16.mxu0 %v7543_v18  ;;  %v7154_v16 = vpop.eup %7153  ;;  %v4921_v17 = vmul.f32 %v7148_v62, %v8575_v10  ;;  %v4939_v18 = vand.u32 2147483648, %v8585_v29  ;;  %7185 = vrsqrt.f32 %v8653_v48 }
 0x308   : > { %4765 = vmatprep.subr.bf16.mxu1 %v7544_v19  ;;  %v4946_v19 = vand.u32 2147483648, %v8589_v36 }
 0x30a   : > { %4301 = vmatpush1.bf16.msra.mxu0 %v7545_v20  ;;  %v7156_v20 = vpop.eup %7155  ;;  %7187 = vrsqrt.f32 %v8655_v52 }
 0x30b   : > { %4766 = vmatpush1.bf16.msra.mxu1 %v7546_v21  ;;  %4302 = vmatprep.subr.bf16.mxu0 %v7547_v22  ;;  %v4909_v21 = vsel %vm4908_vm1, %v8569_v63, %v4907_v0  ;;  %v4928_v22 = vmul.f32 %v7150_v2, %v8577_v11  ;;  %vm4964_vm1 = vcmp.eq.f32.partialorder %v8601_v59, inf  ;;  %v4974_v2 = vand.u32 2147483648, %v8605_v3 }
 0x30c   : > { %4767 = vmatprep.subr.bf16.mxu1 %v7548_v23  ;;  %v7158_v23 = vpop.eup %7157  ;;  %7189 = vrsqrt.f32 %v8657_v53 }
 0x30d   : > { %v4956_v63 = vmul.f32 %v7158_v23, %v8593_v41 }
 0x30e   : > { %4303 = vmatpush1.bf16.msra.mxu0 %v7549_v24  ;;  %v4916_v24 = vsel %vm4915_vm3, %v8573_v6, %v4914_v4  ;;  %vm4971_vm3 = vcmp.eq.f32.partialorder %v8605_v3, inf }
 0x30f   : > { %4768 = vmatpush1.bf16.msra.mxu1 %v7550_v25  ;;  %4304 = vmatprep.subr.bf16.mxu0 %v7551_v26  ;;  %v4935_v25 = vmul.f32 %v7152_v12, %v8585_v29  ;;  %v4953_v26 = vand.u32 2147483648, %v8591_v40  ;;  %v4958_v58 = vsel %vm4957_vm15, %v8593_v41, %v4956_v63  ;;  %v5009_v63 = vand.u32 2147483648, %v8623_v42 }
 0x310   : > { %4769 = vmatprep.subr.bf16.mxu1 %v7552_v27  ;;  %v7160_v27 = vpop.eup %7159  ;;  %vm5013_vm15 = vcmp.eq.f32.partialorder %v8625_v43, inf }
 0x312   : > { %4305 = vmatpush1.bf16.msra.mxu0 %v7553_v30  ;;  %v4942_v30 = vmul.f32 %v7154_v16, %v8589_v36  ;;  %v4981_v16 = vand.u32 2147483648, %v8607_v8 }
 0x313   : > { %4770 = vmatpush1.bf16.msra.mxu1 %v7554_v31  ;;  %4306 = vmatprep.subr.bf16.mxu0 %v7555_v32  ;;  %v4960_v31 = vand.u32 2147483648, %v8593_v41  ;;  %v8775_v32 = vsel %vm4910_vm2, %v4911_v60, %v4909_v21  ;;  %vm4966_vm2 = vcmp.eq.f32.partialorder %v8601_v59, 0.0 }
 0x314   : > { %4771 = vmatprep.subr.bf16.mxu1 %v7556_v33  ;;  %v4923_v33 = vsel %vm4922_vm5, %v8575_v10, %v4921_v17  ;;  %vm4978_vm5 = vcmp.eq.f32.partialorder %v8607_v8, inf }
 0x315   : > { %v8841_v4 = vsel %vm4959_vm0, %v4960_v31, %v4958_v58  ;;  %vm5015_vm0 = vcmp.eq.f32.partialorder %v8625_v43, 0.0  ;;  %v5037_v58 = vand.u32 2147483648, %v8639_v14 }
 0x316   : > { %4307 = vmatpush1.bf16.msra.mxu0 %v7557_v38  ;;  %v7162_v38 = vpop.eup %7161 }
 0x317   : > { %4772 = vmatpush1.bf16.msra.mxu1 %v7558_v39  ;;  %v8784_v39 = vsel %vm4917_vm4, %v4918_v1, %v4916_v24  ;;  %v4970_v10 = vmul.f32 %v7162_v38, %v8605_v3  ;;  %vm4973_vm4 = vcmp.eq.f32.partialorder %v8605_v3, 0.0  ;;  %v4995_v24 = vand.u32 2147483648, %v8617_v28 }
 0x319   : > { %4309 = vmatmul.mubr.bf16.vlgmr.msra.gmra.mrb[24].mxu0 %v7125_v34 }
 0x31a   : > { %4774 = vmatmul.mubr.bf16.vlgmr.msra.gmra.mrb[24].mxu1 %v7125_v34  ;;  %4318 = vmatprep.mubr.bf16.mxu0 %v7128_v44  ;;  %v4949_v34 = vmul.f32 %v7156_v20, %v8591_v40  ;;  %v4988_v20 = vand.u32 2147483648, %v8609_v9 }
 0x31b   : > { %4783 = vmatprep.mubr.bf16.mxu1 %v7128_v44  ;;  %v4930_v44 = vsel %vm4929_vm7, %v8577_v11, %v4928_v22  ;;  %vm4985_vm7 = vcmp.eq.f32.partialorder %v8609_v9, inf }
 0x321   : > { %4319 = vmatmul.mubr.bf16.gmra.mrb[28].mxu0 %v7130_v45 }
 0x322   : > { %4784 = vmatmul.mubr.bf16.gmra.mrb[28].mxu1 %v7130_v45  ;;  %4328 = vmatprep.mubr.bf16.mxu0 %v7131_v46  ;;  %v7164_v45 = vpop.eup %7163 }
 0x323   : > { %4793 = vmatprep.mubr.bf16.mxu1 %v7131_v46  ;;  %v4937_v46 = vsel %vm4936_vm9, %v8585_v29, %v4935_v25  ;;  %v7166_v6 = vpop.eup %7165  ;;  %v4977_v11 = vmul.f32 %v7164_v45, %v8607_v8  ;;  %vm4987_vm9 = vcmp.eq.f32.partialorder %v8609_v9, 0.0  ;;  %v5016_v45 = vand.u32 2147483648, %v8625_v43 }
 0x324   : > { %v8816_v57 = vsel %vm4938_vm10, %v4939_v18, %v4937_v46  ;;  %v4984_v29 = vmul.f32 %v7166_v6, %v8609_v9  ;;  %vm4994_vm10 = vcmp.eq.f32.partialorder %v8617_v28, 0.0 }
 0x326   : > { %v4986_v17 = vsel %vm4985_vm7, %v8609_v9, %v4984_v29  ;;  %vm5041_vm7 = vcmp.eq.f32.partialorder %v8641_v15, inf }
 0x329   : > { %4329 = vmatmul.mubr.bf16.gmra.mrb[32].mxu0 %v7133_v47 }
 0x32a   : > { %4794 = vmatmul.mubr.bf16.gmra.mrb[32].mxu1 %v7133_v47  ;;  %4338 = vmatprep.mubr.bf16.mxu0 %v7134_v49  ;;  %v4963_v47 = vmul.f32 %v7160_v27, %v8601_v59  ;;  %v8871_v27 = vsel %vm4987_vm9, %v4988_v20, %v4986_v17  ;;  %vm5048_vm9 = vcmp.eq.f32.partialorder %v8649_v35, inf }
 0x32b   : > { %4803 = vmatprep.mubr.bf16.mxu1 %v7134_v49  ;;  %v8799_v49 = vsel %vm4924_vm6, %v4925_v5, %v4923_v33  ;;  %v4972_v5 = vsel %vm4971_vm3, %v8605_v3, %v4970_v10  ;;  %vm4980_vm6 = vcmp.eq.f32.partialorder %v8607_v8, 0.0  ;;  %vm5034_vm3 = vcmp.eq.f32.partialorder %v8639_v14, inf }
 0x32c   : > { %v4965_v62 = vsel %vm4964_vm1, %v8601_v59, %v4963_v47  ;;  %vm5020_vm1 = vcmp.eq.f32.partialorder %v8633_v61, inf }
 0x331   : > { %4339 = vmatmul.mubr.bf16.gmra.mrb[36].mxu0 %v7136_v50 }
 0x332   : > { %4804 = vmatmul.mubr.bf16.gmra.mrb[36].mxu1 %v7136_v50  ;;  %4348 = vmatprep.mubr.bf16.mxu0 %v7137_v51  ;;  %v4944_v50 = vsel %vm4943_vm11, %v8589_v36, %v4942_v30  ;;  %vm4999_vm11 = vcmp.eq.f32.partialorder %v8621_v37, inf  ;;  %v5002_v30 = vand.u32 2147483648, %v8621_v37 }
 0x333   : > { %4813 = vmatprep.mubr.bf16.mxu1 %v7137_v51  ;;  %v7168_v51 = vpop.eup %7167  ;;  %v8825_v60 = vsel %vm4945_vm12, %v4946_v19, %v4944_v50  ;;  %vm5001_vm12 = vcmp.eq.f32.partialorder %v8621_v37, 0.0  ;;  %v5023_v50 = vand.u32 2147483648, %v8633_v61 }
 0x334   : > { %v7170_v0 = vpop.eup %7169  ;;  %v4991_v36 = vmul.f32 %v7168_v51, %v8617_v28  ;;  %v5030_v51 = vand.u32 2147483648, %v8637_v7 }
 0x335   : > { %v7172_v12 = vpop.eup %7171  ;;  %v4998_v18 = vmul.f32 %v7170_v0, %v8621_v37 }
 0x336   : > { %v7174_v41 = vpop.eup %7173  ;;  %v5005_v25 = vmul.f32 %v7172_v12, %v8623_v42 }
 0x337   : > { %v7176_v19 = vpop.eup %7175  ;;  %v5012_v9 = vmul.f32 %v7174_v41, %v8625_v43 }
 0x338   : > { %v7178_v22 = vpop.eup %7177  ;;  %v5019_v31 = vmul.f32 %v7176_v19, %v8633_v61 }
 0x339   : > { %4349 = vmatmul.mubr.bf16.gmra.mrb[40].mxu0 %v7139_v54 }
 0x33a   : > { %4814 = vmatmul.mubr.bf16.gmra.mrb[40].mxu1 %v7139_v54  ;;  %4358 = vmatprep.mubr.bf16.mxu0 %v7140_v55  ;;  %v8807_v54 = vsel %vm4931_vm8, %v4932_v13, %v4930_v44  ;;  %v4979_v13 = vsel %vm4978_vm5, %v8607_v8, %v4977_v11  ;;  %vm4992_vm8 = vcmp.eq.f32.partialorder %v8617_v28, inf  ;;  %v5000_v8 = vsel %vm4999_vm11, %v8621_v37, %v4998_v18 }
 0x33b   : > { %4823 = vmatprep.mubr.bf16.mxu1 %v7140_v55  ;;  %v4951_v55 = vsel %vm4950_vm13, %v8591_v40, %v4949_v34  ;;  %v4993_v21 = vsel %vm4992_vm8, %v8617_v28, %v4991_v36  ;;  %v8866_v23 = vsel %vm4980_vm6, %v4981_v16, %v4979_v13  ;;  %vm5006_vm13 = vcmp.eq.f32.partialorder %v8623_v42, inf }
 0x33c   : > { %v8835_v1 = vsel %vm4952_vm14, %v4953_v26, %v4951_v55  ;;  %v7180_v26 = vpop.eup %7179  ;;  %v8877_v3 = vsel %vm4994_vm10, %v4995_v24, %v4993_v21  ;;  %v5026_v28 = vmul.f32 %v7178_v22, %v8637_v7  ;;  %v5007_v33 = vsel %vm5006_vm13, %v8623_v42, %v5005_v25 }
 0x33d   : > { %vm5008_vm14 = vcmp.eq.f32.partialorder %v8623_v42, 0.0  ;;  %v5033_v34 = vmul.f32 %v7180_v26, %v8639_v14  ;;  %v7182_v38 = vpop.eup %7181  ;;  %v8889_v44 = vsel %vm5001_vm12, %v5002_v30, %v5000_v8  ;;  %v5014_v37 = vsel %vm5013_vm15, %v8625_v43, %v5012_v9 }
 0x33e   : > { %v8898_v46 = vsel %vm5008_vm14, %v5009_v63, %v5007_v33  ;;  %v5021_v47 = vsel %vm5020_vm1, %v8633_v61, %v5019_v31  ;;  %v7184_v42 = vpop.eup %7183  ;;  %v5040_v43 = vmul.f32 %v7182_v38, %v8641_v15  ;;  %v8907_v10 = vsel %vm5015_vm0, %v5016_v45, %v5014_v37 }
 0x33f   : > { %v5035_v55 = vsel %vm5034_vm3, %v8639_v14, %v5033_v34  ;;  %vm5029_vm5 = vcmp.eq.f32.partialorder %v8637_v7, 0.0  ;;  %vm5036_vm6 = vcmp.eq.f32.partialorder %v8639_v14, 0.0  ;;  %vm5043_vm8 = vcmp.eq.f32.partialorder %v8641_v15, 0.0 }
 0x340   : > { %v5042_v41 = vsel %vm5041_vm7, %v8641_v15, %v5040_v43  ;;  %vm5050_vm10 = vcmp.eq.f32.partialorder %v8649_v35, 0.0  ;;  %vm5055_vm11 = vcmp.eq.f32.partialorder %v8653_v48, inf  ;;  %v5051_v37 = vand.u32 2147483648, %v8649_v35 }
 0x341   : > { %4359 = vmatmul.mubr.bf16.gmra.mrb[44].mxu0 %v7142_v56  ;;  %v5058_v45 = vand.u32 2147483648, %v8653_v48  ;;  %vm5057_vm12 = vcmp.eq.f32.partialorder %v8653_v48, 0.0  ;;  %vm5062_vm13 = vcmp.eq.f32.partialorder %v8655_v52, inf  ;;  %v5065_v43 = vand.u32 2147483648, %v8655_v52 }
 0x342   : > { %4824 = vmatmul.mubr.bf16.gmra.mrb[44].mxu1 %v7142_v56  ;;  %v4967_v56 = vand.u32 2147483648, %v8601_v59  ;;  %v8860_v59 = vsel %vm4973_vm4, %v4974_v2, %v4972_v5  ;;  %vm5022_vm4 = vcmp.eq.f32.partialorder %v8633_v61, 0.0  ;;  %v8918_v2 = vsel %vm5036_vm6, %v5037_v58, %v5035_v55 }
 0x343   : > { %v8912_v11 = vsel %vm5022_vm4, %v5023_v50, %v5021_v47  ;;  %v5044_v61 = vand.u32 2147483648, %v8641_v15 }
 0x344   : > { %v8848_v40 = vsel %vm4966_vm2, %v4967_v56, %v4965_v62  ;;  %vm5027_vm2 = vcmp.eq.f32.partialorder %v8637_v7, inf  ;;  %v7186_v56 = vpop.eup %7185 }
 0x345   : > { %v5028_v6 = vsel %vm5027_vm2, %v8637_v7, %v5026_v28  ;;  %v5047_v7 = vmul.f32 %v7184_v42, %v8649_v35  ;;  %v7188_v36 = vpop.eup %7187  ;;  %v5054_v14 = vmul.f32 %v7186_v56, %v8653_v48  ;;  %v8946_v47 = vsel %vm5043_vm8, %v5044_v61, %v5042_v41 }
 0x346   : > { %v8914_v62 = vsel %vm5029_vm5, %v5030_v51, %v5028_v6  ;;  %v7190_v21 = vpop.eup %7189  ;;  %v5061_v28 = vmul.f32 %v7188_v36, %v8655_v52 }
 0x347   : > { %v5049_v34 = vsel %vm5048_vm9, %v8649_v35, %v5047_v7  ;;  %v5056_v38 = vsel %vm5055_vm11, %v8653_v48, %v5054_v14  ;;  %v8961_v48 = vmul.f32 %v7190_v21, %v8657_v53 }
 0x348   : > { %v8952_v50 = vsel %vm5050_vm10, %v5051_v37, %v5049_v34  ;;  %v8954_v51 = vsel %vm5057_vm12, %v5058_v45, %v5056_v38  ;;  %v8957_v55 = vsel %vm5062_vm13, %v8655_v52, %v5061_v28 }
 0x3ec   : > { %v4310_v29 = vpop.f32.mrb[24].mxu0 }
 0x3ed   : > { %v4775_v0 = vpop.f32.mrb[24].mxu1  ;;  %v5074_v5 = vmul.f32 %v4310_v29, %v4310_v29  ;;  %v4312_v13 = vpop.f32.mrb[25].mxu0 }
 0x3ee   : > { %v5098_v12 = vmul.f32 %v4775_v0, %v4775_v0  ;;  %v4777_v16 = vpop.f32.mrb[25].mxu1  ;;  %v5075_v17 = vmul.f32 %v4312_v13, %v4312_v13  ;;  %v4314_v19 = vpop.f32.mrb[26].mxu0  ;;  %v5072_v0 = vand.u32 2147483648, %v8657_v53 }
 0x3ef   : > { %v5099_v18 = vmul.f32 %v4777_v16, %v4777_v16  ;;  %v4779_v20 = vpop.f32.mrb[26].mxu1  ;;  %v5076_v24 = vmul.f32 %v4314_v19, %v4314_v19  ;;  %v4316_v26 = vpop.f32.mrb[27].mxu0 }
 0x3f0   : > { %v8927_v22 = vadd.f32 %v5098_v12, %v5074_v5  ;;  %v5100_v25 = vmul.f32 %v4779_v20, %v4779_v20  ;;  %v4781_v8 = vpop.f32.mrb[27].mxu1  ;;  %v5077_v30 = vmul.f32 %v4316_v26, %v4316_v26 }
 0x3f1   : > { %v8930_v9 = vadd.f32 %v5099_v18, %v5075_v17  ;;  %v5101_v31 = vmul.f32 %v4781_v8, %v4781_v8 }
 0x3f2   : > { %7191 = vrsqrt.f32 %v8927_v22  ;;  %v8934_v33 = vadd.f32 %v5100_v25, %v5076_v24  ;;  %vm5148_vm14 = vcmp.eq.f32.partialorder %v8927_v22, inf  ;;  %vm5150_vm15 = vcmp.eq.f32.partialorder %v8927_v22, 0.0 }
 0x3f3   : > { %7193 = vrsqrt.f32 %v8930_v9  ;;  %v8939_v63 = vadd.f32 %v5101_v31, %v5077_v30  ;;  %v5151_v19 = vand.u32 2147483648, %v8927_v22  ;;  %vm5155_vm0 = vcmp.eq.f32.partialorder %v8930_v9, inf }
 0x3f4   : > { %7195 = vrsqrt.f32 %v8934_v33  ;;  %v4320_v6 = vpop.f32.mrb[28].mxu0  ;;  %vm5157_vm1 = vcmp.eq.f32.partialorder %v8930_v9, 0.0  ;;  %v5158_v24 = vand.u32 2147483648, %v8930_v9  ;;  %vm5162_vm2 = vcmp.eq.f32.partialorder %v8934_v33, inf }
 0x3f5   : > { %v4785_v42 = vpop.f32.mrb[28].mxu1  ;;  %v5078_v15 = vmul.f32 %v4320_v6, %v4320_v6  ;;  %v4322_v58 = vpop.f32.mrb[29].mxu0  ;;  %7197 = vrsqrt.f32 %v8939_v63  ;;  %vm5164_vm3 = vcmp.eq.f32.partialorder %v8934_v33, 0.0  ;;  %v5165_v26 = vand.u32 2147483648, %v8934_v33 }
 0x3f6   : > { %v5102_v56 = vmul.f32 %v4785_v42, %v4785_v42  ;;  %v4787_v29 = vpop.f32.mrb[29].mxu1  ;;  %v5079_v35 = vmul.f32 %v4322_v58, %v4322_v58  ;;  %v4324_v7 = vpop.f32.mrb[30].mxu0  ;;  %v5172_v8 = vand.u32 2147483648, %v8939_v63  ;;  %vm5169_vm4 = vcmp.eq.f32.partialorder %v8939_v63, inf }
 0x3f7   : > { %v5103_v61 = vmul.f32 %v4787_v29, %v4787_v29  ;;  %v4789_v36 = vpop.f32.mrb[30].mxu1  ;;  %v5080_v12 = vmul.f32 %v4324_v7, %v4324_v7  ;;  %v4326_v16 = vpop.f32.mrb[31].mxu0  ;;  %vm5171_vm5 = vcmp.eq.f32.partialorder %v8939_v63, 0.0 }
 0x3f8   : > { %v8966_v5 = vadd.f32 %v5102_v56, %v5078_v15  ;;  %v5104_v13 = vmul.f32 %v4789_v36, %v4789_v36  ;;  %v4791_v41 = vpop.f32.mrb[31].mxu1  ;;  %v5081_v17 = vmul.f32 %v4326_v16, %v4326_v16 }
 0x3f9   : > { %v8969_v14 = vadd.f32 %v5103_v61, %v5079_v35  ;;  %v5105_v18 = vmul.f32 %v4791_v41, %v4791_v41 }
 0x3fa   : > { %7199 = vrsqrt.f32 %v8966_v5  ;;  %v8973_v20 = vadd.f32 %v5104_v13, %v5080_v12  ;;  %v5179_v38 = vand.u32 2147483648, %v8966_v5  ;;  %vm5176_vm6 = vcmp.eq.f32.partialorder %v8966_v5, inf }
 0x3fb   : > { %7201 = vrsqrt.f32 %v8969_v14  ;;  %v8978_v21 = vadd.f32 %v5105_v18, %v5081_v17  ;;  %v5186_v37 = vand.u32 2147483648, %v8969_v14  ;;  %vm5178_vm7 = vcmp.eq.f32.partialorder %v8966_v5, 0.0 }
 0x3fc   : > { %v7192_v25 = vpop.eup %7191  ;;  %7203 = vrsqrt.f32 %v8973_v20  ;;  %v4330_v31 = vpop.f32.mrb[32].mxu0  ;;  %v5193_v29 = vand.u32 2147483648, %v8973_v20  ;;  %vm5183_vm8 = vcmp.eq.f32.partialorder %v8969_v14, inf  ;;  %vm5185_vm9 = vcmp.eq.f32.partialorder %v8969_v14, 0.0 }
 0x3fd   : > { %v7194_v30 = vpop.eup %7193  ;;  %7205 = vrsqrt.f32 %v8978_v21  ;;  %v4795_v28 = vpop.f32.mrb[32].mxu1  ;;  %v5147_v34 = vmul.f32 %v7192_v25, %v8927_v22  ;;  %v5082_v6 = vmul.f32 %v4330_v31, %v4330_v31  ;;  %vm5190_vm10 = vcmp.eq.f32.partialorder %v8973_v20, inf }
 0x3fe   : > { %v7196_v45 = vpop.eup %7195  ;;  %v5106_v42 = vmul.f32 %v4795_v28, %v4795_v28  ;;  %v4332_v15 = vpop.f32.mrb[33].mxu0  ;;  %v5154_v58 = vmul.f32 %v7194_v30, %v8930_v9  ;;  %vm5192_vm11 = vcmp.eq.f32.partialorder %v8973_v20, 0.0  ;;  %vm5197_vm12 = vcmp.eq.f32.partialorder %v8978_v21, inf }
 0x3ff   : > { %v4797_v56 = vpop.f32.mrb[33].mxu1  ;;  %v5083_v35 = vmul.f32 %v4332_v15, %v4332_v15  ;;  %v4334_v7 = vpop.f32.mrb[34].mxu0  ;;  %v5149_v12 = vsel %vm5148_vm14, %v8927_v22, %v5147_v34  ;;  %v5161_v13 = vmul.f32 %v7196_v45, %v8934_v33  ;;  %vm5199_vm13 = vcmp.eq.f32.partialorder %v8978_v21, 0.0 }
 0x400   : > { %v5107_v61 = vmul.f32 %v4797_v56, %v4797_v56  ;;  %v4799_v36 = vpop.f32.mrb[34].mxu1  ;;  %v8998_v16 = vadd.f32 %v5106_v42, %v5082_v6  ;;  %v5084_v41 = vmul.f32 %v4334_v7, %v4334_v7  ;;  %v4336_v18 = vpop.f32.mrb[35].mxu0  ;;  %v5152_v30 = vsel %vm5150_vm15, %v5151_v19, %v5149_v12 }
 0x401   : > { %v5108_v17 = vmul.f32 %v4799_v36, %v4799_v36  ;;  %v4801_v25 = vpop.f32.mrb[35].mxu1  ;;  %v7198_v31 = vpop.eup %7197  ;;  %v5085_v15 = vmul.f32 %v4336_v18, %v4336_v18  ;;  %v5156_v34 = vsel %vm5155_vm0, %v8930_v9, %v5154_v58  ;;  %v5314_v22 = vsub.f32 %v8775_v32, %v5152_v30 }
 0x402   : > { %v9002_v28 = vadd.f32 %v5107_v61, %v5083_v35  ;;  %v5109_v56 = vmul.f32 %v4801_v25, %v4801_v25  ;;  %7207 = vrsqrt.f32 %v8998_v16  ;;  %v5159_v6 = vsel %vm5157_vm1, %v5158_v24, %v5156_v34 }
 0x403   : > { %v9009_v45 = vadd.f32 %v5108_v17, %v5084_v41  ;;  %v5315_v42 = vsub.f32 %v8784_v39, %v5159_v6  ;;  %v5163_v58 = vsel %vm5162_vm2, %v8934_v33, %v5161_v13  ;;  %v5350_v32 = vmul.f32 %v5314_v22, %v5314_v22 }
 0x404   : > { %7209 = vrsqrt.f32 %v9002_v28  ;;  %v9017_v19 = vadd.f32 %v5109_v56, %v5085_v15  ;;  %v7200_v9 = vpop.eup %7199  ;;  %v5166_v24 = vsel %vm5164_vm3, %v5165_v26, %v5163_v58  ;;  %v5168_v35 = vmul.f32 %v7198_v31, %v8939_v63  ;;  %v4340_v7 = vpop.f32.mrb[36].mxu0 }
 0x405   : > { %7211 = vrsqrt.f32 %v9009_v45  ;;  %v7202_v61 = vpop.eup %7201  ;;  %v4805_v39 = vpop.f32.mrb[36].mxu1  ;;  %v5351_v36 = vmul.f32 %v5315_v42, %v5315_v42  ;;  %v5316_v12 = vsub.f32 %v8799_v49, %v5166_v24  ;;  %v5175_v13 = vmul.f32 %v7200_v9, %v8966_v5 }
 0x406   : > { %7213 = vrsqrt.f32 %v9017_v19  ;;  %v7204_v41 = vpop.eup %7203  ;;  %v5086_v17 = vmul.f32 %v4340_v7, %v4340_v7  ;;  %v5110_v18 = vmul.f32 %v4805_v39, %v4805_v39  ;;  %v4342_v25 = vpop.f32.mrb[37].mxu0  ;;  %v5170_v33 = vsel %vm5169_vm4, %v8939_v63, %v5168_v35 }
 0x407   : > { %v4807_v30 = vpop.f32.mrb[37].mxu1  ;;  %v5182_v26 = vmul.f32 %v7202_v61, %v8969_v14  ;;  %v7206_v31 = vpop.eup %7205  ;;  %v5087_v15 = vmul.f32 %v4342_v25, %v4342_v25  ;;  %v5374_v6 = vadd.f32 %v5351_v36, %v5350_v32  ;;  %v5173_v22 = vsel %vm5171_vm5, %v5172_v8, %v5170_v33 }
 0x408   : > { %v5111_v56 = vmul.f32 %v4807_v30, %v4807_v30  ;;  %v4344_v34 = vpop.f32.mrb[38].mxu0  ;;  %v4809_v49 = vpop.f32.mrb[38].mxu1  ;;  %v9041_v42 = vadd.f32 %v5110_v18, %v5086_v17  ;;  %v5317_v61 = vsub.f32 %v8807_v54, %v5173_v22  ;;  %v5352_v36 = vmul.f32 %v5316_v12, %v5316_v12 }
 0x409   : > { %v5088_v58 = vmul.f32 %v4344_v34, %v4344_v34  ;;  %v5112_v9 = vmul.f32 %v4809_v49, %v4809_v49  ;;  %v4811_v24 = vpop.f32.mrb[39].mxu1  ;;  %v4346_v35 = vpop.f32.mrb[39].mxu0  ;;  %5375 = vadd.xlane.f32.xlu0 %v5374_v6  ;;  %v5177_v17 = vsel %vm5176_vm6, %v8966_v5, %v5175_v13  ;;  %v5184_v18 = vsel %vm5183_vm8, %v8969_v14, %v5182_v26 }
 0x40a   : > { %v9044_v7 = vadd.f32 %v5111_v56, %v5087_v15  ;;  %v5113_v39 = vmul.f32 %v4811_v24, %v4811_v24  ;;  %v5089_v32 = vmul.f32 %v4346_v35, %v4346_v35  ;;  %7215 = vrsqrt.f32 %v9041_v42 }
 0x40b   : > { %v9048_v63 = vadd.f32 %v5112_v9, %v5088_v58  ;;  %v5353_v8 = vmul.f32 %v5317_v61, %v5317_v61  ;;  %v5180_v12 = vsel %vm5178_vm7, %v5179_v38, %v5177_v17  ;;  %v5187_v13 = vsel %vm5185_vm9, %v5186_v37, %v5184_v18 }
 0x40c   : > { %7217 = vrsqrt.f32 %v9044_v7  ;;  %v9054_v54 = vadd.f32 %v5113_v39, %v5089_v32  ;;  %v7208_v25 = vpop.eup %7207  ;;  %v5318_v33 = vsub.f32 %v8816_v57, %v5180_v12  ;;  %v4350_v5 = vpop.f32.mrb[40].mxu0  ;;  %v5319_v56 = vsub.f32 %v8825_v60, %v5187_v13 }
 0x40d   : > { %7219 = vrsqrt.f32 %v9048_v63  ;;  %v5377_v30 = vadd.f32 %v5353_v8, %v5352_v36  ;;  %v4815_v38 = vpop.f32.mrb[40].mxu1  ;;  %v5189_v26 = vmul.f32 %v7204_v41, %v8973_v20  ;;  %v5196_v34 = vmul.f32 %v7206_v31, %v8978_v21  ;;  %v4352_v14 = vpop.f32.mrb[41].mxu0 }
 0x40e   : > { %v7210_v15 = vpop.eup %7209  ;;  %7221 = vrsqrt.f32 %v9054_v54  ;;  %v5090_v6 = vmul.f32 %v4350_v5, %v4350_v5  ;;  %v5114_v22 = vmul.f32 %v4815_v38, %v4815_v38  ;;  %v4817_v37 = vpop.f32.mrb[41].mxu1  ;;  %v5354_v58 = vmul.f32 %v5318_v33, %v5318_v33 }
 0x40f   : > { %v9073_v49 = vpop.eup %7211  ;;  %5378 = vadd.xlane.f32.xlu0 %v5377_v30  ;;  %v5091_v9 = vmul.f32 %v4352_v14, %v4352_v14  ;;  %v5115_v24 = vmul.f32 %v4817_v37, %v4817_v37  ;;  %v4354_v35 = vpop.f32.mrb[42].mxu0  ;;  %v5355_v61 = vmul.f32 %v5319_v56, %v5319_v56  ;;  %v5191_v41 = vsel %vm5190_vm10, %v8973_v20, %v5189_v26 }
 0x410   : > { %v9076_v57 = vpop.eup %7213  ;;  %v4819_v60 = vpop.f32.mrb[42].mxu1  ;;  %v9081_v31 = vadd.f32 %v5114_v22, %v5090_v6  ;;  %v5092_v39 = vmul.f32 %v4354_v35, %v4354_v35  ;;  %v5194_v17 = vsel %vm5192_vm11, %v5193_v29, %v5191_v41  ;;  %v5198_v5 = vsel %vm5197_vm12, %v8978_v21, %v5196_v34 }
 0x411   : > { %v5116_v32 = vmul.f32 %v4819_v60, %v4819_v60  ;;  %v4821_v36 = vpop.f32.mrb[43].mxu1  ;;  %v4356_v8 = vpop.f32.mrb[43].mxu0  ;;  %v9087_v12 = vadd.f32 %v5115_v24, %v5091_v9  ;;  %v5380_v30 = vadd.f32 %v5355_v61, %v5354_v58  ;;  %v5200_v38 = vand.u32 2147483648, %v8978_v21 }
 0x412   : > { %v5117_v18 = vmul.f32 %v4821_v36, %v4821_v36  ;;  %v5093_v13 = vmul.f32 %v4356_v8, %v4356_v8  ;;  %7223 = vrsqrt.f32 %v9081_v31  ;;  %v5320_v29 = vsub.f32 %v8835_v1, %v5194_v17 }
 0x413   : > { %v9090_v33 = vadd.f32 %v5116_v32, %v5092_v39  ;;  %7225 = vrsqrt.f32 %v9087_v12  ;;  %5381 = vadd.xlane.f32.xlu1 %v5380_v30  ;;  %v5203_v56 = vmul.f32 %v7208_v25, %v8998_v16  ;;  %v5201_v6 = vsel %vm5199_vm13, %v5200_v38, %v5198_v5 }
 0x414   : > { %v9097_v20 = vadd.f32 %v5117_v18, %v5093_v13  ;;  %v9101_v26 = vpop.eup %7215  ;;  %vm5204_vm14 = vcmp.eq.f32.partialorder %v8998_v16, inf  ;;  %vm5206_vm15 = vcmp.eq.f32.partialorder %v8998_v16, 0.0  ;;  %v5321_v22 = vsub.f32 %v8841_v4, %v5201_v6  ;;  %v4360_v14 = vpop.f32.mrb[44].mxu0 }
 0x415   : > { %7227 = vrsqrt.f32 %v9090_v33  ;;  %v5356_v1 = vmul.f32 %v5320_v29, %v5320_v29  ;;  %v4825_v25 = vpop.f32.mrb[44].mxu1  ;;  %v5205_v37 = vsel %vm5204_vm14, %v8998_v16, %v5203_v56  ;;  %v5094_v9 = vmul.f32 %v4360_v14, %v4360_v14  ;;  %v4362_v24 = vpop.f32.mrb[45].mxu0 }
 0x416   : > { %v9108_v34 = vpop.eup %7217  ;;  %7229 = vrsqrt.f32 %v9097_v20  ;;  %v5118_v21 = vmul.f32 %v4825_v25, %v4825_v25  ;;  %v4827_v35 = vpop.f32.mrb[45].mxu1  ;;  %v5207_v60 = vand.u32 2147483648, %v8998_v16  ;;  %v5210_v61 = vmul.f32 %v7210_v15, %v9002_v28 }
 0x417   : > { %v9113_v58 = vpop.eup %7219  ;;  %v5357_v39 = vmul.f32 %v5321_v22, %v5321_v22  ;;  %v5095_v32 = vmul.f32 %v4362_v24, %v4362_v24  ;;  %v5119_v4 = vmul.f32 %v4827_v35, %v4827_v35  ;;  %v4364_v36 = vpop.f32.mrb[46].mxu0  ;;  %vm5211_vm0 = vcmp.eq.f32.partialorder %v9002_v28, inf }
 0x418   : > { %v9117_v41 = vpop.eup %7221  ;;  %v4829_v8 = vpop.f32.mrb[46].mxu1  ;;  %v9120_v17 = vadd.f32 %v5118_v21, %v5094_v9  ;;  %v5096_v18 = vmul.f32 %v4364_v36, %v4364_v36  ;;  %v5208_v5 = vsel %vm5206_vm15, %v5207_v60, %v5205_v37  ;;  %v5212_v6 = vsel %vm5211_vm0, %v9002_v28, %v5210_v61 }
 0x419   : > { %v5120_v30 = vmul.f32 %v4829_v8, %v4829_v8  ;;  %v4831_v13 = vpop.f32.mrb[47].mxu1  ;;  %v4366_v38 = vpop.f32.mrb[47].mxu0  ;;  %v5383_v29 = vadd.f32 %v5357_v39, %v5356_v1  ;;  %v9124_v15 = vadd.f32 %v5119_v4, %v5095_v32  ;;  %vm5213_vm1 = vcmp.eq.f32.partialorder %v9002_v28, 0.0 }
 0x41a   : > { %v5121_v56 = vmul.f32 %v4831_v13, %v4831_v13  ;;  %7231 = vrsqrt.f32 %v9120_v17  ;;  %v5214_v14 = vand.u32 2147483648, %v9002_v28  ;;  %v5322_v16 = vsub.f32 %v8848_v40, %v5208_v5 }
 0x41b   : > { %v9128_v22 = vadd.f32 %v5120_v30, %v5096_v18  ;;  %5384 = vadd.xlane.f32.xlu1 %v5383_v29  ;;  %7233 = vrsqrt.f32 %v9124_v15  ;;  %v5097_v25 = vmul.f32 %v4366_v38, %v4366_v38  ;;  %v5217_v1 = vmul.f32 %v9073_v49, %v9009_v45 }
 0x41c   : > { %v7224_v37 = vpop.eup %7223  ;;  %v5215_v9 = vsel %vm5213_vm1, %v5214_v14, %v5212_v6  ;;  %vm5218_vm2 = vcmp.eq.f32.partialorder %v9009_v45, inf  ;;  %vm5220_vm3 = vcmp.eq.f32.partialorder %v9009_v45, 0.0  ;;  %v5358_v24 = vmul.f32 %v5322_v16, %v5322_v16 }
 0x41d   : > { %7235 = vrsqrt.f32 %v9128_v22  ;;  %v9139_v21 = vpop.eup %7225  ;;  %v5323_v28 = vsub.f32 %v8860_v59, %v5215_v9  ;;  %v9142_v35 = vadd.f32 %v5121_v56, %v5097_v25  ;;  %v5219_v40 = vsel %vm5218_vm2, %v9009_v45, %v5217_v1 }
 0x41e   : > { %v5221_v49 = vand.u32 2147483648, %v9009_v45  ;;  %v5224_v61 = vmul.f32 %v9076_v57, %v9017_v19  ;;  %vm5225_vm4 = vcmp.eq.f32.partialorder %v9017_v19, inf  ;;  %vm5227_vm5 = vcmp.eq.f32.partialorder %v9017_v19, 0.0 }
 0x41f   : > { %v9145_v60 = vpop.eup %7227  ;;  %v5359_v32 = vmul.f32 %v5323_v28, %v5323_v28  ;;  %7237 = vrsqrt.f32 %v9142_v35  ;;  %v5228_v59 = vand.u32 2147483648, %v9017_v19  ;;  %v5231_v4 = vmul.f32 %v9101_v26, %v9041_v42 }
 0x420   : > { %v9152_v39 = vpop.eup %7229  ;;  %v5222_v36 = vsel %vm5220_vm3, %v5221_v49, %v5219_v40  ;;  %v5226_v8 = vsel %vm5225_vm4, %v9017_v19, %v5224_v61  ;;  %vm5232_vm6 = vcmp.eq.f32.partialorder %v9041_v42, inf  ;;  %vm5234_vm7 = vcmp.eq.f32.partialorder %v9041_v42, 0.0 }
 0x421   : > { %v5386_v57 = vadd.f32 %v5359_v32, %v5358_v24  ;;  %v5229_v18 = vsel %vm5227_vm5, %v5228_v59, %v5226_v8  ;;  %v5324_v30 = vsub.f32 %v8866_v23, %v5222_v36  ;;  %v5233_v13 = vsel %vm5232_vm6, %v9041_v42, %v5231_v4 }
 0x422   : > { %v5325_v5 = vsub.f32 %v8871_v27, %v5229_v18  ;;  %v5235_v38 = vand.u32 2147483648, %v9041_v42  ;;  %v5238_v45 = vmul.f32 %v9108_v34, %v9044_v7  ;;  %vm5239_vm8 = vcmp.eq.f32.partialorder %v9044_v7, inf }
 0x423   : > { %5387 = vadd.xlane.f32.xlu0 %v5386_v57  ;;  %v5360_v19 = vmul.f32 %v5324_v30, %v5324_v30  ;;  %vm5241_vm9 = vcmp.eq.f32.partialorder %v9044_v7, 0.0  ;;  %v5242_v26 = vand.u32 2147483648, %v9044_v7  ;;  %v5245_v23 = vmul.f32 %v9113_v58, %v9048_v63 }
 0x424   : > { %v7232_v29 = vpop.eup %7231  ;;  %v5361_v56 = vmul.f32 %v5325_v5, %v5325_v5  ;;  %v5236_v27 = vsel %vm5234_vm7, %v5235_v38, %v5233_v13  ;;  %v5240_v6 = vsel %vm5239_vm8, %v9044_v7, %v5238_v45  ;;  %vm5246_vm10 = vcmp.eq.f32.partialorder %v9048_v63, inf }
 0x425   : > { %v9178_v34 = vpop.eup %7233  ;;  %v5243_v14 = vsel %vm5241_vm9, %v5242_v26, %v5240_v6  ;;  %v5326_v16 = vsub.f32 %v8877_v3, %v5236_v27  ;;  %v5247_v25 = vsel %vm5246_vm10, %v9048_v63, %v5245_v23  ;;  %vm5248_vm11 = vcmp.eq.f32.partialorder %v9048_v63, 0.0 }
 0x426   : > { %v5389_v58 = vadd.f32 %v5361_v56, %v5360_v19  ;;  %v5327_v9 = vsub.f32 %v8889_v44, %v5243_v14  ;;  %v5249_v42 = vand.u32 2147483648, %v9048_v63  ;;  %v5252_v7 = vmul.f32 %v9117_v41, %v9054_v54 }
 0x427   : > { %v9183_v1 = vpop.eup %7235  ;;  %v5362_v28 = vmul.f32 %v5326_v16, %v5326_v16  ;;  %vm5253_vm12 = vcmp.eq.f32.partialorder %v9054_v54, inf  ;;  %vm5255_vm13 = vcmp.eq.f32.partialorder %v9054_v54, 0.0  ;;  %v5256_v3 = vand.u32 2147483648, %v9054_v54 }
 0x428   : > { %5390 = vadd.xlane.f32.xlu1 %v5389_v58  ;;  %v5363_v24 = vmul.f32 %v5327_v9, %v5327_v9  ;;  %v5250_v40 = vsel %vm5248_vm11, %v5249_v42, %v5247_v25  ;;  %v5254_v49 = vsel %vm5253_vm12, %v9054_v54, %v5252_v7  ;;  %v5259_v61 = vmul.f32 %v7224_v37, %v9081_v31 }
 0x429   : > { %v9194_v44 = vpop.eup %7237  ;;  %v5257_v63 = vsel %vm5255_vm13, %v5256_v3, %v5254_v49  ;;  %v5328_v32 = vsub.f32 %v8898_v46, %v5250_v40  ;;  %vm5260_vm14 = vcmp.eq.f32.partialorder %v9081_v31, inf  ;;  %vm5262_vm15 = vcmp.eq.f32.partialorder %v9081_v31, 0.0 }
 0x42a   : > { %v5392_v41 = vadd.f32 %v5363_v24, %v5362_v28  ;;  %v5329_v59 = vsub.f32 %v8907_v10, %v5257_v63  ;;  %v5261_v4 = vsel %vm5260_vm14, %v9081_v31, %v5259_v61  ;;  %v5263_v36 = vand.u32 2147483648, %v9081_v31  ;;  %v5338_v63 = vld [vmem:[%s9369_s4] sm:$0xff] }
 0x42b   : > { %v5364_v8 = vmul.f32 %v5328_v32, %v5328_v32  ;;  %v5266_v54 = vmul.f32 %v9139_v21, %v9087_v12  ;;  %vm5267_vm0 = vcmp.eq.f32.partialorder %v9087_v12, inf  ;;  %vm5269_vm1 = vcmp.eq.f32.partialorder %v9087_v12, 0.0 }
 0x42c   : > { %5393 = vadd.xlane.f32.xlu0 %v5392_v41  ;;  %v5365_v46 = vmul.f32 %v5329_v59, %v5329_v59  ;;  %v5264_v37 = vsel %vm5262_vm15, %v5263_v36, %v5261_v4  ;;  %v5270_v57 = vand.u32 2147483648, %v9087_v12  ;;  %v5273_v10 = vmul.f32 %v9145_v60, %v9090_v33  ;;  %v5340_v59 = vld [vmem:[%s9369_s4 + $0x10] sm:$0xff] }
 0x42d   : > { %v5268_v18 = vsel %vm5267_vm0, %v9087_v12, %v5266_v54  ;;  %v5330_v31 = vsub.f32 %v8912_v11, %v5264_v37  ;;  %vm5274_vm2 = vcmp.eq.f32.partialorder %v9090_v33, inf  ;;  %vm5276_vm3 = vcmp.eq.f32.partialorder %v9090_v33, 0.0  ;;  %v5342_v37 = vld [vmem:[%s9369_s4 + $0x20] sm:$0xff] }
 0x42e   : > { %v5395_v21 = vadd.f32 %v5365_v46, %v5364_v8  ;;  %v5271_v30 = vsel %vm5269_vm1, %v5270_v57, %v5268_v18  ;;  %v5275_v13 = vsel %vm5274_vm2, %v9090_v33, %v5273_v10  ;;  %v5277_v5 = vand.u32 2147483648, %v9090_v33  ;;  %v5341_v8 = vld [vmem:[%s9369_s4 + $0x18] sm:$0xff]  ;;  %v5343_v18 = vld [vmem:[%s9369_s4 + $0x28] sm:$0xff] }
 0x42f   : > { %v5331_v38 = vsub.f32 %v8914_v62, %v5271_v30  ;;  %v5366_v45 = vmul.f32 %v5330_v31, %v5330_v31  ;;  %v5280_v60 = vmul.f32 %v9152_v39, %v9097_v20  ;;  %vm5281_vm4 = vcmp.eq.f32.partialorder %v9097_v20, inf  ;;  %v5344_v30 = vld [vmem:[%s9369_s4 + $0x30] sm:$0xff] }
 0x430   : > { %vm5064_vm5 = vcmp.eq.f32.partialorder %v8655_v52, 0.0  ;;  %vm5069_vm6 = vcmp.eq.f32.partialorder %v8657_v53, inf  ;;  %5396 = vadd.xlane.f32.xlu1 %v5395_v21  ;;  %v5278_v11 = vsel %vm5276_vm3, %v5277_v5, %v5275_v13  ;;  %vm5283_vm7 = vcmp.eq.f32.partialorder %v9097_v20, 0.0 }
 0x431   : > { %v5284_v12 = vand.u32 2147483648, %v9097_v20  ;;  %v5287_v33 = vmul.f32 %v7232_v29, %v9120_v17  ;;  %v5367_v19 = vmul.f32 %v5331_v38, %v5331_v38  ;;  %v5282_v62 = vsel %vm5281_vm4, %v9097_v20, %v5280_v60  ;;  %v5345_v38 = vld [vmem:[%s9369_s4 + $0x38] sm:$0xff] }
 0x432   : > { %v5332_v26 = vsub.f32 %v8918_v2, %v5278_v11  ;;  %vm5288_vm8 = vcmp.eq.f32.partialorder %v9120_v17, inf  ;;  %vm5290_vm9 = vcmp.eq.f32.partialorder %v9120_v17, 0.0  ;;  %v5291_v56 = vand.u32 2147483648, %v9120_v17  ;;  %v5346_v11 = vld [vmem:[%s9369_s4 + $0x40] sm:$0xff] }
 0x433   : > { %v5285_v39 = vsel %vm5283_vm7, %v5284_v12, %v5282_v62  ;;  %v5289_v23 = vsel %vm5288_vm8, %v9120_v17, %v5287_v33  ;;  %v5398_v27 = vadd.f32 %v5367_v19, %v5366_v45  ;;  %v5294_v29 = vmul.f32 %v9178_v34, %v9124_v15  ;;  %v5347_v19 = vld [vmem:[%s9369_s4 + $0x48] sm:$0xff] }
 0x434   : > { %v5333_v6 = vsub.f32 %v8946_v47, %v5285_v39  ;;  %v5368_v14 = vmul.f32 %v5332_v26, %v5332_v26  ;;  %v5292_v16 = vsel %vm5290_vm9, %v5291_v56, %v5289_v23  ;;  %vm5295_vm10 = vcmp.eq.f32.partialorder %v9124_v15, inf  ;;  %v5348_v39 = vld [vmem:[%s9369_s4 + $0x50] sm:$0xff] }
 0x435   : > { %vm5297_vm11 = vcmp.eq.f32.partialorder %v9124_v15, 0.0  ;;  %v5298_v2 = vand.u32 2147483648, %v9124_v15  ;;  %5399 = vadd.xlane.f32.xlu0 %v5398_v27  ;;  %v5296_v25 = vsel %vm5295_vm10, %v9124_v15, %v5294_v29  ;;  %v5334_v17 = vsub.f32 %v8952_v50, %v5292_v16  ;;  %v5349_v27 = vld [vmem:[%s9369_s4 + $0x58] sm:$0xff] }
 0x436   : > { %v5369_v20 = vmul.f32 %v5333_v6, %v5333_v6  ;;  %v5301_v47 = vmul.f32 %v9183_v1, %v9128_v22  ;;  %vm5302_vm12 = vcmp.eq.f32.partialorder %v9128_v22, inf  ;;  %vm5304_vm13 = vcmp.eq.f32.partialorder %v9128_v22, 0.0 }
 0x437   : > { %v5299_v58 = vsel %vm5297_vm11, %v5298_v2, %v5296_v25  ;;  %v5305_v34 = vand.u32 2147483648, %v9128_v22  ;;  %v5370_v7 = vmul.f32 %v5334_v17, %v5334_v17  ;;  %v5066_v50 = vsel %vm5064_vm5, %v5065_v43, %v8957_v55 }
 0x438   : > { %v5401_v9 = vadd.f32 %v5369_v20, %v5368_v14  ;;  %v5335_v42 = vsub.f32 %v8954_v51, %v5299_v58  ;;  %v5303_v28 = vsel %vm5302_vm12, %v9128_v22, %v5301_v47  ;;  %v5070_v15 = vsel %vm5069_vm6, %v8657_v53, %v8961_v48 }
 0x439   : > { %v5306_v1 = vsel %vm5304_vm13, %v5305_v34, %v5303_v28  ;;  %v5308_v3 = vmul.f32 %v9194_v44, %v9142_v35  ;;  %vm5309_vm14 = vcmp.eq.f32.partialorder %v9142_v35, inf  ;;  %v5312_v22 = vand.u32 2147483648, %v9142_v35 }
 0x43a   : > { %5402 = vadd.xlane.f32.xlu1 %v5401_v9  ;;  %v5371_v51 = vmul.f32 %v5335_v42, %v5335_v42  ;;  %v5336_v24 = vsub.f32 %v5066_v50, %v5306_v1  ;;  %vm5071_vm15 = vcmp.eq.f32.partialorder %v8657_v53, 0.0  ;;  %vm5311_vm0 = vcmp.eq.f32.partialorder %v9142_v35, 0.0  ;;  %v5339_v53 = vld [vmem:[%s9369_s4 + $0x8] sm:$0xff] }
 0x43b   : > { %v5310_v52 = vsel %vm5309_vm14, %v9142_v35, %v5308_v3  ;;  %v5073_v43 = vsel %vm5071_vm15, %v5072_v0, %v5070_v15  ;;  %vm5422_vm1 = vcmask 7168  }
 0x43c   : > { %v5404_v55 = vadd.f32 %v5371_v51, %v5370_v7  ;;  %v5313_v48 = vsel %vm5311_vm0, %v5312_v22, %v5310_v52  ;;  %v5372_v49 = vmul.f32 %v5336_v24, %v5336_v24 }
 0x43d   : > { %v5337_v40 = vsub.f32 %v5073_v43, %v5313_v48 }
 0x43e   : > { %5405 = vadd.xlane.f32.xlu0 %v5404_v55 }
 0x43f   : > { %v5373_v61 = vmul.f32 %v5337_v40, %v5337_v40 }
 0x441   : > { %v5407_v44 = vadd.f32 %v5373_v61, %v5372_v49 }
 0x443   : > { %5408 = vadd.xlane.f32.xlu1 %v5407_v44 }
 0x496   : > { %v5376_v32 = vpop.xlane.xlu0 %5375 }
 0x497   : > { %v5410_v41 = vadd.f32 %v5376_v32, %v5338_v63 }
 0x499   : > { %5423 = vst.msk [vmem:[%s9369_s4] sm:$0xff] %vm5422_vm1, %v5410_v41 }
 0x49c   : > { %v5379_v0 = vpop.xlane.xlu0 %5378 }
 0x49d   : > { %v5411_v35 = vadd.f32 %v5379_v0, %v5339_v53 }
 0x49f   : > { %5424 = vst.msk [vmem:[%s9369_s4 + $0x8] sm:$0xff] %vm5422_vm1, %v5411_v35 }
 0x4a0   : > { %v5382_v4 = vpop.xlane.xlu1 %5381 }
 0x4a1   : > { %v5412_v36 = vadd.f32 %v5382_v4, %v5340_v59 }
 0x4a3   : > { %5425 = vst.msk [vmem:[%s9369_s4 + $0x10] sm:$0xff] %vm5422_vm1, %v5412_v36 }
 0x4a8   : > { %v5385_v54 = vpop.xlane.xlu1 %5384 }
 0x4a9   : > { %v5413_v46 = vadd.f32 %v5385_v54, %v5341_v8 }
 0x4ab   : > { %5426 = vst.msk [vmem:[%s9369_s4 + $0x18] sm:$0xff] %vm5422_vm1, %v5413_v46 }
 0x4b0   : > { %v5388_v57 = vpop.xlane.xlu0 %5387 }
 0x4b1   : > { %v5414_v10 = vadd.f32 %v5388_v57, %v5342_v37 }
 0x4b3   : > { %5427 = vst.msk [vmem:[%s9369_s4 + $0x20] sm:$0xff] %vm5422_vm1, %v5414_v10 }
 0x4b5   : > { %v5391_v31 = vpop.xlane.xlu1 %5390 }
 0x4b6   : > { %v5415_v21 = vadd.f32 %v5391_v31, %v5343_v18 }
 0x4b8   : > { %5428 = vst.msk [vmem:[%s9369_s4 + $0x28] sm:$0xff] %vm5422_vm1, %v5415_v21 }
 0x4b9   : > { %v5394_v13 = vpop.xlane.xlu0 %5393 }
 0x4ba   : > { %v5416_v5 = vadd.f32 %v5394_v13, %v5344_v30 }
 0x4bc   : > { %5429 = vst.msk [vmem:[%s9369_s4 + $0x30] sm:$0xff] %vm5422_vm1, %v5416_v5 }
 0x4bd   : > { %v5397_v45 = vpop.xlane.xlu1 %5396 }
 0x4be   : > { %v5417_v60 = vadd.f32 %v5397_v45, %v5345_v38 }
 0x4c0   : > { %5430 = vst.msk [vmem:[%s9369_s4 + $0x38] sm:$0xff] %vm5422_vm1, %v5417_v60 }
 0x4c2   : > { %v5400_v12 = vpop.xlane.xlu0 %5399 }
 0x4c3   : > { %v5418_v33 = vadd.f32 %v5400_v12, %v5346_v11 }
 0x4c5   : > { %5431 = vst.msk [vmem:[%s9369_s4 + $0x40] sm:$0xff] %vm5422_vm1, %v5418_v33 }
 0x4c7   : > { %v5403_v62 = vpop.xlane.xlu1 %5402 }
 0x4c8   : > { %v5419_v26 = vadd.f32 %v5403_v62, %v5347_v19 }
 0x4ca   : > { %5432 = vst.msk [vmem:[%s9369_s4 + $0x48] sm:$0xff] %vm5422_vm1, %v5419_v26 }
 0x4cb   : > { %v5406_v23 = vpop.xlane.xlu0 %5405 }
 0x4cc   : > { %v5420_v56 = vadd.f32 %v5406_v23, %v5348_v39 }
 0x4ce   : > { %5433 = vst.msk [vmem:[%s9369_s4 + $0x50] sm:$0xff] %vm5422_vm1, %v5420_v56 }
 0x4d0   : > { %v5409_v6 = vpop.xlane.xlu1 %5408 }
 0x4d1   : > { %v5421_v14 = vadd.f32 %v5409_v6, %v5349_v27 }
 0x4d3   : > { %5434 = vst.msk [vmem:[%s9369_s4 + $0x58] sm:$0xff] %vm5422_vm1, %v5421_v14 }
 0x4d4 PF: > { %s16_s20 = sadd.s32 1, %s7733_s20   ;;  %s9403_s8 = sld [smem:[#allocation12_spill]] }
 0x4d5   : > { %p13_p1 = scmp.ge.s32.totalorder %s16_s20, 7   ;;  %s9404_s10 = sld [smem:[#allocation11_spill]] }
 0x4d6   : > { %s9405_s15 = smov %s7717_s16  ;;  %s9406_s16 = smov %s7721_s17 }
 0x4d7   : > { %s9408_s18 = smov %s7729_s19  ;;  %15 = sbr.rel (!%p13_p1) target bundleno = 7 (0x7), region = 100 }
 0x4da   : > { %s9407_s17 = smov %s9403_s8 }
 0x4db   : > { %s9409_s19 = smov %s9404_s10 }
 0x4de   :  { %5457 = vsyncpa [#allocation3], 1 }
 0x4df   :  { %5459 = vsyncpa [#allocation3 + $0x1], 1 }
 0x4e0   :  { %5460 = vsyncpa [#allocation5], 1 }

</bundles_post_ra>
